<compile_context>
chip_gen: v7x
topology: tpu7x:2x2x1
jax: 0.10.0
libtpu: 0.0.40
codegen_flags: <defaults>
</compile_context>

<pallas_src>
import functools
import math

import jax
import jax.numpy as jnp
from jax import lax
from jax.experimental import pallas as pl
from jax.experimental.pallas import tpu as pltpu

_GN_EPS = 1e-5  # PyTorch F.group_norm default eps


def _round_up(x, m):
    return ((x + m - 1) // m) * m


def _make_fused_kernel(kernel_sizes, bt, T, C, pad_a, residual_scale):
    """Fused kernel over all blocks; bt = samples per grid step (static)."""
    nb = len(kernel_sizes)
    Tp = pad_a + T                      # per-sample slab length (8-aligned prefix)
    inv_n = 1.0 / float(T * C)

    def kernel(*refs):
        x_ref = refs[0]                                  # (bt*T, C) f32
        param_refs = refs[1:1 + 4 * nb]
        o_ref = refs[1 + 4 * nb]                         # (bt*T, C) f32
        xpad_ref = refs[2 + 4 * nb]                      # (bt*Tp, C) f32 slab
        xbf_ref = refs[3 + 4 * nb]                       # (bt*Tp, C) bf16 matmul copy

        # Load input into the padded slab; zero the aligned causal prefix once
        # (those rows are never overwritten, so every block reuses them).
        for b in range(bt):
            base = b * Tp
            if pad_a:
                xpad_ref[base:base + pad_a, :] = jnp.zeros((pad_a, C), jnp.float32)
            xpad_ref[base + pad_a:base + Tp, :] = (
                x_ref[b * T:(b + 1) * T, :].astype(jnp.float32))

        for i, k in enumerate(kernel_sizes):
            w_ref, b_ref, g_ref, beta_ref = param_refs[4 * i:4 * i + 4]

            # bf16 copy of the (aligned, contiguous) slab: MXU operand for all
            # k taps of this block.  Residual / GN math stays f32.
            xbf_ref[...] = xpad_ref[...].astype(jnp.bfloat16)

            # Causal conv = k per-tap matmuls over the full padded slab
            # (M = bt*Tp, aligned, no im2col staging); shifted per-sample
            # output windows are accumulated in f32.  Pad rows produce a few
            # wasted output rows that are simply never extracted.
            acc = [None] * bt
            for j in range(k):
                wj = w_ref[j * C:(j + 1) * C, :]                   # (C, C) bf16
                yf = jnp.dot(xbf_ref[...], wj,
                             preferred_element_type=jnp.float32)   # (bt*Tp, C)
                s = pad_a - (k - 1) + j
                for b in range(bt):
                    win = yf[b * Tp + s:b * Tp + s + T, :]
                    acc[b] = win if acc[b] is None else acc[b] + win

            bias = b_ref[...]                                      # (1, C)
            gamma = g_ref[...]
            beta = beta_ref[...]
            for b in range(bt):
                y = acc[b] + bias                                  # (T, C) f32
                # GroupNorm(num_groups=1) per sample, two-pass statistics.
                mean = jnp.sum(jnp.sum(y, axis=1, keepdims=True),
                               axis=0, keepdims=True) * inv_n
                d = y - mean
                var = jnp.sum(jnp.sum(d * d, axis=1, keepdims=True),
                              axis=0, keepdims=True) * inv_n
                y = d * lax.rsqrt(var + _GN_EPS)
                y = y * gamma + beta                               # affine
                y = jnp.maximum(y, 0.0)                            # ReLU
                # Residual read right before the add (short live range);
                # rows [pad_a, pad_a+T) of the sample slab are 8-aligned.
                row = b * Tp + pad_a
                xpad_ref[row:row + T, :] = (
                    (y + xpad_ref[row:row + T, :]) * residual_scale)

        for b in range(bt):
            row = b * Tp + pad_a
            o_ref[b * T:(b + 1) * T, :] = xpad_ref[row:row + T, :].astype(o_ref.dtype)

    return kernel


def aggregator_forward(z_nct, params, kernel_sizes, residual_scale,
                       *, batch_tiles=1):
    """Full Aggregator forward. z_nct: (B, C, T) PyTorch layout.

    batch_tiles=1 (default) for single-TensorCore chips (v5e/v6e);
    batch_tiles=2 on v7x if each half still gives enough matmul M.
    """
    B, C, T = z_nct.shape
    nb = len(kernel_sizes)
    assert len(params) == nb
    assert C % 128 == 0, "num_filters must map to whole 128-lane vregs"
    assert B % batch_tiles == 0
    bt = B // batch_tiles
    kmax = max(kernel_sizes)
    pad_a = _round_up(max(kmax - 1, 0), 8)       # sublane-aligned causal pad
    Tp = pad_a + T

    # (B, C, T) -> (B*T, C): channels on lanes, time on sublanes.
    x = jnp.transpose(z_nct, (0, 2, 1)).reshape(B * T, C).astype(jnp.float32)

    kernel = _make_fused_kernel(kernel_sizes, bt, T, C, pad_a,
                                float(residual_scale))

    in_specs = [pl.BlockSpec((bt * T, C), lambda i: (i, 0))]
    args = [x]
    for (w_im, b, gamma, beta), k in zip(params, kernel_sizes):
        in_specs += [
            pl.BlockSpec((k * C, C), lambda i: (0, 0)),   # conv weight (bf16)
            pl.BlockSpec((1, C), lambda i: (0, 0)),       # conv bias
            pl.BlockSpec((1, C), lambda i: (0, 0)),       # GN gamma
            pl.BlockSpec((1, C), lambda i: (0, 0)),       # GN beta
        ]
        args += [w_im.astype(jnp.bfloat16), b, gamma, beta]

    # VMEM budget (scratch + double-buffered I/O blocks + weights).
    slab_bytes = bt * Tp * C * (4 + 2)
    io_bytes = 2 * 2 * bt * T * C * 4
    w_bytes = 2 * sum(k * C * C * 2 + 3 * C * 4 for k in kernel_sizes)
    vmem_limit = int(min(128 * 2**20,
                         max(32 * 2**20, 1.5 * (slab_bytes + io_bytes + w_bytes))))

    flops = 2 * B * T * C * C * sum(kernel_sizes)
    bytes_accessed = (2 * B * T * C * 4
                      + sum(k * C * C * 2 + 3 * C * 4 for k in kernel_sizes))

    out2d = pl.pallas_call(
        kernel,
        out_shape=jax.ShapeDtypeStruct((B * T, C), jnp.float32),
        grid=(batch_tiles,),
        in_specs=in_specs,
        out_specs=pl.BlockSpec((bt * T, C), lambda i: (i, 0)),
        scratch_shapes=[
            pltpu.VMEM((bt * Tp, C), jnp.float32),   # running activation slab
            pltpu.VMEM((bt * Tp, C), jnp.bfloat16),  # bf16 matmul operand
        ],
        input_output_aliases={0: 0},                 # residual -> output
        compiler_params=pltpu.CompilerParams(
            dimension_semantics=(("parallel",) if batch_tiles > 1
                                 else ("arbitrary",)),
            vmem_limit_bytes=vmem_limit),
        cost_estimate=pl.CostEstimate(flops=int(flops), transcendentals=0,
                                      bytes_accessed=int(bytes_accessed)),
    )(*args)

    out = out2d.reshape(B, T, C)
    return jnp.transpose(out, (0, 2, 1))             # back to (B, C, T)


def init_params(key, num_blocks, C, kernel_sizes):
    """Deterministic init matching Aggregator.__init__, stored kernel-ready."""
    params = []
    for i in range(num_blocks):
        k = kernel_sizes[i]
        key, sub = jax.random.split(key)
        fan_in = C * k
        std = math.sqrt(2.0 / fan_in)                  # kaiming_normal_
        w_torch = jax.random.normal(sub, (C, C, k), jnp.float32) * std
        # (C_out, C_in, k) -> (k*C_in, C_out), pre-cast ONCE to bf16.
        w_im = jnp.transpose(w_torch, (2, 1, 0)).reshape(k * C, C)
        w_im = w_im.astype(jnp.bfloat16)
        b = jnp.zeros((1, C), jnp.float32)             # conv bias
        gamma = jnp.ones((1, C), jnp.float32)          # GN weight
        beta = jnp.zeros((1, C), jnp.float32)          # GN bias
        params.append((w_im, b, gamma, beta))
    return params


def reference_forward(z_nct, params, kernel_sizes, residual_scale):
    """Pure-JAX reference mirroring the kernel numerics (bf16 conv operands,
    f32 accumulation / GroupNorm / residual), same structure as the PyTorch
    Aggregator: causal conv -> GroupNorm(1) -> ReLU -> scaled residual."""
    x = jnp.transpose(z_nct, (0, 2, 1)).astype(jnp.float32)   # (B, T, C)
    B, T, C = x.shape
    for (w_im, b, gamma, beta), k in zip(params, kernel_sizes):
        residual = x
        xp = jnp.pad(x, ((0, 0), (k - 1, 0), (0, 0))).astype(jnp.bfloat16)
        w_kcc = w_im.reshape(k, C, C)                          # bf16
        y = sum(jnp.einsum('btc,cd->btd', xp[:, j:j + T, :], w_kcc[j],
                           preferred_element_type=jnp.float32)
                for j in range(k))
        y = y + b.reshape(1, 1, C)
        mean = jnp.mean(y, axis=(1, 2), keepdims=True)
        var = jnp.mean((y - mean) ** 2, axis=(1, 2), keepdims=True)
        y = (y - mean) * lax.rsqrt(var + _GN_EPS)
        y = y * gamma.reshape(1, 1, C) + beta.reshape(1, 1, C)
        y = jnp.maximum(y, 0.0)
        x = (y + residual) * residual_scale
    return jnp.transpose(x, (0, 2, 1))


if __name__ == "__main__":
    B, C, T = 2, 128, 16                 # batch, num_filters, sequence length
    num_blocks = 5
    kernel_sizes = [2, 3, 4, 5, 6, 7][:num_blocks]
    residual_scale = math.sqrt(0.5)      # module stores sqrt(residual_scale)

    key = jax.random.PRNGKey(0)
    key, zk = jax.random.split(key)
    z = jax.random.normal(zk, (B, C, T), jnp.float32)      # PyTorch NCW layout
    params = init_params(key, num_blocks, C, kernel_sizes)

    fwd = jax.jit(functools.partial(aggregator_forward,
                                    kernel_sizes=kernel_sizes,
                                    residual_scale=residual_scale))
    out = jax.block_until_ready(fwd(z, params))

    ref = reference_forward(z, params, kernel_sizes, residual_scale)
    assert out.shape == (B, C, T)
    assert bool(jnp.allclose(out, ref, atol=2e-3, rtol=2e-3))
    print("KERNEL_OK")
</pallas_src>

<mosaic_0001>
module attributes {stable_mosaic.version = 11 : i64} {
  func.func @kernel(%arg0: i32, %arg1: memref<32x128xf32, #tpu.memory_space<vmem>>, %arg2: memref<256x128xbf16, #tpu.memory_space<vmem>>, %arg3: memref<1x128xf32, #tpu.memory_space<vmem>>, %arg4: memref<1x128xf32, #tpu.memory_space<vmem>>, %arg5: memref<1x128xf32, #tpu.memory_space<vmem>>, %arg6: memref<384x128xbf16, #tpu.memory_space<vmem>>, %arg7: memref<1x128xf32, #tpu.memory_space<vmem>>, %arg8: memref<1x128xf32, #tpu.memory_space<vmem>>, %arg9: memref<1x128xf32, #tpu.memory_space<vmem>>, %arg10: memref<512x128xbf16, #tpu.memory_space<vmem>>, %arg11: memref<1x128xf32, #tpu.memory_space<vmem>>, %arg12: memref<1x128xf32, #tpu.memory_space<vmem>>, %arg13: memref<1x128xf32, #tpu.memory_space<vmem>>, %arg14: memref<640x128xbf16, #tpu.memory_space<vmem>>, %arg15: memref<1x128xf32, #tpu.memory_space<vmem>>, %arg16: memref<1x128xf32, #tpu.memory_space<vmem>>, %arg17: memref<1x128xf32, #tpu.memory_space<vmem>>, %arg18: memref<768x128xbf16, #tpu.memory_space<vmem>>, %arg19: memref<1x128xf32, #tpu.memory_space<vmem>>, %arg20: memref<1x128xf32, #tpu.memory_space<vmem>>, %arg21: memref<1x128xf32, #tpu.memory_space<vmem>>, %arg22: memref<32x128xf32, #tpu.memory_space<vmem>>, %arg23: memref<48x128xf32, #tpu.memory_space<vmem>>, %arg24: memref<48x128xbf16, #tpu.memory_space<vmem>>) attributes {dimension_semantics = [#tpu.dimension_semantics<arbitrary>], iteration_bounds = array<i64: 1>, scalar_prefetch = 0 : i64, scratch_operands = 2 : i64, tpu.core_type = #tpu.core_type<tc>, window_params = [{transform_indices = @transform_0, window_bounds = array<i64: 32, 128>}, {pipeline_mode = #tpu.pipeline_mode<synchronous>, transform_indices = @transform_1, window_bounds = array<i64: 256, 128>}, {pipeline_mode = #tpu.pipeline_mode<synchronous>, transform_indices = @transform_2, window_bounds = array<i64: 1, 128>}, {pipeline_mode = #tpu.pipeline_mode<synchronous>, transform_indices = @transform_3, window_bounds = array<i64: 1, 128>}, {pipeline_mode = #tpu.pipeline_mode<synchronous>, transform_indices = @transform_4, window_bounds = array<i64: 1, 128>}, {pipeline_mode = #tpu.pipeline_mode<synchronous>, transform_indices = @transform_5, window_bounds = array<i64: 384, 128>}, {pipeline_mode = #tpu.pipeline_mode<synchronous>, transform_indices = @transform_6, window_bounds = array<i64: 1, 128>}, {pipeline_mode = #tpu.pipeline_mode<synchronous>, transform_indices = @transform_7, window_bounds = array<i64: 1, 128>}, {pipeline_mode = #tpu.pipeline_mode<synchronous>, transform_indices = @transform_8, window_bounds = array<i64: 1, 128>}, {pipeline_mode = #tpu.pipeline_mode<synchronous>, transform_indices = @transform_9, window_bounds = array<i64: 512, 128>}, {pipeline_mode = #tpu.pipeline_mode<synchronous>, transform_indices = @transform_10, window_bounds = array<i64: 1, 128>}, {pipeline_mode = #tpu.pipeline_mode<synchronous>, transform_indices = @transform_11, window_bounds = array<i64: 1, 128>}, {pipeline_mode = #tpu.pipeline_mode<synchronous>, transform_indices = @transform_12, window_bounds = array<i64: 1, 128>}, {pipeline_mode = #tpu.pipeline_mode<synchronous>, transform_indices = @transform_13, window_bounds = array<i64: 640, 128>}, {pipeline_mode = #tpu.pipeline_mode<synchronous>, transform_indices = @transform_14, window_bounds = array<i64: 1, 128>}, {pipeline_mode = #tpu.pipeline_mode<synchronous>, transform_indices = @transform_15, window_bounds = array<i64: 1, 128>}, {pipeline_mode = #tpu.pipeline_mode<synchronous>, transform_indices = @transform_16, window_bounds = array<i64: 1, 128>}, {pipeline_mode = #tpu.pipeline_mode<synchronous>, transform_indices = @transform_17, window_bounds = array<i64: 768, 128>}, {pipeline_mode = #tpu.pipeline_mode<synchronous>, transform_indices = @transform_18, window_bounds = array<i64: 1, 128>}, {pipeline_mode = #tpu.pipeline_mode<synchronous>, transform_indices = @transform_19, window_bounds = array<i64: 1, 128>}, {pipeline_mode = #tpu.pipeline_mode<synchronous>, transform_indices = @transform_20, window_bounds = array<i64: 1, 128>}, {transform_indices = @transform_21, window_bounds = array<i64: 32, 128>}]} {
    %cst = arith.constant 0.000000e+00 : f32
    %0 = vector.broadcast %cst : f32 to vector<8x128xf32>
    %c0 = arith.constant 0 : index
    %c0_0 = arith.constant 0 : index
    %1 = vector.load %arg23[%c0, %c0_0] : memref<48x128xf32, #tpu.memory_space<vmem>>, vector<8x128xf32>
    tpu.vector_store %arg23[%c0, %c0_0], %0 {strides = array<i32>} : memref<48x128xf32, #tpu.memory_space<vmem>>, vector<8x128xf32>,
    %c0_1 = arith.constant 0 : index
    %c0_2 = arith.constant 0 : index
    %2 = vector.load %arg1[%c0_1, %c0_2] : memref<32x128xf32, #tpu.memory_space<vmem>>, vector<16x128xf32>
    %c8 = arith.constant 8 : index
    %c0_3 = arith.constant 0 : index
    %3 = vector.load %arg23[%c8, %c0_3] : memref<48x128xf32, #tpu.memory_space<vmem>>, vector<16x128xf32>
    tpu.vector_store %arg23[%c8, %c0_3], %2 {strides = array<i32>} : memref<48x128xf32, #tpu.memory_space<vmem>>, vector<16x128xf32>,
    %cst_4 = arith.constant 0.000000e+00 : f32
    %4 = vector.broadcast %cst_4 : f32 to vector<8x128xf32>
    %c24 = arith.constant 24 : index
    %c0_5 = arith.constant 0 : index
    %5 = vector.load %arg23[%c24, %c0_5] : memref<48x128xf32, #tpu.memory_space<vmem>>, vector<8x128xf32>
    tpu.vector_store %arg23[%c24, %c0_5], %4 {strides = array<i32>} : memref<48x128xf32, #tpu.memory_space<vmem>>, vector<8x128xf32>,
    %c16 = arith.constant 16 : index
    %c0_6 = arith.constant 0 : index
    %6 = vector.load %arg1[%c16, %c0_6] : memref<32x128xf32, #tpu.memory_space<vmem>>, vector<16x128xf32>
    %c32 = arith.constant 32 : index
    %c0_7 = arith.constant 0 : index
    %7 = vector.load %arg23[%c32, %c0_7] : memref<48x128xf32, #tpu.memory_space<vmem>>, vector<16x128xf32>
    tpu.vector_store %arg23[%c32, %c0_7], %6 {strides = array<i32>} : memref<48x128xf32, #tpu.memory_space<vmem>>, vector<16x128xf32>,
    %c0_8 = arith.constant 0 : index
    %c0_9 = arith.constant 0 : index
    %8 = vector.load %arg23[%c0_8, %c0_9] : memref<48x128xf32, #tpu.memory_space<vmem>>, vector<48x128xf32>
    %9 = arith.truncf %8 : vector<48x128xf32> to vector<48x128xbf16>
    %c0_10 = arith.constant 0 : index
    %c0_11 = arith.constant 0 : index
    %10 = vector.load %arg24[%c0_10, %c0_11] : memref<48x128xbf16, #tpu.memory_space<vmem>>, vector<48x128xbf16>
    tpu.vector_store %arg24[%c0_10, %c0_11], %9 {strides = array<i32>} : memref<48x128xbf16, #tpu.memory_space<vmem>>, vector<48x128xbf16>,
    %c0_12 = arith.constant 0 : index
    %c0_13 = arith.constant 0 : index
    %11 = vector.load %arg2[%c0_12, %c0_13] : memref<256x128xbf16, #tpu.memory_space<vmem>>, vector<128x128xbf16>
    %c0_14 = arith.constant 0 : index
    %c0_15 = arith.constant 0 : index
    %12 = vector.load %arg24[%c0_14, %c0_15] : memref<48x128xbf16, #tpu.memory_space<vmem>>, vector<48x128xbf16>
    %cst_16 = arith.constant dense<0.000000e+00> : vector<48x128xf32>
    %13 = tpu.matmul %12, %11, %cst_16 {dimension_numbers = #tpu.dot_dimension_numbers<[1], [0], [0], [1], [0, 0, 1, 1], [], []>} : vector<48x128xbf16>, vector<128x128xbf16>, vector<48x128xf32> -> vector<48x128xf32>
    %14 = vector.extract_strided_slice %13 {offsets = [7, 0], sizes = [16, 128], strides = [1, 1]} : vector<48x128xf32> to vector<16x128xf32>
    %15 = vector.extract_strided_slice %13 {offsets = [31, 0], sizes = [16, 128], strides = [1, 1]} : vector<48x128xf32> to vector<16x128xf32>
    %c128 = arith.constant 128 : index
    %c0_17 = arith.constant 0 : index
    %16 = vector.load %arg2[%c128, %c0_17] : memref<256x128xbf16, #tpu.memory_space<vmem>>, vector<128x128xbf16>
    %c0_18 = arith.constant 0 : index
    %c0_19 = arith.constant 0 : index
    %17 = vector.load %arg24[%c0_18, %c0_19] : memref<48x128xbf16, #tpu.memory_space<vmem>>, vector<48x128xbf16>
    %cst_20 = arith.constant dense<0.000000e+00> : vector<48x128xf32>
    %18 = tpu.matmul %17, %16, %cst_20 {dimension_numbers = #tpu.dot_dimension_numbers<[1], [0], [0], [1], [0, 0, 1, 1], [], []>} : vector<48x128xbf16>, vector<128x128xbf16>, vector<48x128xf32> -> vector<48x128xf32>
    %19 = vector.extract_strided_slice %18 {offsets = [8, 0], sizes = [16, 128], strides = [1, 1]} : vector<48x128xf32> to vector<16x128xf32>
    %20 = arith.addf %14, %19 : vector<16x128xf32>
    %21 = vector.extract_strided_slice %18 {offsets = [32, 0], sizes = [16, 128], strides = [1, 1]} : vector<48x128xf32> to vector<16x128xf32>
    %22 = arith.addf %15, %21 : vector<16x128xf32>
    %c0_21 = arith.constant 0 : index
    %c0_22 = arith.constant 0 : index
    %23 = vector.load %arg3[%c0_21, %c0_22] : memref<1x128xf32, #tpu.memory_space<vmem>>, vector<1x128xf32>
    %c0_23 = arith.constant 0 : index
    %c0_24 = arith.constant 0 : index
    %24 = vector.load %arg4[%c0_23, %c0_24] : memref<1x128xf32, #tpu.memory_space<vmem>>, vector<1x128xf32>
    %c0_25 = arith.constant 0 : index
    %c0_26 = arith.constant 0 : index
    %25 = vector.load %arg5[%c0_25, %c0_26] : memref<1x128xf32, #tpu.memory_space<vmem>>, vector<1x128xf32>
    %26 = vector.broadcast %23 : vector<1x128xf32> to vector<16x128xf32>
    %27 = arith.addf %20, %26 : vector<16x128xf32>
    %cst_27 = arith.constant dense<0.000000e+00> : vector<16xf32>
    %28 = vector.multi_reduction <add>, %27, %cst_27 [1] : vector<16x128xf32> to vector<16xf32>
    %29 = vector.shape_cast %28 : vector<16xf32> to vector<16x1xf32>
    %cst_28 = arith.constant dense<0.000000e+00> : vector<1xf32>
    %30 = vector.multi_reduction <add>, %29, %cst_28 [0] : vector<16x1xf32> to vector<1xf32>
    %31 = vector.shape_cast %30 : vector<1xf32> to vector<1x1xf32>
    %cst_29 = arith.constant 4.8828125E-4 : f32
    %32 = vector.broadcast %cst_29 : f32 to vector<1x1xf32>
    %33 = arith.mulf %31, %32 : vector<1x1xf32>
    %34 = vector.broadcast %33 : vector<1x1xf32> to vector<16x128xf32>
    %35 = arith.subf %27, %34 : vector<16x128xf32>
    %36 = arith.mulf %35, %35 : vector<16x128xf32>
    %cst_30 = arith.constant dense<0.000000e+00> : vector<16xf32>
    %37 = vector.multi_reduction <add>, %36, %cst_30 [1] : vector<16x128xf32> to vector<16xf32>
    %38 = vector.shape_cast %37 : vector<16xf32> to vector<16x1xf32>
    %cst_31 = arith.constant dense<0.000000e+00> : vector<1xf32>
    %39 = vector.multi_reduction <add>, %38, %cst_31 [0] : vector<16x1xf32> to vector<1xf32>
    %40 = vector.shape_cast %39 : vector<1xf32> to vector<1x1xf32>
    %cst_32 = arith.constant 4.8828125E-4 : f32
    %41 = vector.broadcast %cst_32 : f32 to vector<1x1xf32>
    %42 = arith.mulf %40, %41 : vector<1x1xf32>
    %cst_33 = arith.constant 9.99999974E-6 : f32
    %43 = vector.broadcast %cst_33 : f32 to vector<1x1xf32>
    %44 = arith.addf %42, %43 : vector<1x1xf32>
    %45 = math.rsqrt %44 : vector<1x1xf32>
    %46 = vector.broadcast %45 : vector<1x1xf32> to vector<16x128xf32>
    %47 = arith.mulf %35, %46 : vector<16x128xf32>
    %48 = vector.broadcast %24 : vector<1x128xf32> to vector<16x128xf32>
    %49 = arith.mulf %47, %48 : vector<16x128xf32>
    %50 = vector.broadcast %25 : vector<1x128xf32> to vector<16x128xf32>
    %51 = arith.addf %49, %50 : vector<16x128xf32>
    %cst_34 = arith.constant 0.000000e+00 : f32
    %52 = vector.broadcast %cst_34 : f32 to vector<16x128xf32>
    %53 = arith.maximumf %51, %52 : vector<16x128xf32>
    %c8_35 = arith.constant 8 : index
    %c0_36 = arith.constant 0 : index
    %54 = vector.load %arg23[%c8_35, %c0_36] : memref<48x128xf32, #tpu.memory_space<vmem>>, vector<16x128xf32>
    %55 = arith.addf %53, %54 : vector<16x128xf32>
    %cst_37 = arith.constant 0.707106769 : f32
    %56 = vector.broadcast %cst_37 : f32 to vector<16x128xf32>
    %57 = arith.mulf %55, %56 : vector<16x128xf32>
    %c8_38 = arith.constant 8 : index
    %c0_39 = arith.constant 0 : index
    %58 = vector.load %arg23[%c8_38, %c0_39] : memref<48x128xf32, #tpu.memory_space<vmem>>, vector<16x128xf32>
    tpu.vector_store %arg23[%c8_38, %c0_39], %57 {strides = array<i32>} : memref<48x128xf32, #tpu.memory_space<vmem>>, vector<16x128xf32>,
    %59 = vector.broadcast %23 : vector<1x128xf32> to vector<16x128xf32>
    %60 = arith.addf %22, %59 : vector<16x128xf32>
    %cst_40 = arith.constant dense<0.000000e+00> : vector<16xf32>
    %61 = vector.multi_reduction <add>, %60, %cst_40 [1] : vector<16x128xf32> to vector<16xf32>
    %62 = vector.shape_cast %61 : vector<16xf32> to vector<16x1xf32>
    %cst_41 = arith.constant dense<0.000000e+00> : vector<1xf32>
    %63 = vector.multi_reduction <add>, %62, %cst_41 [0] : vector<16x1xf32> to vector<1xf32>
    %64 = vector.shape_cast %63 : vector<1xf32> to vector<1x1xf32>
    %cst_42 = arith.constant 4.8828125E-4 : f32
    %65 = vector.broadcast %cst_42 : f32 to vector<1x1xf32>
    %66 = arith.mulf %64, %65 : vector<1x1xf32>
    %67 = vector.broadcast %66 : vector<1x1xf32> to vector<16x128xf32>
    %68 = arith.subf %60, %67 : vector<16x128xf32>
    %69 = arith.mulf %68, %68 : vector<16x128xf32>
    %cst_43 = arith.constant dense<0.000000e+00> : vector<16xf32>
    %70 = vector.multi_reduction <add>, %69, %cst_43 [1] : vector<16x128xf32> to vector<16xf32>
    %71 = vector.shape_cast %70 : vector<16xf32> to vector<16x1xf32>
    %cst_44 = arith.constant dense<0.000000e+00> : vector<1xf32>
    %72 = vector.multi_reduction <add>, %71, %cst_44 [0] : vector<16x1xf32> to vector<1xf32>
    %73 = vector.shape_cast %72 : vector<1xf32> to vector<1x1xf32>
    %cst_45 = arith.constant 4.8828125E-4 : f32
    %74 = vector.broadcast %cst_45 : f32 to vector<1x1xf32>
    %75 = arith.mulf %73, %74 : vector<1x1xf32>
    %cst_46 = arith.constant 9.99999974E-6 : f32
    %76 = vector.broadcast %cst_46 : f32 to vector<1x1xf32>
    %77 = arith.addf %75, %76 : vector<1x1xf32>
    %78 = math.rsqrt %77 : vector<1x1xf32>
    %79 = vector.broadcast %78 : vector<1x1xf32> to vector<16x128xf32>
    %80 = arith.mulf %68, %79 : vector<16x128xf32>
    %81 = vector.broadcast %24 : vector<1x128xf32> to vector<16x128xf32>
    %82 = arith.mulf %80, %81 : vector<16x128xf32>
    %83 = vector.broadcast %25 : vector<1x128xf32> to vector<16x128xf32>
    %84 = arith.addf %82, %83 : vector<16x128xf32>
    %cst_47 = arith.constant 0.000000e+00 : f32
    %85 = vector.broadcast %cst_47 : f32 to vector<16x128xf32>
    %86 = arith.maximumf %84, %85 : vector<16x128xf32>
    %c32_48 = arith.constant 32 : index
    %c0_49 = arith.constant 0 : index
    %87 = vector.load %arg23[%c32_48, %c0_49] : memref<48x128xf32, #tpu.memory_space<vmem>>, vector<16x128xf32>
    %88 = arith.addf %86, %87 : vector<16x128xf32>
    %cst_50 = arith.constant 0.707106769 : f32
    %89 = vector.broadcast %cst_50 : f32 to vector<16x128xf32>
    %90 = arith.mulf %88, %89 : vector<16x128xf32>
    %c32_51 = arith.constant 32 : index
    %c0_52 = arith.constant 0 : index
    %91 = vector.load %arg23[%c32_51, %c0_52] : memref<48x128xf32, #tpu.memory_space<vmem>>, vector<16x128xf32>
    tpu.vector_store %arg23[%c32_51, %c0_52], %90 {strides = array<i32>} : memref<48x128xf32, #tpu.memory_space<vmem>>, vector<16x128xf32>,
    %c0_53 = arith.constant 0 : index
    %c0_54 = arith.constant 0 : index
    %92 = vector.load %arg23[%c0_53, %c0_54] : memref<48x128xf32, #tpu.memory_space<vmem>>, vector<48x128xf32>
    %93 = arith.truncf %92 : vector<48x128xf32> to vector<48x128xbf16>
    %c0_55 = arith.constant 0 : index
    %c0_56 = arith.constant 0 : index
    %94 = vector.load %arg24[%c0_55, %c0_56] : memref<48x128xbf16, #tpu.memory_space<vmem>>, vector<48x128xbf16>
    tpu.vector_store %arg24[%c0_55, %c0_56], %93 {strides = array<i32>} : memref<48x128xbf16, #tpu.memory_space<vmem>>, vector<48x128xbf16>,
    %c0_57 = arith.constant 0 : index
    %c0_58 = arith.constant 0 : index
    %95 = vector.load %arg6[%c0_57, %c0_58] : memref<384x128xbf16, #tpu.memory_space<vmem>>, vector<128x128xbf16>
    %c0_59 = arith.constant 0 : index
    %c0_60 = arith.constant 0 : index
    %96 = vector.load %arg24[%c0_59, %c0_60] : memref<48x128xbf16, #tpu.memory_space<vmem>>, vector<48x128xbf16>
    %cst_61 = arith.constant dense<0.000000e+00> : vector<48x128xf32>
    %97 = tpu.matmul %96, %95, %cst_61 {dimension_numbers = #tpu.dot_dimension_numbers<[1], [0], [0], [1], [0, 0, 1, 1], [], []>} : vector<48x128xbf16>, vector<128x128xbf16>, vector<48x128xf32> -> vector<48x128xf32>
    %98 = vector.extract_strided_slice %97 {offsets = [6, 0], sizes = [16, 128], strides = [1, 1]} : vector<48x128xf32> to vector<16x128xf32>
    %99 = vector.extract_strided_slice %97 {offsets = [30, 0], sizes = [16, 128], strides = [1, 1]} : vector<48x128xf32> to vector<16x128xf32>
    %c128_62 = arith.constant 128 : index
    %c0_63 = arith.constant 0 : index
    %100 = vector.load %arg6[%c128_62, %c0_63] : memref<384x128xbf16, #tpu.memory_space<vmem>>, vector<128x128xbf16>
    %c0_64 = arith.constant 0 : index
    %c0_65 = arith.constant 0 : index
    %101 = vector.load %arg24[%c0_64, %c0_65] : memref<48x128xbf16, #tpu.memory_space<vmem>>, vector<48x128xbf16>
    %cst_66 = arith.constant dense<0.000000e+00> : vector<48x128xf32>
    %102 = tpu.matmul %101, %100, %cst_66 {dimension_numbers = #tpu.dot_dimension_numbers<[1], [0], [0], [1], [0, 0, 1, 1], [], []>} : vector<48x128xbf16>, vector<128x128xbf16>, vector<48x128xf32> -> vector<48x128xf32>
    %103 = vector.extract_strided_slice %102 {offsets = [7, 0], sizes = [16, 128], strides = [1, 1]} : vector<48x128xf32> to vector<16x128xf32>
    %104 = arith.addf %98, %103 : vector<16x128xf32>
    %105 = vector.extract_strided_slice %102 {offsets = [31, 0], sizes = [16, 128], strides = [1, 1]} : vector<48x128xf32> to vector<16x128xf32>
    %106 = arith.addf %99, %105 : vector<16x128xf32>
    %c256 = arith.constant 256 : index
    %c0_67 = arith.constant 0 : index
    %107 = vector.load %arg6[%c256, %c0_67] : memref<384x128xbf16, #tpu.memory_space<vmem>>, vector<128x128xbf16>
    %c0_68 = arith.constant 0 : index
    %c0_69 = arith.constant 0 : index
    %108 = vector.load %arg24[%c0_68, %c0_69] : memref<48x128xbf16, #tpu.memory_space<vmem>>, vector<48x128xbf16>
    %cst_70 = arith.constant dense<0.000000e+00> : vector<48x128xf32>
    %109 = tpu.matmul %108, %107, %cst_70 {dimension_numbers = #tpu.dot_dimension_numbers<[1], [0], [0], [1], [0, 0, 1, 1], [], []>} : vector<48x128xbf16>, vector<128x128xbf16>, vector<48x128xf32> -> vector<48x128xf32>
    %110 = vector.extract_strided_slice %109 {offsets = [8, 0], sizes = [16, 128], strides = [1, 1]} : vector<48x128xf32> to vector<16x128xf32>
    %111 = arith.addf %104, %110 : vector<16x128xf32>
    %112 = vector.extract_strided_slice %109 {offsets = [32, 0], sizes = [16, 128], strides = [1, 1]} : vector<48x128xf32> to vector<16x128xf32>
    %113 = arith.addf %106, %112 : vector<16x128xf32>
    %c0_71 = arith.constant 0 : index
    %c0_72 = arith.constant 0 : index
    %114 = vector.load %arg7[%c0_71, %c0_72] : memref<1x128xf32, #tpu.memory_space<vmem>>, vector<1x128xf32>
    %c0_73 = arith.constant 0 : index
    %c0_74 = arith.constant 0 : index
    %115 = vector.load %arg8[%c0_73, %c0_74] : memref<1x128xf32, #tpu.memory_space<vmem>>, vector<1x128xf32>
    %c0_75 = arith.constant 0 : index
    %c0_76 = arith.constant 0 : index
    %116 = vector.load %arg9[%c0_75, %c0_76] : memref<1x128xf32, #tpu.memory_space<vmem>>, vector<1x128xf32>
    %117 = vector.broadcast %114 : vector<1x128xf32> to vector<16x128xf32>
    %118 = arith.addf %111, %117 : vector<16x128xf32>
    %cst_77 = arith.constant dense<0.000000e+00> : vector<16xf32>
    %119 = vector.multi_reduction <add>, %118, %cst_77 [1] : vector<16x128xf32> to vector<16xf32>
    %120 = vector.shape_cast %119 : vector<16xf32> to vector<16x1xf32>
    %cst_78 = arith.constant dense<0.000000e+00> : vector<1xf32>
    %121 = vector.multi_reduction <add>, %120, %cst_78 [0] : vector<16x1xf32> to vector<1xf32>
    %122 = vector.shape_cast %121 : vector<1xf32> to vector<1x1xf32>
    %cst_79 = arith.constant 4.8828125E-4 : f32
    %123 = vector.broadcast %cst_79 : f32 to vector<1x1xf32>
    %124 = arith.mulf %122, %123 : vector<1x1xf32>
    %125 = vector.broadcast %124 : vector<1x1xf32> to vector<16x128xf32>
    %126 = arith.subf %118, %125 : vector<16x128xf32>
    %127 = arith.mulf %126, %126 : vector<16x128xf32>
    %cst_80 = arith.constant dense<0.000000e+00> : vector<16xf32>
    %128 = vector.multi_reduction <add>, %127, %cst_80 [1] : vector<16x128xf32> to vector<16xf32>
    %129 = vector.shape_cast %128 : vector<16xf32> to vector<16x1xf32>
    %cst_81 = arith.constant dense<0.000000e+00> : vector<1xf32>
    %130 = vector.multi_reduction <add>, %129, %cst_81 [0] : vector<16x1xf32> to vector<1xf32>
    %131 = vector.shape_cast %130 : vector<1xf32> to vector<1x1xf32>
    %cst_82 = arith.constant 4.8828125E-4 : f32
    %132 = vector.broadcast %cst_82 : f32 to vector<1x1xf32>
    %133 = arith.mulf %131, %132 : vector<1x1xf32>
    %cst_83 = arith.constant 9.99999974E-6 : f32
    %134 = vector.broadcast %cst_83 : f32 to vector<1x1xf32>
    %135 = arith.addf %133, %134 : vector<1x1xf32>
    %136 = math.rsqrt %135 : vector<1x1xf32>
    %137 = vector.broadcast %136 : vector<1x1xf32> to vector<16x128xf32>
    %138 = arith.mulf %126, %137 : vector<16x128xf32>
    %139 = vector.broadcast %115 : vector<1x128xf32> to vector<16x128xf32>
    %140 = arith.mulf %138, %139 : vector<16x128xf32>
    %141 = vector.broadcast %116 : vector<1x128xf32> to vector<16x128xf32>
    %142 = arith.addf %140, %141 : vector<16x128xf32>
    %cst_84 = arith.constant 0.000000e+00 : f32
    %143 = vector.broadcast %cst_84 : f32 to vector<16x128xf32>
    %144 = arith.maximumf %142, %143 : vector<16x128xf32>
    %c8_85 = arith.constant 8 : index
    %c0_86 = arith.constant 0 : index
    %145 = vector.load %arg23[%c8_85, %c0_86] : memref<48x128xf32, #tpu.memory_space<vmem>>, vector<16x128xf32>
    %146 = arith.addf %144, %145 : vector<16x128xf32>
    %cst_87 = arith.constant 0.707106769 : f32
    %147 = vector.broadcast %cst_87 : f32 to vector<16x128xf32>
    %148 = arith.mulf %146, %147 : vector<16x128xf32>
    %c8_88 = arith.constant 8 : index
    %c0_89 = arith.constant 0 : index
    %149 = vector.load %arg23[%c8_88, %c0_89] : memref<48x128xf32, #tpu.memory_space<vmem>>, vector<16x128xf32>
    tpu.vector_store %arg23[%c8_88, %c0_89], %148 {strides = array<i32>} : memref<48x128xf32, #tpu.memory_space<vmem>>, vector<16x128xf32>,
    %150 = vector.broadcast %114 : vector<1x128xf32> to vector<16x128xf32>
    %151 = arith.addf %113, %150 : vector<16x128xf32>
    %cst_90 = arith.constant dense<0.000000e+00> : vector<16xf32>
    %152 = vector.multi_reduction <add>, %151, %cst_90 [1] : vector<16x128xf32> to vector<16xf32>
    %153 = vector.shape_cast %152 : vector<16xf32> to vector<16x1xf32>
    %cst_91 = arith.constant dense<0.000000e+00> : vector<1xf32>
    %154 = vector.multi_reduction <add>, %153, %cst_91 [0] : vector<16x1xf32> to vector<1xf32>
    %155 = vector.shape_cast %154 : vector<1xf32> to vector<1x1xf32>
    %cst_92 = arith.constant 4.8828125E-4 : f32
    %156 = vector.broadcast %cst_92 : f32 to vector<1x1xf32>
    %157 = arith.mulf %155, %156 : vector<1x1xf32>
    %158 = vector.broadcast %157 : vector<1x1xf32> to vector<16x128xf32>
    %159 = arith.subf %151, %158 : vector<16x128xf32>
    %160 = arith.mulf %159, %159 : vector<16x128xf32>
    %cst_93 = arith.constant dense<0.000000e+00> : vector<16xf32>
    %161 = vector.multi_reduction <add>, %160, %cst_93 [1] : vector<16x128xf32> to vector<16xf32>
    %162 = vector.shape_cast %161 : vector<16xf32> to vector<16x1xf32>
    %cst_94 = arith.constant dense<0.000000e+00> : vector<1xf32>
    %163 = vector.multi_reduction <add>, %162, %cst_94 [0] : vector<16x1xf32> to vector<1xf32>
    %164 = vector.shape_cast %163 : vector<1xf32> to vector<1x1xf32>
    %cst_95 = arith.constant 4.8828125E-4 : f32
    %165 = vector.broadcast %cst_95 : f32 to vector<1x1xf32>
    %166 = arith.mulf %164, %165 : vector<1x1xf32>
    %cst_96 = arith.constant 9.99999974E-6 : f32
    %167 = vector.broadcast %cst_96 : f32 to vector<1x1xf32>
    %168 = arith.addf %166, %167 : vector<1x1xf32>
    %169 = math.rsqrt %168 : vector<1x1xf32>
    %170 = vector.broadcast %169 : vector<1x1xf32> to vector<16x128xf32>
    %171 = arith.mulf %159, %170 : vector<16x128xf32>
    %172 = vector.broadcast %115 : vector<1x128xf32> to vector<16x128xf32>
    %173 = arith.mulf %171, %172 : vector<16x128xf32>
    %174 = vector.broadcast %116 : vector<1x128xf32> to vector<16x128xf32>
    %175 = arith.addf %173, %174 : vector<16x128xf32>
    %cst_97 = arith.constant 0.000000e+00 : f32
    %176 = vector.broadcast %cst_97 : f32 to vector<16x128xf32>
    %177 = arith.maximumf %175, %176 : vector<16x128xf32>
    %c32_98 = arith.constant 32 : index
    %c0_99 = arith.constant 0 : index
    %178 = vector.load %arg23[%c32_98, %c0_99] : memref<48x128xf32, #tpu.memory_space<vmem>>, vector<16x128xf32>
    %179 = arith.addf %177, %178 : vector<16x128xf32>
    %cst_100 = arith.constant 0.707106769 : f32
    %180 = vector.broadcast %cst_100 : f32 to vector<16x128xf32>
    %181 = arith.mulf %179, %180 : vector<16x128xf32>
    %c32_101 = arith.constant 32 : index
    %c0_102 = arith.constant 0 : index
    %182 = vector.load %arg23[%c32_101, %c0_102] : memref<48x128xf32, #tpu.memory_space<vmem>>, vector<16x128xf32>
    tpu.vector_store %arg23[%c32_101, %c0_102], %181 {strides = array<i32>} : memref<48x128xf32, #tpu.memory_space<vmem>>, vector<16x128xf32>,
    %c0_103 = arith.constant 0 : index
    %c0_104 = arith.constant 0 : index
    %183 = vector.load %arg23[%c0_103, %c0_104] : memref<48x128xf32, #tpu.memory_space<vmem>>, vector<48x128xf32>
    %184 = arith.truncf %183 : vector<48x128xf32> to vector<48x128xbf16>
    %c0_105 = arith.constant 0 : index
    %c0_106 = arith.constant 0 : index
    %185 = vector.load %arg24[%c0_105, %c0_106] : memref<48x128xbf16, #tpu.memory_space<vmem>>, vector<48x128xbf16>
    tpu.vector_store %arg24[%c0_105, %c0_106], %184 {strides = array<i32>} : memref<48x128xbf16, #tpu.memory_space<vmem>>, vector<48x128xbf16>,
    %c0_107 = arith.constant 0 : index
    %c0_108 = arith.constant 0 : index
    %186 = vector.load %arg10[%c0_107, %c0_108] : memref<512x128xbf16, #tpu.memory_space<vmem>>, vector<128x128xbf16>
    %c0_109 = arith.constant 0 : index
    %c0_110 = arith.constant 0 : index
    %187 = vector.load %arg24[%c0_109, %c0_110] : memref<48x128xbf16, #tpu.memory_space<vmem>>, vector<48x128xbf16>
    %cst_111 = arith.constant dense<0.000000e+00> : vector<48x128xf32>
    %188 = tpu.matmul %187, %186, %cst_111 {dimension_numbers = #tpu.dot_dimension_numbers<[1], [0], [0], [1], [0, 0, 1, 1], [], []>} : vector<48x128xbf16>, vector<128x128xbf16>, vector<48x128xf32> -> vector<48x128xf32>
    %189 = vector.extract_strided_slice %188 {offsets = [5, 0], sizes = [16, 128], strides = [1, 1]} : vector<48x128xf32> to vector<16x128xf32>
    %190 = vector.extract_strided_slice %188 {offsets = [29, 0], sizes = [16, 128], strides = [1, 1]} : vector<48x128xf32> to vector<16x128xf32>
    %c128_112 = arith.constant 128 : index
    %c0_113 = arith.constant 0 : index
    %191 = vector.load %arg10[%c128_112, %c0_113] : memref<512x128xbf16, #tpu.memory_space<vmem>>, vector<128x128xbf16>
    %c0_114 = arith.constant 0 : index
    %c0_115 = arith.constant 0 : index
    %192 = vector.load %arg24[%c0_114, %c0_115] : memref<48x128xbf16, #tpu.memory_space<vmem>>, vector<48x128xbf16>
    %cst_116 = arith.constant dense<0.000000e+00> : vector<48x128xf32>
    %193 = tpu.matmul %192, %191, %cst_116 {dimension_numbers = #tpu.dot_dimension_numbers<[1], [0], [0], [1], [0, 0, 1, 1], [], []>} : vector<48x128xbf16>, vector<128x128xbf16>, vector<48x128xf32> -> vector<48x128xf32>
    %194 = vector.extract_strided_slice %193 {offsets = [6, 0], sizes = [16, 128], strides = [1, 1]} : vector<48x128xf32> to vector<16x128xf32>
    %195 = arith.addf %189, %194 : vector<16x128xf32>
    %196 = vector.extract_strided_slice %193 {offsets = [30, 0], sizes = [16, 128], strides = [1, 1]} : vector<48x128xf32> to vector<16x128xf32>
    %197 = arith.addf %190, %196 : vector<16x128xf32>
    %c256_117 = arith.constant 256 : index
    %c0_118 = arith.constant 0 : index
    %198 = vector.load %arg10[%c256_117, %c0_118] : memref<512x128xbf16, #tpu.memory_space<vmem>>, vector<128x128xbf16>
    %c0_119 = arith.constant 0 : index
    %c0_120 = arith.constant 0 : index
    %199 = vector.load %arg24[%c0_119, %c0_120] : memref<48x128xbf16, #tpu.memory_space<vmem>>, vector<48x128xbf16>
    %cst_121 = arith.constant dense<0.000000e+00> : vector<48x128xf32>
    %200 = tpu.matmul %199, %198, %cst_121 {dimension_numbers = #tpu.dot_dimension_numbers<[1], [0], [0], [1], [0, 0, 1, 1], [], []>} : vector<48x128xbf16>, vector<128x128xbf16>, vector<48x128xf32> -> vector<48x128xf32>
    %201 = vector.extract_strided_slice %200 {offsets = [7, 0], sizes = [16, 128], strides = [1, 1]} : vector<48x128xf32> to vector<16x128xf32>
    %202 = arith.addf %195, %201 : vector<16x128xf32>
    %203 = vector.extract_strided_slice %200 {offsets = [31, 0], sizes = [16, 128], strides = [1, 1]} : vector<48x128xf32> to vector<16x128xf32>
    %204 = arith.addf %197, %203 : vector<16x128xf32>
    %c384 = arith.constant 384 : index
    %c0_122 = arith.constant 0 : index
    %205 = vector.load %arg10[%c384, %c0_122] : memref<512x128xbf16, #tpu.memory_space<vmem>>, vector<128x128xbf16>
    %c0_123 = arith.constant 0 : index
    %c0_124 = arith.constant 0 : index
    %206 = vector.load %arg24[%c0_123, %c0_124] : memref<48x128xbf16, #tpu.memory_space<vmem>>, vector<48x128xbf16>
    %cst_125 = arith.constant dense<0.000000e+00> : vector<48x128xf32>
    %207 = tpu.matmul %206, %205, %cst_125 {dimension_numbers = #tpu.dot_dimension_numbers<[1], [0], [0], [1], [0, 0, 1, 1], [], []>} : vector<48x128xbf16>, vector<128x128xbf16>, vector<48x128xf32> -> vector<48x128xf32>
    %208 = vector.extract_strided_slice %207 {offsets = [8, 0], sizes = [16, 128], strides = [1, 1]} : vector<48x128xf32> to vector<16x128xf32>
    %209 = arith.addf %202, %208 : vector<16x128xf32>
    %210 = vector.extract_strided_slice %207 {offsets = [32, 0], sizes = [16, 128], strides = [1, 1]} : vector<48x128xf32> to vector<16x128xf32>
    %211 = arith.addf %204, %210 : vector<16x128xf32>
    %c0_126 = arith.constant 0 : index
    %c0_127 = arith.constant 0 : index
    %212 = vector.load %arg11[%c0_126, %c0_127] : memref<1x128xf32, #tpu.memory_space<vmem>>, vector<1x128xf32>
    %c0_128 = arith.constant 0 : index
    %c0_129 = arith.constant 0 : index
    %213 = vector.load %arg12[%c0_128, %c0_129] : memref<1x128xf32, #tpu.memory_space<vmem>>, vector<1x128xf32>
    %c0_130 = arith.constant 0 : index
    %c0_131 = arith.constant 0 : index
    %214 = vector.load %arg13[%c0_130, %c0_131] : memref<1x128xf32, #tpu.memory_space<vmem>>, vector<1x128xf32>
    %215 = vector.broadcast %212 : vector<1x128xf32> to vector<16x128xf32>
    %216 = arith.addf %209, %215 : vector<16x128xf32>
    %cst_132 = arith.constant dense<0.000000e+00> : vector<16xf32>
    %217 = vector.multi_reduction <add>, %216, %cst_132 [1] : vector<16x128xf32> to vector<16xf32>
    %218 = vector.shape_cast %217 : vector<16xf32> to vector<16x1xf32>
    %cst_133 = arith.constant dense<0.000000e+00> : vector<1xf32>
    %219 = vector.multi_reduction <add>, %218, %cst_133 [0] : vector<16x1xf32> to vector<1xf32>
    %220 = vector.shape_cast %219 : vector<1xf32> to vector<1x1xf32>
    %cst_134 = arith.constant 4.8828125E-4 : f32
    %221 = vector.broadcast %cst_134 : f32 to vector<1x1xf32>
    %222 = arith.mulf %220, %221 : vector<1x1xf32>
    %223 = vector.broadcast %222 : vector<1x1xf32> to vector<16x128xf32>
    %224 = arith.subf %216, %223 : vector<16x128xf32>
    %225 = arith.mulf %224, %224 : vector<16x128xf32>
    %cst_135 = arith.constant dense<0.000000e+00> : vector<16xf32>
    %226 = vector.multi_reduction <add>, %225, %cst_135 [1] : vector<16x128xf32> to vector<16xf32>
    %227 = vector.shape_cast %226 : vector<16xf32> to vector<16x1xf32>
    %cst_136 = arith.constant dense<0.000000e+00> : vector<1xf32>
    %228 = vector.multi_reduction <add>, %227, %cst_136 [0] : vector<16x1xf32> to vector<1xf32>
    %229 = vector.shape_cast %228 : vector<1xf32> to vector<1x1xf32>
    %cst_137 = arith.constant 4.8828125E-4 : f32
    %230 = vector.broadcast %cst_137 : f32 to vector<1x1xf32>
    %231 = arith.mulf %229, %230 : vector<1x1xf32>
    %cst_138 = arith.constant 9.99999974E-6 : f32
    %232 = vector.broadcast %cst_138 : f32 to vector<1x1xf32>
    %233 = arith.addf %231, %232 : vector<1x1xf32>
    %234 = math.rsqrt %233 : vector<1x1xf32>
    %235 = vector.broadcast %234 : vector<1x1xf32> to vector<16x128xf32>
    %236 = arith.mulf %224, %235 : vector<16x128xf32>
    %237 = vector.broadcast %213 : vector<1x128xf32> to vector<16x128xf32>
    %238 = arith.mulf %236, %237 : vector<16x128xf32>
    %239 = vector.broadcast %214 : vector<1x128xf32> to vector<16x128xf32>
    %240 = arith.addf %238, %239 : vector<16x128xf32>
    %cst_139 = arith.constant 0.000000e+00 : f32
    %241 = vector.broadcast %cst_139 : f32 to vector<16x128xf32>
    %242 = arith.maximumf %240, %241 : vector<16x128xf32>
    %c8_140 = arith.constant 8 : index
    %c0_141 = arith.constant 0 : index
    %243 = vector.load %arg23[%c8_140, %c0_141] : memref<48x128xf32, #tpu.memory_space<vmem>>, vector<16x128xf32>
    %244 = arith.addf %242, %243 : vector<16x128xf32>
    %cst_142 = arith.constant 0.707106769 : f32
    %245 = vector.broadcast %cst_142 : f32 to vector<16x128xf32>
    %246 = arith.mulf %244, %245 : vector<16x128xf32>
    %c8_143 = arith.constant 8 : index
    %c0_144 = arith.constant 0 : index
    %247 = vector.load %arg23[%c8_143, %c0_144] : memref<48x128xf32, #tpu.memory_space<vmem>>, vector<16x128xf32>
    tpu.vector_store %arg23[%c8_143, %c0_144], %246 {strides = array<i32>} : memref<48x128xf32, #tpu.memory_space<vmem>>, vector<16x128xf32>,
    %248 = vector.broadcast %212 : vector<1x128xf32> to vector<16x128xf32>
    %249 = arith.addf %211, %248 : vector<16x128xf32>
    %cst_145 = arith.constant dense<0.000000e+00> : vector<16xf32>
    %250 = vector.multi_reduction <add>, %249, %cst_145 [1] : vector<16x128xf32> to vector<16xf32>
    %251 = vector.shape_cast %250 : vector<16xf32> to vector<16x1xf32>
    %cst_146 = arith.constant dense<0.000000e+00> : vector<1xf32>
    %252 = vector.multi_reduction <add>, %251, %cst_146 [0] : vector<16x1xf32> to vector<1xf32>
    %253 = vector.shape_cast %252 : vector<1xf32> to vector<1x1xf32>
    %cst_147 = arith.constant 4.8828125E-4 : f32
    %254 = vector.broadcast %cst_147 : f32 to vector<1x1xf32>
    %255 = arith.mulf %253, %254 : vector<1x1xf32>
    %256 = vector.broadcast %255 : vector<1x1xf32> to vector<16x128xf32>
    %257 = arith.subf %249, %256 : vector<16x128xf32>
    %258 = arith.mulf %257, %257 : vector<16x128xf32>
    %cst_148 = arith.constant dense<0.000000e+00> : vector<16xf32>
    %259 = vector.multi_reduction <add>, %258, %cst_148 [1] : vector<16x128xf32> to vector<16xf32>
    %260 = vector.shape_cast %259 : vector<16xf32> to vector<16x1xf32>
    %cst_149 = arith.constant dense<0.000000e+00> : vector<1xf32>
    %261 = vector.multi_reduction <add>, %260, %cst_149 [0] : vector<16x1xf32> to vector<1xf32>
    %262 = vector.shape_cast %261 : vector<1xf32> to vector<1x1xf32>
    %cst_150 = arith.constant 4.8828125E-4 : f32
    %263 = vector.broadcast %cst_150 : f32 to vector<1x1xf32>
    %264 = arith.mulf %262, %263 : vector<1x1xf32>
    %cst_151 = arith.constant 9.99999974E-6 : f32
    %265 = vector.broadcast %cst_151 : f32 to vector<1x1xf32>
    %266 = arith.addf %264, %265 : vector<1x1xf32>
    %267 = math.rsqrt %266 : vector<1x1xf32>
    %268 = vector.broadcast %267 : vector<1x1xf32> to vector<16x128xf32>
    %269 = arith.mulf %257, %268 : vector<16x128xf32>
    %270 = vector.broadcast %213 : vector<1x128xf32> to vector<16x128xf32>
    %271 = arith.mulf %269, %270 : vector<16x128xf32>
    %272 = vector.broadcast %214 : vector<1x128xf32> to vector<16x128xf32>
    %273 = arith.addf %271, %272 : vector<16x128xf32>
    %cst_152 = arith.constant 0.000000e+00 : f32
    %274 = vector.broadcast %cst_152 : f32 to vector<16x128xf32>
    %275 = arith.maximumf %273, %274 : vector<16x128xf32>
    %c32_153 = arith.constant 32 : index
    %c0_154 = arith.constant 0 : index
    %276 = vector.load %arg23[%c32_153, %c0_154] : memref<48x128xf32, #tpu.memory_space<vmem>>, vector<16x128xf32>
    %277 = arith.addf %275, %276 : vector<16x128xf32>
    %cst_155 = arith.constant 0.707106769 : f32
    %278 = vector.broadcast %cst_155 : f32 to vector<16x128xf32>
    %279 = arith.mulf %277, %278 : vector<16x128xf32>
    %c32_156 = arith.constant 32 : index
    %c0_157 = arith.constant 0 : index
    %280 = vector.load %arg23[%c32_156, %c0_157] : memref<48x128xf32, #tpu.memory_space<vmem>>, vector<16x128xf32>
    tpu.vector_store %arg23[%c32_156, %c0_157], %279 {strides = array<i32>} : memref<48x128xf32, #tpu.memory_space<vmem>>, vector<16x128xf32>,
    %c0_158 = arith.constant 0 : index
    %c0_159 = arith.constant 0 : index
    %281 = vector.load %arg23[%c0_158, %c0_159] : memref<48x128xf32, #tpu.memory_space<vmem>>, vector<48x128xf32>
    %282 = arith.truncf %281 : vector<48x128xf32> to vector<48x128xbf16>
    %c0_160 = arith.constant 0 : index
    %c0_161 = arith.constant 0 : index
    %283 = vector.load %arg24[%c0_160, %c0_161] : memref<48x128xbf16, #tpu.memory_space<vmem>>, vector<48x128xbf16>
    tpu.vector_store %arg24[%c0_160, %c0_161], %282 {strides = array<i32>} : memref<48x128xbf16, #tpu.memory_space<vmem>>, vector<48x128xbf16>,
    %c0_162 = arith.constant 0 : index
    %c0_163 = arith.constant 0 : index
    %284 = vector.load %arg14[%c0_162, %c0_163] : memref<640x128xbf16, #tpu.memory_space<vmem>>, vector<128x128xbf16>
    %c0_164 = arith.constant 0 : index
    %c0_165 = arith.constant 0 : index
    %285 = vector.load %arg24[%c0_164, %c0_165] : memref<48x128xbf16, #tpu.memory_space<vmem>>, vector<48x128xbf16>
    %cst_166 = arith.constant dense<0.000000e+00> : vector<48x128xf32>
    %286 = tpu.matmul %285, %284, %cst_166 {dimension_numbers = #tpu.dot_dimension_numbers<[1], [0], [0], [1], [0, 0, 1, 1], [], []>} : vector<48x128xbf16>, vector<128x128xbf16>, vector<48x128xf32> -> vector<48x128xf32>
    %287 = vector.extract_strided_slice %286 {offsets = [4, 0], sizes = [16, 128], strides = [1, 1]} : vector<48x128xf32> to vector<16x128xf32>
    %288 = vector.extract_strided_slice %286 {offsets = [28, 0], sizes = [16, 128], strides = [1, 1]} : vector<48x128xf32> to vector<16x128xf32>
    %c128_167 = arith.constant 128 : index
    %c0_168 = arith.constant 0 : index
    %289 = vector.load %arg14[%c128_167, %c0_168] : memref<640x128xbf16, #tpu.memory_space<vmem>>, vector<128x128xbf16>
    %c0_169 = arith.constant 0 : index
    %c0_170 = arith.constant 0 : index
    %290 = vector.load %arg24[%c0_169, %c0_170] : memref<48x128xbf16, #tpu.memory_space<vmem>>, vector<48x128xbf16>
    %cst_171 = arith.constant dense<0.000000e+00> : vector<48x128xf32>
    %291 = tpu.matmul %290, %289, %cst_171 {dimension_numbers = #tpu.dot_dimension_numbers<[1], [0], [0], [1], [0, 0, 1, 1], [], []>} : vector<48x128xbf16>, vector<128x128xbf16>, vector<48x128xf32> -> vector<48x128xf32>
    %292 = vector.extract_strided_slice %291 {offsets = [5, 0], sizes = [16, 128], strides = [1, 1]} : vector<48x128xf32> to vector<16x128xf32>
    %293 = arith.addf %287, %292 : vector<16x128xf32>
    %294 = vector.extract_strided_slice %291 {offsets = [29, 0], sizes = [16, 128], strides = [1, 1]} : vector<48x128xf32> to vector<16x128xf32>
    %295 = arith.addf %288, %294 : vector<16x128xf32>
    %c256_172 = arith.constant 256 : index
    %c0_173 = arith.constant 0 : index
    %296 = vector.load %arg14[%c256_172, %c0_173] : memref<640x128xbf16, #tpu.memory_space<vmem>>, vector<128x128xbf16>
    %c0_174 = arith.constant 0 : index
    %c0_175 = arith.constant 0 : index
    %297 = vector.load %arg24[%c0_174, %c0_175] : memref<48x128xbf16, #tpu.memory_space<vmem>>, vector<48x128xbf16>
    %cst_176 = arith.constant dense<0.000000e+00> : vector<48x128xf32>
    %298 = tpu.matmul %297, %296, %cst_176 {dimension_numbers = #tpu.dot_dimension_numbers<[1], [0], [0], [1], [0, 0, 1, 1], [], []>} : vector<48x128xbf16>, vector<128x128xbf16>, vector<48x128xf32> -> vector<48x128xf32>
    %299 = vector.extract_strided_slice %298 {offsets = [6, 0], sizes = [16, 128], strides = [1, 1]} : vector<48x128xf32> to vector<16x128xf32>
    %300 = arith.addf %293, %299 : vector<16x128xf32>
    %301 = vector.extract_strided_slice %298 {offsets = [30, 0], sizes = [16, 128], strides = [1, 1]} : vector<48x128xf32> to vector<16x128xf32>
    %302 = arith.addf %295, %301 : vector<16x128xf32>
    %c384_177 = arith.constant 384 : index
    %c0_178 = arith.constant 0 : index
    %303 = vector.load %arg14[%c384_177, %c0_178] : memref<640x128xbf16, #tpu.memory_space<vmem>>, vector<128x128xbf16>
    %c0_179 = arith.constant 0 : index
    %c0_180 = arith.constant 0 : index
    %304 = vector.load %arg24[%c0_179, %c0_180] : memref<48x128xbf16, #tpu.memory_space<vmem>>, vector<48x128xbf16>
    %cst_181 = arith.constant dense<0.000000e+00> : vector<48x128xf32>
    %305 = tpu.matmul %304, %303, %cst_181 {dimension_numbers = #tpu.dot_dimension_numbers<[1], [0], [0], [1], [0, 0, 1, 1], [], []>} : vector<48x128xbf16>, vector<128x128xbf16>, vector<48x128xf32> -> vector<48x128xf32>
    %306 = vector.extract_strided_slice %305 {offsets = [7, 0], sizes = [16, 128], strides = [1, 1]} : vector<48x128xf32> to vector<16x128xf32>
    %307 = arith.addf %300, %306 : vector<16x128xf32>
    %308 = vector.extract_strided_slice %305 {offsets = [31, 0], sizes = [16, 128], strides = [1, 1]} : vector<48x128xf32> to vector<16x128xf32>
    %309 = arith.addf %302, %308 : vector<16x128xf32>
    %c512 = arith.constant 512 : index
    %c0_182 = arith.constant 0 : index
    %310 = vector.load %arg14[%c512, %c0_182] : memref<640x128xbf16, #tpu.memory_space<vmem>>, vector<128x128xbf16>
    %c0_183 = arith.constant 0 : index
    %c0_184 = arith.constant 0 : index
    %311 = vector.load %arg24[%c0_183, %c0_184] : memref<48x128xbf16, #tpu.memory_space<vmem>>, vector<48x128xbf16>
    %cst_185 = arith.constant dense<0.000000e+00> : vector<48x128xf32>
    %312 = tpu.matmul %311, %310, %cst_185 {dimension_numbers = #tpu.dot_dimension_numbers<[1], [0], [0], [1], [0, 0, 1, 1], [], []>} : vector<48x128xbf16>, vector<128x128xbf16>, vector<48x128xf32> -> vector<48x128xf32>
    %313 = vector.extract_strided_slice %312 {offsets = [8, 0], sizes = [16, 128], strides = [1, 1]} : vector<48x128xf32> to vector<16x128xf32>
    %314 = arith.addf %307, %313 : vector<16x128xf32>
    %315 = vector.extract_strided_slice %312 {offsets = [32, 0], sizes = [16, 128], strides = [1, 1]} : vector<48x128xf32> to vector<16x128xf32>
    %316 = arith.addf %309, %315 : vector<16x128xf32>
    %c0_186 = arith.constant 0 : index
    %c0_187 = arith.constant 0 : index
    %317 = vector.load %arg15[%c0_186, %c0_187] : memref<1x128xf32, #tpu.memory_space<vmem>>, vector<1x128xf32>
    %c0_188 = arith.constant 0 : index
    %c0_189 = arith.constant 0 : index
    %318 = vector.load %arg16[%c0_188, %c0_189] : memref<1x128xf32, #tpu.memory_space<vmem>>, vector<1x128xf32>
    %c0_190 = arith.constant 0 : index
    %c0_191 = arith.constant 0 : index
    %319 = vector.load %arg17[%c0_190, %c0_191] : memref<1x128xf32, #tpu.memory_space<vmem>>, vector<1x128xf32>
    %320 = vector.broadcast %317 : vector<1x128xf32> to vector<16x128xf32>
    %321 = arith.addf %314, %320 : vector<16x128xf32>
    %cst_192 = arith.constant dense<0.000000e+00> : vector<16xf32>
    %322 = vector.multi_reduction <add>, %321, %cst_192 [1] : vector<16x128xf32> to vector<16xf32>
    %323 = vector.shape_cast %322 : vector<16xf32> to vector<16x1xf32>
    %cst_193 = arith.constant dense<0.000000e+00> : vector<1xf32>
    %324 = vector.multi_reduction <add>, %323, %cst_193 [0] : vector<16x1xf32> to vector<1xf32>
    %325 = vector.shape_cast %324 : vector<1xf32> to vector<1x1xf32>
    %cst_194 = arith.constant 4.8828125E-4 : f32
    %326 = vector.broadcast %cst_194 : f32 to vector<1x1xf32>
    %327 = arith.mulf %325, %326 : vector<1x1xf32>
    %328 = vector.broadcast %327 : vector<1x1xf32> to vector<16x128xf32>
    %329 = arith.subf %321, %328 : vector<16x128xf32>
    %330 = arith.mulf %329, %329 : vector<16x128xf32>
    %cst_195 = arith.constant dense<0.000000e+00> : vector<16xf32>
    %331 = vector.multi_reduction <add>, %330, %cst_195 [1] : vector<16x128xf32> to vector<16xf32>
    %332 = vector.shape_cast %331 : vector<16xf32> to vector<16x1xf32>
    %cst_196 = arith.constant dense<0.000000e+00> : vector<1xf32>
    %333 = vector.multi_reduction <add>, %332, %cst_196 [0] : vector<16x1xf32> to vector<1xf32>
    %334 = vector.shape_cast %333 : vector<1xf32> to vector<1x1xf32>
    %cst_197 = arith.constant 4.8828125E-4 : f32
    %335 = vector.broadcast %cst_197 : f32 to vector<1x1xf32>
    %336 = arith.mulf %334, %335 : vector<1x1xf32>
    %cst_198 = arith.constant 9.99999974E-6 : f32
    %337 = vector.broadcast %cst_198 : f32 to vector<1x1xf32>
    %338 = arith.addf %336, %337 : vector<1x1xf32>
    %339 = math.rsqrt %338 : vector<1x1xf32>
    %340 = vector.broadcast %339 : vector<1x1xf32> to vector<16x128xf32>
    %341 = arith.mulf %329, %340 : vector<16x128xf32>
    %342 = vector.broadcast %318 : vector<1x128xf32> to vector<16x128xf32>
    %343 = arith.mulf %341, %342 : vector<16x128xf32>
    %344 = vector.broadcast %319 : vector<1x128xf32> to vector<16x128xf32>
    %345 = arith.addf %343, %344 : vector<16x128xf32>
    %cst_199 = arith.constant 0.000000e+00 : f32
    %346 = vector.broadcast %cst_199 : f32 to vector<16x128xf32>
    %347 = arith.maximumf %345, %346 : vector<16x128xf32>
    %c8_200 = arith.constant 8 : index
    %c0_201 = arith.constant 0 : index
    %348 = vector.load %arg23[%c8_200, %c0_201] : memref<48x128xf32, #tpu.memory_space<vmem>>, vector<16x128xf32>
    %349 = arith.addf %347, %348 : vector<16x128xf32>
    %cst_202 = arith.constant 0.707106769 : f32
    %350 = vector.broadcast %cst_202 : f32 to vector<16x128xf32>
    %351 = arith.mulf %349, %350 : vector<16x128xf32>
    %c8_203 = arith.constant 8 : index
    %c0_204 = arith.constant 0 : index
    %352 = vector.load %arg23[%c8_203, %c0_204] : memref<48x128xf32, #tpu.memory_space<vmem>>, vector<16x128xf32>
    tpu.vector_store %arg23[%c8_203, %c0_204], %351 {strides = array<i32>} : memref<48x128xf32, #tpu.memory_space<vmem>>, vector<16x128xf32>,
    %353 = vector.broadcast %317 : vector<1x128xf32> to vector<16x128xf32>
    %354 = arith.addf %316, %353 : vector<16x128xf32>
    %cst_205 = arith.constant dense<0.000000e+00> : vector<16xf32>
    %355 = vector.multi_reduction <add>, %354, %cst_205 [1] : vector<16x128xf32> to vector<16xf32>
    %356 = vector.shape_cast %355 : vector<16xf32> to vector<16x1xf32>
    %cst_206 = arith.constant dense<0.000000e+00> : vector<1xf32>
    %357 = vector.multi_reduction <add>, %356, %cst_206 [0] : vector<16x1xf32> to vector<1xf32>
    %358 = vector.shape_cast %357 : vector<1xf32> to vector<1x1xf32>
    %cst_207 = arith.constant 4.8828125E-4 : f32
    %359 = vector.broadcast %cst_207 : f32 to vector<1x1xf32>
    %360 = arith.mulf %358, %359 : vector<1x1xf32>
    %361 = vector.broadcast %360 : vector<1x1xf32> to vector<16x128xf32>
    %362 = arith.subf %354, %361 : vector<16x128xf32>
    %363 = arith.mulf %362, %362 : vector<16x128xf32>
    %cst_208 = arith.constant dense<0.000000e+00> : vector<16xf32>
    %364 = vector.multi_reduction <add>, %363, %cst_208 [1] : vector<16x128xf32> to vector<16xf32>
    %365 = vector.shape_cast %364 : vector<16xf32> to vector<16x1xf32>
    %cst_209 = arith.constant dense<0.000000e+00> : vector<1xf32>
    %366 = vector.multi_reduction <add>, %365, %cst_209 [0] : vector<16x1xf32> to vector<1xf32>
    %367 = vector.shape_cast %366 : vector<1xf32> to vector<1x1xf32>
    %cst_210 = arith.constant 4.8828125E-4 : f32
    %368 = vector.broadcast %cst_210 : f32 to vector<1x1xf32>
    %369 = arith.mulf %367, %368 : vector<1x1xf32>
    %cst_211 = arith.constant 9.99999974E-6 : f32
    %370 = vector.broadcast %cst_211 : f32 to vector<1x1xf32>
    %371 = arith.addf %369, %370 : vector<1x1xf32>
    %372 = math.rsqrt %371 : vector<1x1xf32>
    %373 = vector.broadcast %372 : vector<1x1xf32> to vector<16x128xf32>
    %374 = arith.mulf %362, %373 : vector<16x128xf32>
    %375 = vector.broadcast %318 : vector<1x128xf32> to vector<16x128xf32>
    %376 = arith.mulf %374, %375 : vector<16x128xf32>
    %377 = vector.broadcast %319 : vector<1x128xf32> to vector<16x128xf32>
    %378 = arith.addf %376, %377 : vector<16x128xf32>
    %cst_212 = arith.constant 0.000000e+00 : f32
    %379 = vector.broadcast %cst_212 : f32 to vector<16x128xf32>
    %380 = arith.maximumf %378, %379 : vector<16x128xf32>
    %c32_213 = arith.constant 32 : index
    %c0_214 = arith.constant 0 : index
    %381 = vector.load %arg23[%c32_213, %c0_214] : memref<48x128xf32, #tpu.memory_space<vmem>>, vector<16x128xf32>
    %382 = arith.addf %380, %381 : vector<16x128xf32>
    %cst_215 = arith.constant 0.707106769 : f32
    %383 = vector.broadcast %cst_215 : f32 to vector<16x128xf32>
    %384 = arith.mulf %382, %383 : vector<16x128xf32>
    %c32_216 = arith.constant 32 : index
    %c0_217 = arith.constant 0 : index
    %385 = vector.load %arg23[%c32_216, %c0_217] : memref<48x128xf32, #tpu.memory_space<vmem>>, vector<16x128xf32>
    tpu.vector_store %arg23[%c32_216, %c0_217], %384 {strides = array<i32>} : memref<48x128xf32, #tpu.memory_space<vmem>>, vector<16x128xf32>,
    %c0_218 = arith.constant 0 : index
    %c0_219 = arith.constant 0 : index
    %386 = vector.load %arg23[%c0_218, %c0_219] : memref<48x128xf32, #tpu.memory_space<vmem>>, vector<48x128xf32>
    %387 = arith.truncf %386 : vector<48x128xf32> to vector<48x128xbf16>
    %c0_220 = arith.constant 0 : index
    %c0_221 = arith.constant 0 : index
    %388 = vector.load %arg24[%c0_220, %c0_221] : memref<48x128xbf16, #tpu.memory_space<vmem>>, vector<48x128xbf16>
    tpu.vector_store %arg24[%c0_220, %c0_221], %387 {strides = array<i32>} : memref<48x128xbf16, #tpu.memory_space<vmem>>, vector<48x128xbf16>,
    %c0_222 = arith.constant 0 : index
    %c0_223 = arith.constant 0 : index
    %389 = vector.load %arg18[%c0_222, %c0_223] : memref<768x128xbf16, #tpu.memory_space<vmem>>, vector<128x128xbf16>
    %c0_224 = arith.constant 0 : index
    %c0_225 = arith.constant 0 : index
    %390 = vector.load %arg24[%c0_224, %c0_225] : memref<48x128xbf16, #tpu.memory_space<vmem>>, vector<48x128xbf16>
    %cst_226 = arith.constant dense<0.000000e+00> : vector<48x128xf32>
    %391 = tpu.matmul %390, %389, %cst_226 {dimension_numbers = #tpu.dot_dimension_numbers<[1], [0], [0], [1], [0, 0, 1, 1], [], []>} : vector<48x128xbf16>, vector<128x128xbf16>, vector<48x128xf32> -> vector<48x128xf32>
    %392 = vector.extract_strided_slice %391 {offsets = [3, 0], sizes = [16, 128], strides = [1, 1]} : vector<48x128xf32> to vector<16x128xf32>
    %393 = vector.extract_strided_slice %391 {offsets = [27, 0], sizes = [16, 128], strides = [1, 1]} : vector<48x128xf32> to vector<16x128xf32>
    %c128_227 = arith.constant 128 : index
    %c0_228 = arith.constant 0 : index
    %394 = vector.load %arg18[%c128_227, %c0_228] : memref<768x128xbf16, #tpu.memory_space<vmem>>, vector<128x128xbf16>
    %c0_229 = arith.constant 0 : index
    %c0_230 = arith.constant 0 : index
    %395 = vector.load %arg24[%c0_229, %c0_230] : memref<48x128xbf16, #tpu.memory_space<vmem>>, vector<48x128xbf16>
    %cst_231 = arith.constant dense<0.000000e+00> : vector<48x128xf32>
    %396 = tpu.matmul %395, %394, %cst_231 {dimension_numbers = #tpu.dot_dimension_numbers<[1], [0], [0], [1], [0, 0, 1, 1], [], []>} : vector<48x128xbf16>, vector<128x128xbf16>, vector<48x128xf32> -> vector<48x128xf32>
    %397 = vector.extract_strided_slice %396 {offsets = [4, 0], sizes = [16, 128], strides = [1, 1]} : vector<48x128xf32> to vector<16x128xf32>
    %398 = arith.addf %392, %397 : vector<16x128xf32>
    %399 = vector.extract_strided_slice %396 {offsets = [28, 0], sizes = [16, 128], strides = [1, 1]} : vector<48x128xf32> to vector<16x128xf32>
    %400 = arith.addf %393, %399 : vector<16x128xf32>
    %c256_232 = arith.constant 256 : index
    %c0_233 = arith.constant 0 : index
    %401 = vector.load %arg18[%c256_232, %c0_233] : memref<768x128xbf16, #tpu.memory_space<vmem>>, vector<128x128xbf16>
    %c0_234 = arith.constant 0 : index
    %c0_235 = arith.constant 0 : index
    %402 = vector.load %arg24[%c0_234, %c0_235] : memref<48x128xbf16, #tpu.memory_space<vmem>>, vector<48x128xbf16>
    %cst_236 = arith.constant dense<0.000000e+00> : vector<48x128xf32>
    %403 = tpu.matmul %402, %401, %cst_236 {dimension_numbers = #tpu.dot_dimension_numbers<[1], [0], [0], [1], [0, 0, 1, 1], [], []>} : vector<48x128xbf16>, vector<128x128xbf16>, vector<48x128xf32> -> vector<48x128xf32>
    %404 = vector.extract_strided_slice %403 {offsets = [5, 0], sizes = [16, 128], strides = [1, 1]} : vector<48x128xf32> to vector<16x128xf32>
    %405 = arith.addf %398, %404 : vector<16x128xf32>
    %406 = vector.extract_strided_slice %403 {offsets = [29, 0], sizes = [16, 128], strides = [1, 1]} : vector<48x128xf32> to vector<16x128xf32>
    %407 = arith.addf %400, %406 : vector<16x128xf32>
    %c384_237 = arith.constant 384 : index
    %c0_238 = arith.constant 0 : index
    %408 = vector.load %arg18[%c384_237, %c0_238] : memref<768x128xbf16, #tpu.memory_space<vmem>>, vector<128x128xbf16>
    %c0_239 = arith.constant 0 : index
    %c0_240 = arith.constant 0 : index
    %409 = vector.load %arg24[%c0_239, %c0_240] : memref<48x128xbf16, #tpu.memory_space<vmem>>, vector<48x128xbf16>
    %cst_241 = arith.constant dense<0.000000e+00> : vector<48x128xf32>
    %410 = tpu.matmul %409, %408, %cst_241 {dimension_numbers = #tpu.dot_dimension_numbers<[1], [0], [0], [1], [0, 0, 1, 1], [], []>} : vector<48x128xbf16>, vector<128x128xbf16>, vector<48x128xf32> -> vector<48x128xf32>
    %411 = vector.extract_strided_slice %410 {offsets = [6, 0], sizes = [16, 128], strides = [1, 1]} : vector<48x128xf32> to vector<16x128xf32>
    %412 = arith.addf %405, %411 : vector<16x128xf32>
    %413 = vector.extract_strided_slice %410 {offsets = [30, 0], sizes = [16, 128], strides = [1, 1]} : vector<48x128xf32> to vector<16x128xf32>
    %414 = arith.addf %407, %413 : vector<16x128xf32>
    %c512_242 = arith.constant 512 : index
    %c0_243 = arith.constant 0 : index
    %415 = vector.load %arg18[%c512_242, %c0_243] : memref<768x128xbf16, #tpu.memory_space<vmem>>, vector<128x128xbf16>
    %c0_244 = arith.constant 0 : index
    %c0_245 = arith.constant 0 : index
    %416 = vector.load %arg24[%c0_244, %c0_245] : memref<48x128xbf16, #tpu.memory_space<vmem>>, vector<48x128xbf16>
    %cst_246 = arith.constant dense<0.000000e+00> : vector<48x128xf32>
    %417 = tpu.matmul %416, %415, %cst_246 {dimension_numbers = #tpu.dot_dimension_numbers<[1], [0], [0], [1], [0, 0, 1, 1], [], []>} : vector<48x128xbf16>, vector<128x128xbf16>, vector<48x128xf32> -> vector<48x128xf32>
    %418 = vector.extract_strided_slice %417 {offsets = [7, 0], sizes = [16, 128], strides = [1, 1]} : vector<48x128xf32> to vector<16x128xf32>
    %419 = arith.addf %412, %418 : vector<16x128xf32>
    %420 = vector.extract_strided_slice %417 {offsets = [31, 0], sizes = [16, 128], strides = [1, 1]} : vector<48x128xf32> to vector<16x128xf32>
    %421 = arith.addf %414, %420 : vector<16x128xf32>
    %c640 = arith.constant 640 : index
    %c0_247 = arith.constant 0 : index
    %422 = vector.load %arg18[%c640, %c0_247] : memref<768x128xbf16, #tpu.memory_space<vmem>>, vector<128x128xbf16>
    %c0_248 = arith.constant 0 : index
    %c0_249 = arith.constant 0 : index
    %423 = vector.load %arg24[%c0_248, %c0_249] : memref<48x128xbf16, #tpu.memory_space<vmem>>, vector<48x128xbf16>
    %cst_250 = arith.constant dense<0.000000e+00> : vector<48x128xf32>
    %424 = tpu.matmul %423, %422, %cst_250 {dimension_numbers = #tpu.dot_dimension_numbers<[1], [0], [0], [1], [0, 0, 1, 1], [], []>} : vector<48x128xbf16>, vector<128x128xbf16>, vector<48x128xf32> -> vector<48x128xf32>
    %425 = vector.extract_strided_slice %424 {offsets = [8, 0], sizes = [16, 128], strides = [1, 1]} : vector<48x128xf32> to vector<16x128xf32>
    %426 = arith.addf %419, %425 : vector<16x128xf32>
    %427 = vector.extract_strided_slice %424 {offsets = [32, 0], sizes = [16, 128], strides = [1, 1]} : vector<48x128xf32> to vector<16x128xf32>
    %428 = arith.addf %421, %427 : vector<16x128xf32>
    %c0_251 = arith.constant 0 : index
    %c0_252 = arith.constant 0 : index
    %429 = vector.load %arg19[%c0_251, %c0_252] : memref<1x128xf32, #tpu.memory_space<vmem>>, vector<1x128xf32>
    %c0_253 = arith.constant 0 : index
    %c0_254 = arith.constant 0 : index
    %430 = vector.load %arg20[%c0_253, %c0_254] : memref<1x128xf32, #tpu.memory_space<vmem>>, vector<1x128xf32>
    %c0_255 = arith.constant 0 : index
    %c0_256 = arith.constant 0 : index
    %431 = vector.load %arg21[%c0_255, %c0_256] : memref<1x128xf32, #tpu.memory_space<vmem>>, vector<1x128xf32>
    %432 = vector.broadcast %429 : vector<1x128xf32> to vector<16x128xf32>
    %433 = arith.addf %426, %432 : vector<16x128xf32>
    %cst_257 = arith.constant dense<0.000000e+00> : vector<16xf32>
    %434 = vector.multi_reduction <add>, %433, %cst_257 [1] : vector<16x128xf32> to vector<16xf32>
    %435 = vector.shape_cast %434 : vector<16xf32> to vector<16x1xf32>
    %cst_258 = arith.constant dense<0.000000e+00> : vector<1xf32>
    %436 = vector.multi_reduction <add>, %435, %cst_258 [0] : vector<16x1xf32> to vector<1xf32>
    %437 = vector.shape_cast %436 : vector<1xf32> to vector<1x1xf32>
    %cst_259 = arith.constant 4.8828125E-4 : f32
    %438 = vector.broadcast %cst_259 : f32 to vector<1x1xf32>
    %439 = arith.mulf %437, %438 : vector<1x1xf32>
    %440 = vector.broadcast %439 : vector<1x1xf32> to vector<16x128xf32>
    %441 = arith.subf %433, %440 : vector<16x128xf32>
    %442 = arith.mulf %441, %441 : vector<16x128xf32>
    %cst_260 = arith.constant dense<0.000000e+00> : vector<16xf32>
    %443 = vector.multi_reduction <add>, %442, %cst_260 [1] : vector<16x128xf32> to vector<16xf32>
    %444 = vector.shape_cast %443 : vector<16xf32> to vector<16x1xf32>
    %cst_261 = arith.constant dense<0.000000e+00> : vector<1xf32>
    %445 = vector.multi_reduction <add>, %444, %cst_261 [0] : vector<16x1xf32> to vector<1xf32>
    %446 = vector.shape_cast %445 : vector<1xf32> to vector<1x1xf32>
    %cst_262 = arith.constant 4.8828125E-4 : f32
    %447 = vector.broadcast %cst_262 : f32 to vector<1x1xf32>
    %448 = arith.mulf %446, %447 : vector<1x1xf32>
    %cst_263 = arith.constant 9.99999974E-6 : f32
    %449 = vector.broadcast %cst_263 : f32 to vector<1x1xf32>
    %450 = arith.addf %448, %449 : vector<1x1xf32>
    %451 = math.rsqrt %450 : vector<1x1xf32>
    %452 = vector.broadcast %451 : vector<1x1xf32> to vector<16x128xf32>
    %453 = arith.mulf %441, %452 : vector<16x128xf32>
    %454 = vector.broadcast %430 : vector<1x128xf32> to vector<16x128xf32>
    %455 = arith.mulf %453, %454 : vector<16x128xf32>
    %456 = vector.broadcast %431 : vector<1x128xf32> to vector<16x128xf32>
    %457 = arith.addf %455, %456 : vector<16x128xf32>
    %cst_264 = arith.constant 0.000000e+00 : f32
    %458 = vector.broadcast %cst_264 : f32 to vector<16x128xf32>
    %459 = arith.maximumf %457, %458 : vector<16x128xf32>
    %c8_265 = arith.constant 8 : index
    %c0_266 = arith.constant 0 : index
    %460 = vector.load %arg23[%c8_265, %c0_266] : memref<48x128xf32, #tpu.memory_space<vmem>>, vector<16x128xf32>
    %461 = arith.addf %459, %460 : vector<16x128xf32>
    %cst_267 = arith.constant 0.707106769 : f32
    %462 = vector.broadcast %cst_267 : f32 to vector<16x128xf32>
    %463 = arith.mulf %461, %462 : vector<16x128xf32>
    %c8_268 = arith.constant 8 : index
    %c0_269 = arith.constant 0 : index
    %464 = vector.load %arg23[%c8_268, %c0_269] : memref<48x128xf32, #tpu.memory_space<vmem>>, vector<16x128xf32>
    tpu.vector_store %arg23[%c8_268, %c0_269], %463 {strides = array<i32>} : memref<48x128xf32, #tpu.memory_space<vmem>>, vector<16x128xf32>,
    %465 = vector.broadcast %429 : vector<1x128xf32> to vector<16x128xf32>
    %466 = arith.addf %428, %465 : vector<16x128xf32>
    %cst_270 = arith.constant dense<0.000000e+00> : vector<16xf32>
    %467 = vector.multi_reduction <add>, %466, %cst_270 [1] : vector<16x128xf32> to vector<16xf32>
    %468 = vector.shape_cast %467 : vector<16xf32> to vector<16x1xf32>
    %cst_271 = arith.constant dense<0.000000e+00> : vector<1xf32>
    %469 = vector.multi_reduction <add>, %468, %cst_271 [0] : vector<16x1xf32> to vector<1xf32>
    %470 = vector.shape_cast %469 : vector<1xf32> to vector<1x1xf32>
    %cst_272 = arith.constant 4.8828125E-4 : f32
    %471 = vector.broadcast %cst_272 : f32 to vector<1x1xf32>
    %472 = arith.mulf %470, %471 : vector<1x1xf32>
    %473 = vector.broadcast %472 : vector<1x1xf32> to vector<16x128xf32>
    %474 = arith.subf %466, %473 : vector<16x128xf32>
    %475 = arith.mulf %474, %474 : vector<16x128xf32>
    %cst_273 = arith.constant dense<0.000000e+00> : vector<16xf32>
    %476 = vector.multi_reduction <add>, %475, %cst_273 [1] : vector<16x128xf32> to vector<16xf32>
    %477 = vector.shape_cast %476 : vector<16xf32> to vector<16x1xf32>
    %cst_274 = arith.constant dense<0.000000e+00> : vector<1xf32>
    %478 = vector.multi_reduction <add>, %477, %cst_274 [0] : vector<16x1xf32> to vector<1xf32>
    %479 = vector.shape_cast %478 : vector<1xf32> to vector<1x1xf32>
    %cst_275 = arith.constant 4.8828125E-4 : f32
    %480 = vector.broadcast %cst_275 : f32 to vector<1x1xf32>
    %481 = arith.mulf %479, %480 : vector<1x1xf32>
    %cst_276 = arith.constant 9.99999974E-6 : f32
    %482 = vector.broadcast %cst_276 : f32 to vector<1x1xf32>
    %483 = arith.addf %481, %482 : vector<1x1xf32>
    %484 = math.rsqrt %483 : vector<1x1xf32>
    %485 = vector.broadcast %484 : vector<1x1xf32> to vector<16x128xf32>
    %486 = arith.mulf %474, %485 : vector<16x128xf32>
    %487 = vector.broadcast %430 : vector<1x128xf32> to vector<16x128xf32>
    %488 = arith.mulf %486, %487 : vector<16x128xf32>
    %489 = vector.broadcast %431 : vector<1x128xf32> to vector<16x128xf32>
    %490 = arith.addf %488, %489 : vector<16x128xf32>
    %cst_277 = arith.constant 0.000000e+00 : f32
    %491 = vector.broadcast %cst_277 : f32 to vector<16x128xf32>
    %492 = arith.maximumf %490, %491 : vector<16x128xf32>
    %c32_278 = arith.constant 32 : index
    %c0_279 = arith.constant 0 : index
    %493 = vector.load %arg23[%c32_278, %c0_279] : memref<48x128xf32, #tpu.memory_space<vmem>>, vector<16x128xf32>
    %494 = arith.addf %492, %493 : vector<16x128xf32>
    %cst_280 = arith.constant 0.707106769 : f32
    %495 = vector.broadcast %cst_280 : f32 to vector<16x128xf32>
    %496 = arith.mulf %494, %495 : vector<16x128xf32>
    %c32_281 = arith.constant 32 : index
    %c0_282 = arith.constant 0 : index
    %497 = vector.load %arg23[%c32_281, %c0_282] : memref<48x128xf32, #tpu.memory_space<vmem>>, vector<16x128xf32>
    tpu.vector_store %arg23[%c32_281, %c0_282], %496 {strides = array<i32>} : memref<48x128xf32, #tpu.memory_space<vmem>>, vector<16x128xf32>,
    %c8_283 = arith.constant 8 : index
    %c0_284 = arith.constant 0 : index
    %498 = vector.load %arg23[%c8_283, %c0_284] : memref<48x128xf32, #tpu.memory_space<vmem>>, vector<16x128xf32>
    %c0_285 = arith.constant 0 : index
    %c0_286 = arith.constant 0 : index
    %499 = vector.load %arg22[%c0_285, %c0_286] : memref<32x128xf32, #tpu.memory_space<vmem>>, vector<16x128xf32>
    tpu.vector_store %arg22[%c0_285, %c0_286], %498 {strides = array<i32>} : memref<32x128xf32, #tpu.memory_space<vmem>>, vector<16x128xf32>,
    %c32_287 = arith.constant 32 : index
    %c0_288 = arith.constant 0 : index
    %500 = vector.load %arg23[%c32_287, %c0_288] : memref<48x128xf32, #tpu.memory_space<vmem>>, vector<16x128xf32>
    %c16_289 = arith.constant 16 : index
    %c0_290 = arith.constant 0 : index
    %501 = vector.load %arg22[%c16_289, %c0_290] : memref<32x128xf32, #tpu.memory_space<vmem>>, vector<16x128xf32>
    tpu.vector_store %arg22[%c16_289, %c0_290], %500 {strides = array<i32>} : memref<32x128xf32, #tpu.memory_space<vmem>>, vector<16x128xf32>,
    return
  }
  func.func @transform_0(%arg0: i32) -> (i32, i32) {
    %c0_i32 = arith.constant 0 : i32
    %c0_i32_0 = arith.constant 0 : i32
    return %arg0, %c0_i32 : i32, i32
  }
  func.func @transform_1(%arg0: i32) -> (i32, i32) {
    %c0_i32 = arith.constant 0 : i32
    %c0_i32_0 = arith.constant 0 : i32
    %c0_i32_1 = arith.constant 0 : i32
    return %c0_i32, %c0_i32_0 : i32, i32
  }
  func.func @transform_2(%arg0: i32) -> (i32, i32) {
    %c0_i32 = arith.constant 0 : i32
    %c0_i32_0 = arith.constant 0 : i32
    %c0_i32_1 = arith.constant 0 : i32
    return %c0_i32, %c0_i32_0 : i32, i32
  }
  func.func @transform_3(%arg0: i32) -> (i32, i32) {
    %c0_i32 = arith.constant 0 : i32
    %c0_i32_0 = arith.constant 0 : i32
    %c0_i32_1 = arith.constant 0 : i32
    return %c0_i32, %c0_i32_0 : i32, i32
  }
  func.func @transform_4(%arg0: i32) -> (i32, i32) {
    %c0_i32 = arith.constant 0 : i32
    %c0_i32_0 = arith.constant 0 : i32
    %c0_i32_1 = arith.constant 0 : i32
    return %c0_i32, %c0_i32_0 : i32, i32
  }
  func.func @transform_5(%arg0: i32) -> (i32, i32) {
    %c0_i32 = arith.constant 0 : i32
    %c0_i32_0 = arith.constant 0 : i32
    %c0_i32_1 = arith.constant 0 : i32
    return %c0_i32, %c0_i32_0 : i32, i32
  }
  func.func @transform_6(%arg0: i32) -> (i32, i32) {
    %c0_i32 = arith.constant 0 : i32
    %c0_i32_0 = arith.constant 0 : i32
    %c0_i32_1 = arith.constant 0 : i32
    return %c0_i32, %c0_i32_0 : i32, i32
  }
  func.func @transform_7(%arg0: i32) -> (i32, i32) {
    %c0_i32 = arith.constant 0 : i32
    %c0_i32_0 = arith.constant 0 : i32
    %c0_i32_1 = arith.constant 0 : i32
    return %c0_i32, %c0_i32_0 : i32, i32
  }
  func.func @transform_8(%arg0: i32) -> (i32, i32) {
    %c0_i32 = arith.constant 0 : i32
    %c0_i32_0 = arith.constant 0 : i32
    %c0_i32_1 = arith.constant 0 : i32
    return %c0_i32, %c0_i32_0 : i32, i32
  }
  func.func @transform_9(%arg0: i32) -> (i32, i32) {
    %c0_i32 = arith.constant 0 : i32
    %c0_i32_0 = arith.constant 0 : i32
    %c0_i32_1 = arith.constant 0 : i32
    return %c0_i32, %c0_i32_0 : i32, i32
  }
  func.func @transform_10(%arg0: i32) -> (i32, i32) {
    %c0_i32 = arith.constant 0 : i32
    %c0_i32_0 = arith.constant 0 : i32
    %c0_i32_1 = arith.constant 0 : i32
    return %c0_i32, %c0_i32_0 : i32, i32
  }
  func.func @transform_11(%arg0: i32) -> (i32, i32) {
    %c0_i32 = arith.constant 0 : i32
    %c0_i32_0 = arith.constant 0 : i32
    %c0_i32_1 = arith.constant 0 : i32
    return %c0_i32, %c0_i32_0 : i32, i32
  }
  func.func @transform_12(%arg0: i32) -> (i32, i32) {
    %c0_i32 = arith.constant 0 : i32
    %c0_i32_0 = arith.constant 0 : i32
    %c0_i32_1 = arith.constant 0 : i32
    return %c0_i32, %c0_i32_0 : i32, i32
  }
  func.func @transform_13(%arg0: i32) -> (i32, i32) {
    %c0_i32 = arith.constant 0 : i32
    %c0_i32_0 = arith.constant 0 : i32
    %c0_i32_1 = arith.constant 0 : i32
    return %c0_i32, %c0_i32_0 : i32, i32
  }
  func.func @transform_14(%arg0: i32) -> (i32, i32) {
    %c0_i32 = arith.constant 0 : i32
    %c0_i32_0 = arith.constant 0 : i32
    %c0_i32_1 = arith.constant 0 : i32
    return %c0_i32, %c0_i32_0 : i32, i32
  }
  func.func @transform_15(%arg0: i32) -> (i32, i32) {
    %c0_i32 = arith.constant 0 : i32
    %c0_i32_0 = arith.constant 0 : i32
    %c0_i32_1 = arith.constant 0 : i32
    return %c0_i32, %c0_i32_0 : i32, i32
  }
  func.func @transform_16(%arg0: i32) -> (i32, i32) {
    %c0_i32 = arith.constant 0 : i32
    %c0_i32_0 = arith.constant 0 : i32
    %c0_i32_1 = arith.constant 0 : i32
    return %c0_i32, %c0_i32_0 : i32, i32
  }
  func.func @transform_17(%arg0: i32) -> (i32, i32) {
    %c0_i32 = arith.constant 0 : i32
    %c0_i32_0 = arith.constant 0 : i32
    %c0_i32_1 = arith.constant 0 : i32
    return %c0_i32, %c0_i32_0 : i32, i32
  }
  func.func @transform_18(%arg0: i32) -> (i32, i32) {
    %c0_i32 = arith.constant 0 : i32
    %c0_i32_0 = arith.constant 0 : i32
    %c0_i32_1 = arith.constant 0 : i32
    return %c0_i32, %c0_i32_0 : i32, i32
  }
  func.func @transform_19(%arg0: i32) -> (i32, i32) {
    %c0_i32 = arith.constant 0 : i32
    %c0_i32_0 = arith.constant 0 : i32
    %c0_i32_1 = arith.constant 0 : i32
    return %c0_i32, %c0_i32_0 : i32, i32
  }
  func.func @transform_20(%arg0: i32) -> (i32, i32) {
    %c0_i32 = arith.constant 0 : i32
    %c0_i32_0 = arith.constant 0 : i32
    %c0_i32_1 = arith.constant 0 : i32
    return %c0_i32, %c0_i32_0 : i32, i32
  }
  func.func @transform_21(%arg0: i32) -> (i32, i32) {
    %c0_i32 = arith.constant 0 : i32
    %c0_i32_0 = arith.constant 0 : i32
    return %arg0, %c0_i32 : i32, i32
  }
}

</mosaic_0001>

<bundles_post_ra>
// kernel: aggregator_forward.1
= control target key start
LH: loop header
LB: loop body
LE: loop exit
PB: predicated region body
PF: predicated region fallthrough
CT: control target
= control target key end

     0   :  { %s6368_s0 = inlined_call_operand.vmem [shape: f32[32,128], index: 0, kind: input, shape index: {}, may-alias: {0,21}]   ;;  %s6369_s1 = inlined_call_operand.hbm [shape: bf16[256,128], index: 1, kind: input, shape index: {}]   ;;  %s6370_s2 = inlined_call_operand.vmem [shape: f32[1,128], index: 2, kind: input, shape index: {}]   ;;  %s6371_s3 = inlined_call_operand.vmem [shape: f32[1,128], index: 3, kind: input, shape index: {}]   ;;  %s6372_s4 = inlined_call_operand.vmem [shape: f32[1,128], index: 4, kind: input, shape index: {}]   ;;  %s6373_s5 = inlined_call_operand.hbm [shape: bf16[384,128], index: 5, kind: input, shape index: {}]   ;;  %s6374_s6 = inlined_call_operand.vmem [shape: f32[1,128], index: 6, kind: input, shape index: {}]   ;;  %s6375_s7 = inlined_call_operand.vmem [shape: f32[1,128], index: 7, kind: input, shape index: {}]   ;;  %s6376_s8 = inlined_call_operand.vmem [shape: f32[1,128], index: 8, kind: input, shape index: {}]   ;;  %s6377_s9 = inlined_call_operand.hbm [shape: bf16[512,128], index: 9, kind: input, shape index: {}]   ;;  %s6378_s10 = inlined_call_operand.vmem [shape: f32[1,128], index: 10, kind: input, shape index: {}]   ;;  %s6379_s11 = inlined_call_operand.vmem [shape: f32[1,128], index: 11, kind: input, shape index: {}]   ;;  %s6380_s12 = inlined_call_operand.vmem [shape: f32[1,128], index: 12, kind: input, shape index: {}]   ;;  %s6381_s13 = inlined_call_operand.hbm [shape: bf16[640,128], index: 13, kind: input, shape index: {}]   ;;  %s6382_s14 = inlined_call_operand.vmem [shape: f32[1,128], index: 14, kind: input, shape index: {}]   ;;  %s6383_s15 = inlined_call_operand.vmem [shape: f32[1,128], index: 15, kind: input, shape index: {}]   ;;  %s6384_s16 = inlined_call_operand.vmem [shape: f32[1,128], index: 16, kind: input, shape index: {}]   ;;  %s6385_s17 = inlined_call_operand.hbm [shape: bf16[768,128], index: 17, kind: input, shape index: {}]   ;;  %s6386_s18 = inlined_call_operand.vmem [shape: f32[1,128], index: 18, kind: input, shape index: {}]   ;;  %s6387_s19 = inlined_call_operand.vmem [shape: f32[1,128], index: 19, kind: input, shape index: {}]   ;;  %s6388_s20 = inlined_call_operand.vmem [shape: f32[1,128], index: 20, kind: input, shape index: {}]   ;;  %s6389_s21 = inlined_call_operand.vmem [shape: f32[32,128], index: 21, kind: output, shape index: {}, may-alias: {0,21}]  }
   0x1   :  { %6394 = sst [smem:[#allocation15_spill]] %s6368_s0 }
   0x2   :  { %6395 = sst [smem:[#allocation16_spill]] %s6369_s1 }
   0x3   :  { %6396 = sst [smem:[#allocation17_spill]] %s6370_s2 }
   0x4   :  { %6397 = sst [smem:[#allocation18_spill]] %s6371_s3 }
   0x5   :  { %6398 = sst [smem:[#allocation19_spill]] %s6372_s4 }
   0x6   :  { %6399 = sst [smem:[#allocation20_spill]] %s6373_s5 }
   0x7   :  { %6400 = sst [smem:[#allocation21_spill]] %s6388_s20 }
   0x8   :  { %6401 = sst [smem:[#allocation22_spill]] %s6389_s21 }
   0x9   :  { %26 = vsyncpa [#allocation5], 0 }
   0xa   :  { %27 = vsyncpa [#allocation7], 0 }
   0xb   :  { %28 = vsyncpa [#allocation10], 0  ;;  %s5361_s2 = smov [#allocation6]   ;;  %s5362_s26 = smov [#allocation9]  }
   0xc   :  { %s54_s25 = sshll.u32 %s5361_s2, 4  ;;  %s90_s27 = sshll.u32 %s5362_s26, 4  ;;  %s55_s25 = int_to_ptr.vmem [resolvable:$true] %s54_s25  ;;  %s5480_s27 = int_to_ptr.vmem [resolvable:$true] %s90_s27 }
   0xd   :  { %s6402_s29 = sld [smem:[#allocation20_spill]] }
  0x13   :  { %s5245_s0 = scalar_lea.hbm %s6402_s29, 3072 }
  0x14   :  { %p5246_p0 = scmp.ne.s32.totalorder %s6402_s29, %s5245_s0  ;;  %p5249_p1 = scmp.lt.u32.totalorder %s5245_s0, %s6402_s29 }
  0x16   :  { %p5251_p2 = pnand %p5249_p1, %p5246_p0 }
  0x18   :  { %5254 = shalt.err (!%p5251_p2)
}
  0x19   :  { %s5255_s23 = scalar_lea.vmem %s55_s25, 3072  ;;  %p5260_p4 = scmp.lt.s32.totalorder %s55_s25, %s55_s25 }
  0x1a   :  { %p5256_p3 = scmp.ne.s32.totalorder %s55_s25, %s5255_s23  ;;  %p5261_p5 = scmp.lt.s32.totalorder %s5255_s23, %s5255_s23 }
  0x1c   :  { %p5262_p6 = por %p5261_p5, %p5260_p4 }
  0x1e   :  { %p5263_p7 = pnand %p5262_p6, %p5256_p3 }
  0x20   :  { %5266 = shalt.err (!%p5263_p7)
}
  0x21   :  { %s5363_s1 = smov 64   ;;  %s5364_s24 = smov 4  }
  0x22   :  { %60 = dma.hbm_to_vmem [thread:$0]  %s6402_s29, 3072, %s55_s25, [#allocation7], %s5363_s1, %s5363_s1, %s5364_s24  }
  0x23   :  { %s5267_s0 = scalar_lea.hbm %s6381_s13, 5120 }
  0x24   :  { %p5268_p8 = scmp.ne.s32.totalorder %s6381_s13, %s5267_s0  ;;  %p5271_p9 = scmp.lt.u32.totalorder %s5267_s0, %s6381_s13 }
  0x26   :  { %p5273_p10 = pnand %p5271_p9, %p5268_p8 }
  0x28   :  { %5276 = shalt.err (!%p5273_p10)
}
  0x29   :  { %s5277_s23 = scalar_lea.vmem %s5480_s27, 5120  ;;  %p5282_p12 = scmp.lt.s32.totalorder %s5480_s27, %s5480_s27 }
  0x2a   :  { %p5278_p11 = scmp.ne.s32.totalorder %s5480_s27, %s5277_s23  ;;  %p5283_p13 = scmp.lt.s32.totalorder %s5277_s23, %s5277_s23 }
  0x2c   :  { %p5284_p0 = por %p5283_p13, %p5282_p12 }
  0x2e   :  { %p5285_p1 = pnand %p5284_p0, %p5278_p11 }
  0x30   :  { %5288 = shalt.err (!%p5285_p1)
}
  0x31   :  { %96 = dma.hbm_to_vmem [thread:$0]  %s6381_s13, 5120, %s5480_s27, [#allocation10], %s5363_s1, %s5363_s1, %s5364_s24  }
  0x32   :  { %s5365_s2 = smov [#allocation4]   ;;  %s5366_s3 = smov [#allocation8]  }
  0x33   :  { %s36_s26 = sshll.u32 %s5365_s2, 4  ;;  %s72_s28 = sshll.u32 %s5366_s3, 4  ;;  %s37_s26 = int_to_ptr.vmem [resolvable:$true] %s36_s26  ;;  %s5517_s28 = int_to_ptr.vmem [resolvable:$true] %s72_s28 }
  0x34   :  { %s6403_s30 = sld [smem:[#allocation16_spill]] }
  0x3a   :  { %s5289_s5 = scalar_lea.hbm %s6403_s30, 2048 }
  0x3b   :  { %p5290_p2 = scmp.ne.s32.totalorder %s6403_s30, %s5289_s5  ;;  %p5293_p3 = scmp.lt.u32.totalorder %s5289_s5, %s6403_s30 }
  0x3d   :  { %p5295_p4 = pnand %p5293_p3, %p5290_p2 }
  0x3f   :  { %5298 = shalt.err (!%p5295_p4)
}
  0x40   :  { %s5299_s13 = scalar_lea.vmem %s37_s26, 2048  ;;  %p5304_p6 = scmp.lt.s32.totalorder %s37_s26, %s37_s26 }
  0x41   :  { %p5300_p5 = scmp.ne.s32.totalorder %s37_s26, %s5299_s13  ;;  %p5305_p7 = scmp.lt.s32.totalorder %s5299_s13, %s5299_s13 }
  0x43   :  { %p5306_p8 = por %p5305_p7, %p5304_p6 }
  0x45   :  { %p5307_p9 = pnand %p5306_p8, %p5300_p5 }
  0x47   :  { %5310 = shalt.err (!%p5307_p9)
}
  0x48   :  { %42 = dma.hbm_to_vmem [thread:$0]  %s6403_s30, 2048, %s37_s26, [#allocation5], %s5363_s1, %s5363_s1, %s5364_s24  }
  0x49   :  { %s5311_s20 = scalar_lea.hbm %s6377_s9, 4096 }
  0x4a   :  { %p5312_p10 = scmp.ne.s32.totalorder %s6377_s9, %s5311_s20  ;;  %p5315_p11 = scmp.lt.u32.totalorder %s5311_s20, %s6377_s9 }
  0x4c   :  { %p5317_p12 = pnand %p5315_p11, %p5312_p10 }
  0x4e   :  { %5320 = shalt.err (!%p5317_p12)
}
  0x4f   :  { %s5321_s5 = scalar_lea.vmem %s5517_s28, 4096  ;;  %p5326_p0 = scmp.lt.s32.totalorder %s5517_s28, %s5517_s28 }
  0x50   :  { %p5322_p13 = scmp.ne.s32.totalorder %s5517_s28, %s5321_s5  ;;  %p5327_p1 = scmp.lt.s32.totalorder %s5321_s5, %s5321_s5 }
  0x52   :  { %p5328_p2 = por %p5327_p1, %p5326_p0 }
  0x54   :  { %p5329_p3 = pnand %p5328_p2, %p5322_p13 }
  0x56   :  { %5332 = shalt.err (!%p5329_p3)
}
  0x57   :  { %78 = dma.hbm_to_vmem [thread:$0]  %s6377_s9, 4096, %s5517_s28, [#allocation7], %s5363_s1, %s5363_s1, %s5364_s24  }
  0x58   :  { %s5367_s22 = smov [#allocation11]   ;;  %s5333_s25 = scalar_lea.hbm %s6385_s17, 6144 }
  0x59   :  { %s108_s23 = sshll.u32 %s5367_s22, 4  ;;  %p5334_p4 = scmp.ne.s32.totalorder %s6385_s17, %s5333_s25  ;;  %s109_s23 = int_to_ptr.vmem [resolvable:$true] %s108_s23 }
  0x5a   :  { %p5337_p5 = scmp.lt.u32.totalorder %s5333_s25, %s6385_s17 }
  0x5c   :  { %p5339_p6 = pnand %p5337_p5, %p5334_p4 }
  0x5e   :  { %5342 = shalt.err (!%p5339_p6)
}
  0x5f   :  { %s5343_s3 = scalar_lea.vmem %s109_s23, 6144  ;;  %p5348_p8 = scmp.lt.s32.totalorder %s109_s23, %s109_s23 }
  0x60   :  { %p5344_p7 = scmp.ne.s32.totalorder %s109_s23, %s5343_s3  ;;  %p5349_p9 = scmp.lt.s32.totalorder %s5343_s3, %s5343_s3 }
  0x62   :  { %p5350_p10 = por %p5349_p9, %p5348_p8 }
  0x64   :  { %p5351_p11 = pnand %p5350_p10, %p5344_p7 }
  0x66   :  { %5354 = shalt.err (!%p5351_p11)
}
  0x67   :  { %114 = dma.hbm_to_vmem [thread:$0]  %s6385_s17, 6144, %s109_s23, [#allocation10], %s5363_s1, %s5363_s1, %s5364_s24  }
  0x68   :  { %5355 = dma.done.wait [#allocation5], 2048  }
  0x69   :  { %5356 = vsyncadd [#allocation5], 4294965248 }
  0x6a   :  { %5357 = dma.done.wait [#allocation7], 7168  }
  0x6b   :  { %5358 = vsyncadd [#allocation7], 4294960128 }
  0x6c   :  { %5359 = dma.done.wait [#allocation10], 11264  }
  0x6d   :  { %5360 = vsyncadd [#allocation10], 4294956032  ;;  %v5368_v0 = vmov 0.0   ;;  %vm5369_vm0 = vmmov 0   ;;  %v5058_v1 = vld [vmem:[#allocation4] sm:$0xff]   ;;  %v5060_v3 = vld [vmem:[#allocation4 + $0x8] sm:$0xff]  }
  0x6e   :  { %4489 = vmatprep.subr.bf16.mxu0 %v5368_v0  ;;  %137 = vst [vmem:[#allocation2] sm:$0xff] %v5368_v0  ;;  %4517 = vmatprep.subr.bf16.mxu1 %v5368_v0  ;;  %v5059_v2 = vld [vmem:[#allocation4 + $0x40] sm:$0xff]   ;;  %v5061_v4 = vld [vmem:[#allocation4 + $0x48] sm:$0xff]   ;;  %v5062_v5 = vld [vmem:[#allocation4 + $0x10] sm:$0xff]   ;;  %s6404_s24 = sld [smem:[#allocation15_spill]]  ;;  %s6405_s27 = sld [smem:[#allocation17_spill]] }
  0x6f   :  { %4505 = vmatprep.mubr.msk.bf16.mxu0 %vm5369_vm0, %v5368_v0  ;;  %4533 = vmatprep.mubr.msk.bf16.mxu1 %vm5369_vm0, %v5368_v0  ;;  %v5063_v6 = vld [vmem:[#allocation4 + $0x50] sm:$0xff]   ;;  %v5064_v7 = vld [vmem:[#allocation4 + $0x18] sm:$0xff]   ;;  %v5066_v9 = vld [vmem:[#allocation4 + $0x20] sm:$0xff]   ;;  %vm437_vm1 = vcmask 1047559   ;;  %vm404_vm2 = vcmask 1046528   ;;  %vm449_vm3 = vcmask 1040384  }
  0x70   :  { %4490 = vmatpush3.bf16.msra.mxu0 %v5058_v1  ;;  %4518 = vmatpush3.bf16.msra.mxu1 %v5059_v2  ;;  %v5065_v8 = vld [vmem:[#allocation4 + $0x58] sm:$0xff]   ;;  %v5067_v10 = vld [vmem:[#allocation4 + $0x60] sm:$0xff]   ;;  %v5068_v11 = vld [vmem:[#allocation4 + $0x28] sm:$0xff]   ;;  %s6406_s2 = sld [smem:[#allocation18_spill]]  ;;  %s6407_s3 = sld [smem:[#allocation19_spill]]  ;;  %vm1075_vm4 = vcmask 1047558  }
  0x71   :  { %4491 = vmatprep.subr.bf16.mxu0 %v5368_v0  ;;  %4519 = vmatprep.subr.bf16.mxu1 %v5368_v0  ;;  %v5069_v15 = vld [vmem:[#allocation4 + $0x68] sm:$0xff]   ;;  %v5070_v17 = vld [vmem:[#allocation4 + $0x30] sm:$0xff]   ;;  %v5072_v19 = vld [vmem:[#allocation4 + $0x38] sm:$0xff]   ;;  %vm1042_vm5 = vcmask 1045504   ;;  %vm1087_vm6 = vcmask 1041408   ;;  %vm1862_vm7 = vcmask 1047557  }
  0x72   :  { %v5071_v18 = vld [vmem:[#allocation4 + $0x70] sm:$0xff]   ;;  %v5073_v20 = vld [vmem:[#allocation4 + $0x78] sm:$0xff]   ;;  %vm1829_vm8 = vcmask 1044480   ;;  %vm1874_vm9 = vcmask 1042432   ;;  %vm2798_vm10 = vcmask 1047556   ;;  %vm2765_vm11 = vcmask 1043456  }
  0x73   :  { %vm3881_vm12 = vcmask 1047555   ;;  %s6408_s25 = sld [smem:[#allocation21_spill]] }
  0x74   :  { %4492 = vmatpush3.bf16.msra.mxu0 %v5060_v3  ;;  %4520 = vmatpush3.bf16.msra.mxu1 %v5061_v4  ;;  %v138_v12 = vld [vmem:[%s6404_s24] sm:$0xff]  ;;  %v139_v13 = vld [vmem:[%s6404_s24 + $0x8] sm:$0xff]  ;;  %v143_v14 = vld [vmem:[%s6404_s24 + $0x10] sm:$0xff] }
  0x75   :  { %4493 = vmatprep.subr.bf16.mxu0 %v5368_v0  ;;  %4521 = vmatprep.subr.bf16.mxu1 %v5368_v0  ;;  %140 = vst [vmem:[#allocation2 + $0x8] sm:$0xff] %v138_v12  ;;  %141 = vst [vmem:[#allocation2 + $0x10] sm:$0xff] %v139_v13  ;;  %v144_v16 = vld [vmem:[%s6404_s24 + $0x18] sm:$0xff]  ;;  %v153_v21 = vpack.c.bf16 %v138_v12, %v5368_v0  ;;  %v154_v22 = vpack.c.bf16 %v5368_v0, %v139_v13  ;;  %v4110_v33 = vld [vmem:[%s6405_s27] ss:$0 sm:$0xff] }
  0x76   :  { %145 = vst [vmem:[#allocation2 + $0x20] sm:$0xff] %v143_v14  ;;  %146 = vst [vmem:[#allocation2 + $0x28] sm:$0xff] %v144_v16  ;;  %v155_v23 = vpack.c.bf16 %v144_v16, %v143_v14 }
  0x78   :  { %4494 = vmatpush3.bf16.msra.mxu0 %v5062_v5  ;;  %4522 = vmatpush3.bf16.msra.mxu1 %v5063_v6 }
  0x79   :  { %4495 = vmatprep.subr.bf16.mxu0 %v5368_v0  ;;  %4523 = vmatprep.subr.bf16.mxu1 %v5368_v0 }
  0x7c   :  { %4496 = vmatpush3.bf16.msra.mxu0 %v5064_v7  ;;  %4524 = vmatpush3.bf16.msra.mxu1 %v5065_v8 }
  0x7d   :  { %4497 = vmatprep.subr.bf16.mxu0 %v5368_v0  ;;  %4525 = vmatprep.subr.bf16.mxu1 %v5368_v0 }
  0x80   :  { %4498 = vmatpush3.bf16.msra.mxu0 %v5066_v9  ;;  %4526 = vmatpush3.bf16.msra.mxu1 %v5067_v10 }
  0x81   :  { %4499 = vmatprep.subr.bf16.mxu0 %v5368_v0  ;;  %4527 = vmatprep.subr.bf16.mxu1 %v5368_v0 }
  0x84   :  { %4500 = vmatpush3.bf16.msra.mxu0 %v5068_v11  ;;  %4528 = vmatpush3.bf16.msra.mxu1 %v5069_v15 }
  0x85   :  { %4501 = vmatprep.subr.bf16.mxu0 %v5368_v0  ;;  %4529 = vmatprep.subr.bf16.mxu1 %v5368_v0 }
  0x88   :  { %4502 = vmatpush3.bf16.msra.mxu0 %v5070_v17  ;;  %4530 = vmatpush3.bf16.msra.mxu1 %v5071_v18 }
  0x89   :  { %4503 = vmatprep.subr.bf16.mxu0 %v5368_v0  ;;  %4531 = vmatprep.subr.bf16.mxu1 %v5368_v0 }
  0x8c   :  { %4504 = vmatpush3.bf16.msra.mxu0 %v5072_v19  ;;  %4532 = vmatpush3.bf16.msra.mxu1 %v5073_v20 }
  0x8d   :  { %4545 = vmatprep.subr.bf16.mxu0 %v5368_v0  ;;  %4573 = vmatprep.subr.bf16.mxu1 %v5368_v0 }
  0x8f   :  { %4506 = vmatmul.mubr.bf16.vlgmr.msra.gmra.mrb[0].mxu0 %v153_v21  ;;  %4534 = vmatmul.mubr.bf16.vlgmr.msra.gmra.mrb[0].mxu1 %v153_v21 }
  0x90   :  { %4509 = vmatprep.mubr.msk.bf16.mxu0 %vm5369_vm0, %v5368_v0  ;;  %4537 = vmatprep.mubr.msk.bf16.mxu1 %vm5369_vm0, %v5368_v0 }
  0x97   :  { %4510 = vmatmul.mubr.bf16.gmra.mrb[4].mxu0 %v154_v22  ;;  %4538 = vmatmul.mubr.bf16.gmra.mrb[4].mxu1 %v154_v22 }
  0x98   :  { %4513 = vmatprep.mubr.msk.bf16.mxu0 %vm5369_vm0, %v5368_v0  ;;  %4541 = vmatprep.mubr.msk.bf16.mxu1 %vm5369_vm0, %v5368_v0 }
  0x9f   :  { %4514 = vmatmul.mubr.bf16.gmra.mrb[8].mxu0 %v155_v23  ;;  %4542 = vmatmul.mubr.bf16.gmra.mrb[8].mxu1 %v155_v23 }
  0xa0   :  { %4561 = vmatprep.mubr.msk.bf16.mxu0 %vm5369_vm0, %v5368_v0  ;;  %4589 = vmatprep.mubr.msk.bf16.mxu1 %vm5369_vm0, %v5368_v0 }
 0x162   :  { %v260_v24 = vpop.f32.mrb[0].mxu0  ;;  %v381_v25 = vpop.f32.mrb[0].mxu1 }
 0x163   :  { %v4507_v26 = vpop.f32.mrb[1].mxu0  ;;  %v4535_v27 = vpop.f32.mrb[1].mxu1 }
 0x164   :  { %v263_v28 = vpop.f32.mrb[2].mxu0  ;;  %v383_v29 = vpop.f32.mrb[2].mxu1 }
 0x165   :  { %v4508_v30 = vpop.f32.mrb[3].mxu0  ;;  %v405_v31 = vrot.slane %v383_v29, 1  ;;  %v4536_v32 = vpop.f32.mrb[3].mxu1 }
 0x167   :  { %v411_v34 = vadd.f32 %v405_v31, %v260_v24 }
 0x169   :  { %v5621_v36 = vadd.f32 %v4110_v33, %v411_v34 }
 0x16a   :  { %v268_v35 = vpop.f32.mrb[4].mxu0  ;;  %v388_v37 = vpop.f32.mrb[4].mxu1 }
 0x16b   :  { %v4511_v38 = vpop.f32.mrb[5].mxu0  ;;  %v406_v39 = vrot.slane %v388_v37, 1  ;;  %v4539_v40 = vpop.f32.mrb[5].mxu1  ;;  %v438_v41 = vsel %vm437_vm1, %v5621_v36, 0.0 }
 0x16c   :  { %v271_v42 = vpop.f32.mrb[6].mxu0  ;;  %v391_v43 = vpop.f32.mrb[6].mxu1  ;;  %439 = vadd.xlane.f32.xlu0 %v438_v41 }
 0x16d   :  { %v4512_v44 = vpop.f32.mrb[7].mxu0  ;;  %v413_v45 = vadd.f32 %v406_v39, %v268_v35  ;;  %v4540_v46 = vpop.f32.mrb[7].mxu1  ;;  %v407_v47 = vsel %vm404_vm2, %v405_v31, %v406_v39 }
 0x16e   :  { %v412_v48 = vadd.f32 %v407_v47, %v263_v28 }
 0x16f   :  { %v436_v49 = vadd.f32 %v4110_v33, %v413_v45 }
 0x170   :  { %v435_v50 = vadd.f32 %v4110_v33, %v412_v48 }
 0x171   :  { %v443_v51 = vsel %vm404_vm2, %v436_v49, 0.0 }
 0x172   :  { %v276_v52 = vpop.f32.mrb[8].mxu0  ;;  %v395_v53 = vpop.f32.mrb[8].mxu1  ;;  %441 = vadd.xlane.f32.xlu0 %v435_v50  ;;  %444 = vadd.xlane.f32.xlu1 %v443_v51 }
 0x173   :  { %v4515_v54 = vpop.f32.mrb[9].mxu0  ;;  %v416_v55 = vrot.slane %v395_v53, 1  ;;  %v4543_v56 = vpop.f32.mrb[9].mxu1 }
 0x174   :  { %v279_v57 = vpop.f32.mrb[10].mxu0  ;;  %v398_v58 = vpop.f32.mrb[10].mxu1  ;;  %v5074_v56 = vld [vmem:[#allocation6] sm:$0xff]  }
 0x175   :  { %v4516_v59 = vpop.f32.mrb[11].mxu0  ;;  %v422_v60 = vadd.f32 %v416_v55, %v271_v42  ;;  %v417_v61 = vrot.slane %v398_v58, 1  ;;  %v4544_v62 = vpop.f32.mrb[11].mxu1  ;;  %4546 = vmatpush3.bf16.msra.mxu0 %v5074_v56  ;;  %v5076_v58 = vld [vmem:[#allocation6 + $0x8] sm:$0xff]  }
 0x176   :  { %4547 = vmatprep.subr.bf16.mxu0 %v5368_v0  ;;  %v5664_v59 = vld [vmem:[#allocation2] sm:$0xff]  ;;  %v5081_v0 = vld [vmem:[#allocation6 + $0x58] sm:$0xff]  }
 0x177   :  { %v418_v63 = vsel %vm404_vm2, %v416_v55, %v417_v61  ;;  %v424_v1 = vadd.f32 %v417_v61, %v279_v57  ;;  %v542_v2 = vadd.f32 %v4110_v33, %v422_v60  ;;  %v5075_v57 = vld [vmem:[#allocation6 + $0x40] sm:$0xff]   ;;  %v5077_v60 = vld [vmem:[#allocation6 + $0x48] sm:$0xff]   ;;  %v5078_v61 = vld [vmem:[#allocation6 + $0x10] sm:$0xff]  }
 0x178   :  { %v423_v3 = vadd.f32 %v418_v63, %v276_v52  ;;  %4574 = vmatpush3.bf16.msra.mxu1 %v5075_v57  ;;  %v5079_v62 = vld [vmem:[#allocation6 + $0x50] sm:$0xff]   ;;  %v5080_v63 = vld [vmem:[#allocation6 + $0x18] sm:$0xff]   ;;  %v5240_v57 = vld [vmem:[#allocation2 + $0x10] sm:$0xff] }
 0x179   :  { %v545_v4 = vsel %vm437_vm1, %v542_v2, 0.0  ;;  %v544_v5 = vadd.f32 %v4110_v33, %v424_v1  ;;  %4575 = vmatprep.subr.bf16.mxu1 %v5664_v59  ;;  %4548 = vmatpush3.bf16.msra.mxu0 %v5076_v58  ;;  %v5082_v1 = vld [vmem:[#allocation6 + $0x20] sm:$0xff]   ;;  %v528_v58 = vrot.slane %v5240_v57, 1 }
 0x17a   :  { %546 = vadd.xlane.f32.xlu1 %v545_v4  ;;  %v543_v6 = vadd.f32 %v4110_v33, %v423_v3  ;;  %4549 = vmatprep.subr.bf16.mxu0 %v5664_v59  ;;  %v5084_v3 = vld [vmem:[#allocation6 + $0x28] sm:$0xff]  }
 0x17b   :  { %v550_v7 = vsel %vm404_vm2, %v544_v5, 0.0  ;;  %v5085_v4 = vld [vmem:[#allocation6 + $0x68] sm:$0xff]  }
 0x17c   :  { %548 = vadd.xlane.f32.xlu0 %v543_v6  ;;  %4576 = vmatpush3.bf16.msra.mxu1 %v5077_v60 }
 0x17d   :  { %4577 = vmatprep.subr.bf16.mxu1 %v5664_v59  ;;  %4550 = vmatpush3.bf16.msra.mxu0 %v5078_v61 }
 0x17e   :  { %551 = vadd.xlane.f32.xlu1 %v550_v7  ;;  %4551 = vmatprep.subr.bf16.mxu0 %v5664_v59  ;;  %v5088_v7 = vld [vmem:[#allocation6 + $0x38] sm:$0xff]  }
 0x180   :  { %4578 = vmatpush3.bf16.msra.mxu1 %v5079_v62 }
 0x181   :  { %4579 = vmatprep.subr.bf16.mxu1 %v5664_v59  ;;  %4552 = vmatpush3.bf16.msra.mxu0 %v5080_v63 }
 0x182   :  { %4553 = vmatprep.subr.bf16.mxu0 %v5664_v59 }
 0x184   :  { %4580 = vmatpush3.bf16.msra.mxu1 %v5081_v0 }
 0x185   :  { %4581 = vmatprep.subr.bf16.mxu1 %v5664_v59  ;;  %4554 = vmatpush3.bf16.msra.mxu0 %v5082_v1 }
 0x186   :  { %4555 = vmatprep.subr.bf16.mxu0 %v5664_v59 }
 0x189   :  { %4556 = vmatpush3.bf16.msra.mxu0 %v5084_v3 }
 0x18a   :  { %4557 = vmatprep.subr.bf16.mxu0 %v5664_v59 }
 0x1f9   :  { %v440_v8 = vpop.xlane.xlu0 %439 }
 0x1fa   :  { %v450_v11 = vrot.slane %v440_v8, 7  ;;  %v5089_v8 = vld [vmem:[#allocation6 + $0x78] sm:$0xff]  }
 0x1ff   :  { %v442_v9 = vpop.xlane.xlu0 %441  ;;  %v445_v10 = vpop.xlane.xlu1 %444 }
 0x200   :  { %v451_v12 = vrot.slane %v442_v9, 7  ;;  %v453_v13 = vrot.slane %v445_v10, 7 }
 0x202   :  { %v452_v14 = vsel %vm449_vm3, %v450_v11, %v451_v12  ;;  %v454_v15 = vsel %vm449_vm3, %v451_v12, %v453_v13 }
 0x203   :  { %v457_v16 = vadd.f32 %v454_v15, %v452_v14 }
 0x205   :  { %v458_v17 = vrot.slane %v457_v16, 4 }
 0x207   :  { %v459_v18 = vadd.f32 %v458_v17, %v457_v16  ;;  %v547_v19 = vpop.xlane.xlu1 %546 }
 0x208   :  { %v556_v25 = vrot.slane %v547_v19, 7 }
 0x209   :  { %v460_v20 = vrot.slane %v459_v18, 2  ;;  %v549_v21 = vpop.xlane.xlu0 %548 }
 0x20a   :  { %v557_v22 = vrot.slane %v549_v21, 7 }
 0x20b   :  { %v461_v23 = vadd.f32 %v460_v20, %v459_v18  ;;  %v552_v24 = vpop.xlane.xlu1 %551 }
 0x20c   :  { %v559_v26 = vrot.slane %v552_v24, 7  ;;  %v558_v28 = vsel %vm449_vm3, %v556_v25, %v557_v22 }
 0x20d   :  { %v462_v27 = vrot.slane %v461_v23, 1 }
 0x20e   :  { %v560_v29 = vsel %vm449_vm3, %v557_v22, %v559_v26 }
 0x20f   :  { %v563_v30 = vadd.f32 %v560_v29, %v558_v28  ;;  %v463_v31 = vadd.f32 %v462_v27, %v461_v23 }
 0x211   :  { %v564_v32 = vrot.slane %v563_v30, 4  ;;  %v464_v33 = vmul.f32 0.00048828125, %v463_v31 }
 0x213   :  { %v565_v34 = vadd.f32 %v564_v32, %v563_v30  ;;  %v5634_v35 = vsub.f32 %v435_v50, %v464_v33  ;;  %v5637_v37 = vsub.f32 %v5621_v36, %v464_v33  ;;  %v5639_v38 = vsub.f32 %v436_v49, %v464_v33 }
 0x215   :  { %v566_v39 = vrot.slane %v565_v34, 2  ;;  %v469_v40 = vmul.f32 %v5634_v35, %v5634_v35  ;;  %v468_v41 = vmul.f32 %v5637_v37, %v5637_v37  ;;  %v470_v44 = vmul.f32 %v5639_v38, %v5639_v38 }
 0x217   :  { %v567_v42 = vadd.f32 %v566_v39, %v565_v34  ;;  %474 = vadd.xlane.f32.xlu1 %v469_v40  ;;  %v471_v43 = vsel %vm437_vm1, %v468_v41, 0.0  ;;  %v476_v36 = vsel %vm404_vm2, %v470_v44, 0.0 }
 0x218   :  { %472 = vadd.xlane.f32.xlu0 %v471_v43 }
 0x219   :  { %v568_v45 = vrot.slane %v567_v42, 1 }
 0x21b   :  { %v569_v46 = vadd.f32 %v568_v45, %v567_v42 }
 0x21c   :  { %477 = vadd.xlane.f32.xlu0 %v476_v36 }
 0x21d   :  { %v570_v47 = vmul.f32 0.00048828125, %v569_v46  ;;  %v4111_v46 = vld [vmem:[%s6406_s2] ss:$0 sm:$0xff]  ;;  %s6409_s2 = sld [smem:[#allocation22_spill]] }
 0x21f   :  { %v5649_v48 = vsub.f32 %v543_v6, %v570_v47  ;;  %v5651_v49 = vsub.f32 %v542_v2, %v570_v47  ;;  %v5653_v50 = vsub.f32 %v544_v5, %v570_v47  ;;  %v5083_v2 = vld [vmem:[#allocation6 + $0x60] sm:$0xff]   ;;  %v5086_v5 = vld [vmem:[#allocation6 + $0x30] sm:$0xff]  }
 0x220   :  { %4582 = vmatpush3.bf16.msra.mxu1 %v5083_v2  ;;  %v5087_v6 = vld [vmem:[#allocation6 + $0x70] sm:$0xff]   ;;  %4558 = vmatpush3.bf16.msra.mxu0 %v5086_v5 }
 0x221   :  { %v575_v51 = vmul.f32 %v5649_v48, %v5649_v48  ;;  %v574_v52 = vmul.f32 %v5651_v49, %v5651_v49  ;;  %v576_v54 = vmul.f32 %v5653_v50, %v5653_v50  ;;  %4583 = vmatprep.subr.bf16.mxu1 %v5664_v59  ;;  %4559 = vmatprep.subr.bf16.mxu0 %v5664_v59 }
 0x223   :  { %580 = vadd.xlane.f32.xlu0 %v575_v51  ;;  %v577_v53 = vsel %vm437_vm1, %v574_v52, 0.0  ;;  %v582_v55 = vsel %vm404_vm2, %v576_v54, 0.0  ;;  %v4112_v54 = vld [vmem:[%s6407_s3] ss:$0 sm:$0xff] }
 0x224   :  { %578 = vadd.xlane.f32.xlu1 %v577_v53  ;;  %4584 = vmatpush3.bf16.msra.mxu1 %v5085_v4 }
 0x225   :  { %4585 = vmatprep.subr.bf16.mxu1 %v5664_v59  ;;  %4560 = vmatpush3.bf16.msra.mxu0 %v5088_v7 }
 0x226   :  { %4601 = vmatprep.subr.bf16.mxu0 %v5664_v59 }
 0x228   :  { %583 = vadd.xlane.f32.xlu1 %v582_v55  ;;  %4586 = vmatpush3.bf16.msra.mxu1 %v5087_v6  ;;  %v5239_v55 = vld [vmem:[#allocation2 + $0x8] sm:$0xff] }
 0x229   :  { %4587 = vmatprep.subr.bf16.mxu1 %v5664_v59  ;;  %v527_v56 = vrot.slane %v5239_v55, 1 }
 0x22c   :  { %4588 = vmatpush3.bf16.msra.mxu1 %v5089_v8 }
 0x22d   :  { %4629 = vmatprep.subr.bf16.mxu1 %v5664_v59 }
 0x2a4   :  { %v475_v9 = vpop.xlane.xlu1 %474 }
 0x2a5   :  { %v473_v10 = vpop.xlane.xlu0 %472  ;;  %v483_v11 = vrot.slane %v475_v9, 7 }
 0x2a6   :  { %v482_v12 = vrot.slane %v473_v10, 7 }
 0x2a8   :  { %v484_v15 = vsel %vm449_vm3, %v482_v12, %v483_v11 }
 0x2a9   :  { %v478_v13 = vpop.xlane.xlu0 %477 }
 0x2aa   :  { %v485_v14 = vrot.slane %v478_v13, 7  ;;  %v5241_v13 = vld [vmem:[#allocation2 + $0x20] sm:$0xff] }
 0x2ac   :  { %v486_v16 = vsel %vm449_vm3, %v483_v11, %v485_v14  ;;  %v621_v14 = vrot.slane %v5241_v13, 1 }
 0x2ad   :  { %v489_v17 = vadd.f32 %v486_v16, %v484_v15  ;;  %v5242_v15 = vld [vmem:[#allocation2 + $0x28] sm:$0xff] }
 0x2ae   :  { %v622_v16 = vrot.slane %v5242_v15, 1 }
 0x2af   :  { %v490_v18 = vrot.slane %v489_v17, 4 }
 0x2b0   :  { %v581_v20 = vpop.xlane.xlu0 %580 }
 0x2b1   :  { %v491_v19 = vadd.f32 %v490_v18, %v489_v17  ;;  %v579_v21 = vpop.xlane.xlu1 %578  ;;  %v589_v23 = vrot.slane %v581_v20, 7 }
 0x2b2   :  { %v588_v24 = vrot.slane %v579_v21, 7 }
 0x2b3   :  { %v492_v22 = vrot.slane %v491_v19, 2 }
 0x2b4   :  { %v590_v29 = vsel %vm449_vm3, %v588_v24, %v589_v23 }
 0x2b5   :  { %v493_v25 = vadd.f32 %v492_v22, %v491_v19  ;;  %v584_v26 = vpop.xlane.xlu1 %583 }
 0x2b6   :  { %v591_v27 = vrot.slane %v584_v26, 7 }
 0x2b7   :  { %v494_v28 = vrot.slane %v493_v25, 1 }
 0x2b8   :  { %v592_v30 = vsel %vm449_vm3, %v589_v23, %v591_v27  ;;  %v623_v23 = vsel %vm404_vm2, %v621_v14, %v622_v16 }
 0x2b9   :  { %v495_v31 = vadd.f32 %v494_v28, %v493_v25  ;;  %v595_v32 = vadd.f32 %v592_v30, %v590_v29 }
 0x2bb   :  { %v496_v33 = vmul.f32 0.00048828125, %v495_v31  ;;  %v596_v34 = vrot.slane %v595_v32, 4 }
 0x2bd   :  { %v497_v39 = vadd.f32 1e-05, %v496_v33  ;;  %v597_v40 = vadd.f32 %v596_v34, %v595_v32  ;;  %v5091_v33 = vld [vmem:[#allocation6 + $0x88] sm:$0xff]  }
 0x2bf   :  { %5218 = vrsqrt.f32 %v497_v39  ;;  %v598_v41 = vrot.slane %v597_v40, 2  ;;  %v5092_v39 = vld [vmem:[#allocation6 + $0x90] sm:$0xff]  }
 0x2c1   :  { %v599_v42 = vadd.f32 %v598_v41, %v597_v40  ;;  %v5093_v41 = vld [vmem:[#allocation6 + $0x98] sm:$0xff]  }
 0x2c3   :  { %v600_v43 = vrot.slane %v599_v42, 1 }
 0x2c5   :  { %v601_v44 = vadd.f32 %v600_v43, %v599_v42 }
 0x2c7   :  { %v602_v45 = vmul.f32 0.00048828125, %v601_v44  ;;  %v5094_v44 = vld [vmem:[#allocation6 + $0xa0] sm:$0xff]  }
 0x2c9   :  { %v5219_v36 = vpop.eup %5218  ;;  %v603_v47 = vadd.f32 1e-05, %v602_v45 }
 0x2ca   :  { %v499_v51 = vmul.f32 %v5219_v36, %v5637_v37  ;;  %v500_v52 = vmul.f32 %v5219_v36, %v5634_v35  ;;  %v501_v53 = vmul.f32 %v5219_v36, %v5639_v38  ;;  %v529_v37 = vsel %vm404_vm2, %v527_v56, %v528_v58  ;;  %v5095_v36 = vld [vmem:[#allocation6 + $0xa8] sm:$0xff]  }
 0x2cb   :  { %5220 = vrsqrt.f32 %v603_v47  ;;  %v5097_v47 = vld [vmem:[#allocation6 + $0xb8] sm:$0xff]  }
 0x2cc   :  { %v508_v60 = vmul.f32 %v4111_v46, %v499_v51  ;;  %v509_v61 = vmul.f32 %v4111_v46, %v500_v52  ;;  %v510_v62 = vmul.f32 %v4111_v46, %v501_v53 }
 0x2ce   :  { %v517_v63 = vadd.f32 %v4112_v54, %v508_v60  ;;  %v518_v0 = vadd.f32 %v4112_v54, %v509_v61  ;;  %v519_v1 = vadd.f32 %v4112_v54, %v510_v62 }
 0x2d0   :  { %v520_v35 = vmax.f32 %v517_v63, 0.0  ;;  %v521_v2 = vmax.f32 %v518_v0, 0.0  ;;  %v522_v38 = vmax.f32 %v519_v1, 0.0 }
 0x2d2   :  { %v533_v3 = vadd.f32 %v527_v56, %v520_v35  ;;  %v534_v4 = vadd.f32 %v529_v37, %v521_v2  ;;  %v535_v5 = vadd.f32 %v528_v58, %v522_v38 }
 0x2d4   :  { %v536_v6 = vmul.f32 0.70710677, %v533_v3  ;;  %v537_v7 = vmul.f32 0.70710677, %v534_v4  ;;  %v538_v8 = vmul.f32 0.70710677, %v535_v5 }
 0x2d5   :  { %v5221_v9 = vpop.eup %5220 }
 0x2d6   :  { %539 = vst [vmem:[#allocation2 + $0x1] sm:$0x80] %v536_v6  ;;  %540 = vst [vmem:[#allocation2 + $0x9] sm:$0xff] %v537_v7  ;;  %v605_v10 = vmul.f32 %v5221_v9, %v5651_v49  ;;  %v606_v11 = vmul.f32 %v5221_v9, %v5649_v48  ;;  %v607_v12 = vmul.f32 %v5221_v9, %v5653_v50  ;;  %v5090_v48 = vld [vmem:[#allocation6 + $0x80] sm:$0xff]  }
 0x2d7   :  { %541 = vst [vmem:[#allocation2 + $0x11] sm:$0x7f] %v538_v8 }
 0x2d8   :  { %v608_v17 = vmul.f32 %v4111_v46, %v605_v10  ;;  %v609_v18 = vmul.f32 %v4111_v46, %v606_v11  ;;  %v610_v19 = vmul.f32 %v4111_v46, %v607_v12  ;;  %v5096_v46 = vld [vmem:[#allocation6 + $0xb0] sm:$0xff]  }
 0x2da   :  { %v611_v20 = vadd.f32 %v4112_v54, %v608_v17  ;;  %v612_v21 = vadd.f32 %v4112_v54, %v609_v18  ;;  %v613_v22 = vadd.f32 %v4112_v54, %v610_v19 }
 0x2dc   :  { %v614_v24 = vmax.f32 %v611_v20, 0.0  ;;  %v615_v25 = vmax.f32 %v612_v21, 0.0  ;;  %v616_v26 = vmax.f32 %v613_v22, 0.0 }
 0x2dd   :  { %v5699_v49 = vld [vmem:[#allocation2 + $0x8] sm:$0xff] }
 0x2de   :  { %v627_v27 = vadd.f32 %v621_v14, %v614_v24  ;;  %v628_v50 = vadd.f32 %v623_v23, %v615_v25  ;;  %v629_v28 = vadd.f32 %v622_v16, %v616_v26  ;;  %v642_v29 = vpack.c.bf16 %v5699_v49, %v5664_v59  ;;  %v5708_v34 = vld [vmem:[#allocation2 + $0x10] sm:$0xff] }
 0x2df   :  { %v643_v40 = vpack.c.bf16 %v5664_v59, %v5708_v34 }
 0x2e0   :  { %v630_v30 = vmul.f32 0.70710677, %v627_v27  ;;  %v631_v31 = vmul.f32 0.70710677, %v628_v50  ;;  %v632_v32 = vmul.f32 0.70710677, %v629_v28  ;;  %4562 = vmatmul.mubr.bf16.vlgmr.msra.gmra.mrb[12].mxu0 %v642_v29  ;;  %4590 = vmatmul.mubr.bf16.vlgmr.msra.gmra.mrb[12].mxu1 %v642_v29 }
 0x2e1   :  { %4602 = vmatpush3.bf16.msra.mxu0 %v5090_v48  ;;  %4565 = vmatprep.mubr.msk.bf16.mxu0 %vm5369_vm0, %v5664_v59  ;;  %v4137_v28 = vld [vmem:[%s6374_s6] ss:$0 sm:$0xff] }
 0x2e2   :  { %633 = vst [vmem:[#allocation2 + $0x19] sm:$0x80] %v630_v30  ;;  %634 = vst [vmem:[#allocation2 + $0x21] sm:$0xff] %v631_v31  ;;  %4603 = vmatprep.subr.bf16.mxu0 %v5664_v59  ;;  %4593 = vmatprep.mubr.msk.bf16.mxu1 %vm5369_vm0, %v5664_v59 }
 0x2e3   :  { %635 = vst [vmem:[#allocation2 + $0x29] sm:$0x7f] %v632_v32 }
 0x2e5   :  { %4604 = vmatpush3.bf16.msra.mxu0 %v5091_v33 }
 0x2e6   :  { %4605 = vmatprep.subr.bf16.mxu0 %v5664_v59 }
 0x2e8   :  { %4566 = vmatmul.mubr.bf16.gmra.mrb[16].mxu0 %v643_v40  ;;  %4594 = vmatmul.mubr.bf16.gmra.mrb[16].mxu1 %v643_v40 }
 0x2e9   :  { %4606 = vmatpush3.bf16.msra.mxu0 %v5092_v39  ;;  %4569 = vmatprep.mubr.msk.bf16.mxu0 %vm5369_vm0, %v5664_v59  ;;  %v5718_v42 = vld [vmem:[#allocation2 + $0x20] sm:$0xff] }
 0x2ea   :  { %4607 = vmatprep.subr.bf16.mxu0 %v5664_v59  ;;  %4597 = vmatprep.mubr.msk.bf16.mxu1 %vm5369_vm0, %v5664_v59  ;;  %v5720_v43 = vld [vmem:[#allocation2 + $0x28] sm:$0xff] }
 0x2eb   :  { %v644_v45 = vpack.c.bf16 %v5720_v43, %v5718_v42 }
 0x2ed   :  { %4608 = vmatpush3.bf16.msra.mxu0 %v5093_v41 }
 0x2ee   :  { %4609 = vmatprep.subr.bf16.mxu0 %v5664_v59 }
 0x2f0   :  { %4570 = vmatmul.mubr.bf16.gmra.mrb[20].mxu0 %v644_v45  ;;  %4598 = vmatmul.mubr.bf16.gmra.mrb[20].mxu1 %v644_v45 }
 0x2f1   :  { %4610 = vmatpush3.bf16.msra.mxu0 %v5094_v44  ;;  %4617 = vmatprep.mubr.msk.bf16.mxu0 %vm5369_vm0, %v5664_v59 }
 0x2f2   :  { %4611 = vmatprep.subr.bf16.mxu0 %v5664_v59  ;;  %4645 = vmatprep.mubr.msk.bf16.mxu1 %vm5369_vm0, %v5664_v59 }
 0x2f5   :  { %4612 = vmatpush3.bf16.msra.mxu0 %v5095_v36 }
 0x2f6   :  { %4613 = vmatprep.subr.bf16.mxu0 %v5664_v59 }
 0x2f9   :  { %4614 = vmatpush3.bf16.msra.mxu0 %v5096_v46 }
 0x2fa   :  { %4615 = vmatprep.subr.bf16.mxu0 %v5664_v59 }
 0x2fd   :  { %4616 = vmatpush3.bf16.msra.mxu0 %v5097_v47 }
 0x2fe   :  { %4657 = vmatprep.subr.bf16.mxu0 %v5664_v59 }
 0x300   :  { %4618 = vmatmul.mubr.bf16.vlgmr.msra.gmra.mrb[24].mxu0 %v642_v29 }
 0x301   :  { %4621 = vmatprep.mubr.msk.bf16.mxu0 %vm5369_vm0, %v5664_v59 }
 0x308   :  { %4622 = vmatmul.mubr.bf16.gmra.mrb[28].mxu0 %v643_v40 }
 0x309   :  { %4625 = vmatprep.mubr.msk.bf16.mxu0 %vm5369_vm0, %v5664_v59 }
 0x310   :  { %4626 = vmatmul.mubr.bf16.gmra.mrb[32].mxu0 %v644_v45 }
 0x311   :  { %4673 = vmatprep.mubr.msk.bf16.mxu0 %vm5369_vm0, %v5664_v59 }
 0x3b3   :  { %v749_v51 = vpop.f32.mrb[12].mxu0  ;;  %v870_v52 = vpop.f32.mrb[12].mxu1 }
 0x3b4   :  { %v4563_v53 = vpop.f32.mrb[13].mxu0  ;;  %v4591_v54 = vpop.f32.mrb[13].mxu1  ;;  %v896_v57 = vrot.slane %v870_v52, 1 }
 0x3b5   :  { %v752_v55 = vpop.f32.mrb[14].mxu0  ;;  %v873_v56 = vpop.f32.mrb[14].mxu1 }
 0x3b6   :  { %v897_v58 = vrot.slane %v873_v56, 1  ;;  %v4564_v60 = vpop.f32.mrb[15].mxu0  ;;  %v4592_v61 = vpop.f32.mrb[15].mxu1 }
 0x3b8   :  { %v898_v62 = vsel %vm404_vm2, %v896_v57, %v897_v58 }
 0x3b9   :  { %v904_v63 = vadd.f32 %v898_v62, %v749_v51 }
 0x3bb   :  { %v757_v0 = vpop.f32.mrb[16].mxu0  ;;  %v878_v1 = vpop.f32.mrb[16].mxu1 }
 0x3bc   :  { %v899_v37 = vrot.slane %v878_v1, 1  ;;  %v4567_v35 = vpop.f32.mrb[17].mxu0  ;;  %v4595_v2 = vpop.f32.mrb[17].mxu1 }
 0x3bd   :  { %v760_v38 = vpop.f32.mrb[18].mxu0  ;;  %v881_v3 = vpop.f32.mrb[18].mxu1 }
 0x3be   :  { %v900_v4 = vsel %vm404_vm2, %v897_v58, %v899_v37  ;;  %v906_v5 = vadd.f32 %v899_v37, %v757_v0  ;;  %v4568_v6 = vpop.f32.mrb[19].mxu0  ;;  %v4596_v7 = vpop.f32.mrb[19].mxu1  ;;  %v910_v11 = vrot.slane %v881_v3, 1 }
 0x3bf   :  { %v905_v8 = vadd.f32 %v900_v4, %v752_v55 }
 0x3c3   :  { %v765_v9 = vpop.f32.mrb[20].mxu0  ;;  %v886_v10 = vpop.f32.mrb[20].mxu1 }
 0x3c4   :  { %v911_v12 = vrot.slane %v886_v10, 1  ;;  %v4571_v13 = vpop.f32.mrb[21].mxu0  ;;  %v4599_v14 = vpop.f32.mrb[21].mxu1 }
 0x3c5   :  { %v768_v15 = vpop.f32.mrb[22].mxu0  ;;  %v889_v16 = vpop.f32.mrb[22].mxu1 }
 0x3c6   :  { %v912_v17 = vsel %vm404_vm2, %v910_v11, %v911_v12  ;;  %v913_v18 = vrot.slane %v889_v16, 1  ;;  %v4572_v19 = vpop.f32.mrb[23].mxu0  ;;  %v4600_v20 = vpop.f32.mrb[23].mxu1 }
 0x3c7   :  { %v918_v21 = vadd.f32 %v912_v17, %v760_v38 }
 0x3c8   :  { %v914_v22 = vsel %vm404_vm2, %v911_v12, %v913_v18  ;;  %v920_v23 = vadd.f32 %v913_v18, %v768_v15 }
 0x3c9   :  { %v919_v24 = vadd.f32 %v914_v22, %v765_v9 }
 0x3d3   :  { %v1019_v25 = vpop.f32.mrb[24].mxu0 }
 0x3d4   :  { %v4619_v26 = vpop.f32.mrb[25].mxu0 }
 0x3d5   :  { %v1021_v48 = vpop.f32.mrb[26].mxu0 }
 0x3d6   :  { %v1043_v27 = vrot.slane %v1021_v48, 2  ;;  %v4620_v50 = vpop.f32.mrb[27].mxu0 }
 0x3d8   :  { %v1049_v29 = vadd.f32 %v1043_v27, %v904_v63 }
 0x3da   :  { %v5746_v30 = vadd.f32 %v4137_v28, %v1049_v29 }
 0x3db   :  { %v1026_v31 = vpop.f32.mrb[28].mxu0 }
 0x3dc   :  { %v1044_v32 = vrot.slane %v1026_v31, 2  ;;  %v4623_v33 = vpop.f32.mrb[29].mxu0  ;;  %v1076_v39 = vsel %vm1075_vm4, %v5746_v30, 0.0 }
 0x3dd   :  { %1077 = vadd.xlane.f32.xlu0 %v1076_v39  ;;  %v1029_v40 = vpop.f32.mrb[30].mxu0 }
 0x3de   :  { %v1051_v41 = vadd.f32 %v1044_v32, %v906_v5  ;;  %v4624_v44 = vpop.f32.mrb[31].mxu0  ;;  %v1045_v45 = vsel %vm1042_vm5, %v1043_v27, %v1044_v32 }
 0x3df   :  { %v1050_v36 = vadd.f32 %v1045_v45, %v905_v8 }
 0x3e0   :  { %v1074_v46 = vadd.f32 %v4137_v28, %v1051_v41 }
 0x3e1   :  { %v1073_v47 = vadd.f32 %v4137_v28, %v1050_v36 }
 0x3e2   :  { %v1081_v51 = vsel %vm1042_vm5, %v1074_v46, 0.0 }
 0x3e3   :  { %1082 = vadd.xlane.f32.xlu0 %v1081_v51  ;;  %1079 = vadd.xlane.f32.xlu1 %v1073_v47  ;;  %v1033_v52 = vpop.f32.mrb[32].mxu0 }
 0x3e4   :  { %v1054_v53 = vrot.slane %v1033_v52, 2  ;;  %v4627_v54 = vpop.f32.mrb[33].mxu0 }
 0x3e5   :  { %v1036_v55 = vpop.f32.mrb[34].mxu0 }
 0x3e6   :  { %v1060_v56 = vadd.f32 %v1054_v53, %v918_v21  ;;  %v1055_v57 = vrot.slane %v1036_v55, 2  ;;  %v4628_v58 = vpop.f32.mrb[35].mxu0 }
 0x3e7   :  { %v5100_v58 = vld [vmem:[#allocation8 + $0x8] sm:$0xff]  }
 0x3e8   :  { %v1062_v60 = vadd.f32 %v1055_v57, %v920_v23  ;;  %v1180_v61 = vadd.f32 %v4137_v28, %v1060_v56  ;;  %v1056_v62 = vsel %vm1042_vm5, %v1054_v53, %v1055_v57  ;;  %v5098_v56 = vld [vmem:[#allocation8] sm:$0xff]  }
 0x3e9   :  { %v1061_v63 = vadd.f32 %v1056_v62, %v919_v24  ;;  %v5099_v57 = vld [vmem:[#allocation8 + $0x40] sm:$0xff]   ;;  %4630 = vmatpush3.bf16.msra.mxu1 %v5098_v56  ;;  %v5103_v62 = vld [vmem:[#allocation8 + $0x50] sm:$0xff]  }
 0x3ea   :  { %v1183_v0 = vsel %vm1075_vm4, %v1180_v61, 0.0  ;;  %v1182_v1 = vadd.f32 %v4137_v28, %v1062_v60  ;;  %4658 = vmatpush3.bf16.msra.mxu0 %v5099_v57  ;;  %4631 = vmatprep.subr.bf16.mxu1 %v5664_v59  ;;  %v5101_v60 = vld [vmem:[#allocation8 + $0x48] sm:$0xff]  }
 0x3eb   :  { %1184 = vadd.xlane.f32.xlu1 %v1183_v0  ;;  %v1181_v37 = vadd.f32 %v4137_v28, %v1061_v63  ;;  %4659 = vmatprep.subr.bf16.mxu0 %v5664_v59  ;;  %v5104_v63 = vld [vmem:[#allocation8 + $0x18] sm:$0xff]  }
 0x3ec   :  { %v1188_v35 = vsel %vm1042_vm5, %v1182_v1, 0.0  ;;  %v5105_v0 = vld [vmem:[#allocation8 + $0x58] sm:$0xff]  }
 0x3ed   :  { %1186 = vadd.xlane.f32.xlu0 %v1181_v37  ;;  %4632 = vmatpush3.bf16.msra.mxu1 %v5100_v58  ;;  %v4139_v58 = vld [vmem:[%s6376_s8] ss:$0 sm:$0xff] }
 0x3ee   :  { %4660 = vmatpush3.bf16.msra.mxu0 %v5101_v60  ;;  %4633 = vmatprep.subr.bf16.mxu1 %v5664_v59 }
 0x3ef   :  { %1189 = vadd.xlane.f32.xlu1 %v1188_v35  ;;  %4661 = vmatprep.subr.bf16.mxu0 %v5664_v59  ;;  %v5108_v35 = vld [vmem:[#allocation8 + $0x28] sm:$0xff]  }
 0x3f2   :  { %4662 = vmatpush3.bf16.msra.mxu0 %v5103_v62 }
 0x3f3   :  { %4663 = vmatprep.subr.bf16.mxu0 %v5664_v59 }
 0x3f6   :  { %4664 = vmatpush3.bf16.msra.mxu0 %v5105_v0  ;;  %v1166_v0 = vrot.slane %v5708_v34, 2 }
 0x3f7   :  { %4665 = vmatprep.subr.bf16.mxu0 %v5664_v59 }
 0x46a   :  { %v1078_v2 = vpop.xlane.xlu0 %1077 }
 0x46b   :  { %v1088_v4 = vrot.slane %v1078_v2, 6  ;;  %v5109_v2 = vld [vmem:[#allocation8 + $0x68] sm:$0xff]  }
 0x470   :  { %v1083_v38 = vpop.xlane.xlu0 %1082  ;;  %v1080_v3 = vpop.xlane.xlu1 %1079 }
 0x471   :  { %v1091_v5 = vrot.slane %v1083_v38, 6  ;;  %v1089_v6 = vrot.slane %v1080_v3, 6  ;;  %v5110_v38 = vld [vmem:[#allocation8 + $0x30] sm:$0xff]  }
 0x472   :  { %v5111_v3 = vld [vmem:[#allocation8 + $0x70] sm:$0xff]  }
 0x473   :  { %v1090_v7 = vsel %vm1087_vm6, %v1088_v4, %v1089_v6  ;;  %v1092_v8 = vsel %vm1087_vm6, %v1089_v6, %v1091_v5  ;;  %v5112_v4 = vld [vmem:[#allocation8 + $0x38] sm:$0xff]  }
 0x474   :  { %v1095_v9 = vadd.f32 %v1092_v8, %v1090_v7  ;;  %v5113_v5 = vld [vmem:[#allocation8 + $0x78] sm:$0xff]  }
 0x476   :  { %v1096_v10 = vrot.slane %v1095_v9, 4 }
 0x478   :  { %v1097_v11 = vadd.f32 %v1096_v10, %v1095_v9  ;;  %v1185_v12 = vpop.xlane.xlu1 %1184 }
 0x479   :  { %v1194_v18 = vrot.slane %v1185_v12, 6 }
 0x47a   :  { %v1098_v13 = vrot.slane %v1097_v11, 2  ;;  %v1187_v14 = vpop.xlane.xlu0 %1186 }
 0x47b   :  { %v1195_v15 = vrot.slane %v1187_v14, 6 }
 0x47c   :  { %v1099_v16 = vadd.f32 %v1098_v13, %v1097_v11  ;;  %v1190_v17 = vpop.xlane.xlu1 %1189 }
 0x47d   :  { %v1197_v19 = vrot.slane %v1190_v17, 6  ;;  %v1196_v21 = vsel %vm1087_vm6, %v1194_v18, %v1195_v15 }
 0x47e   :  { %v1100_v20 = vrot.slane %v1099_v16, 1 }
 0x47f   :  { %v1198_v22 = vsel %vm1087_vm6, %v1195_v15, %v1197_v19 }
 0x480   :  { %v1201_v23 = vadd.f32 %v1198_v22, %v1196_v21  ;;  %v1101_v24 = vadd.f32 %v1100_v20, %v1099_v16 }
 0x482   :  { %v1202_v25 = vrot.slane %v1201_v23, 4  ;;  %v1102_v26 = vmul.f32 0.00048828125, %v1101_v24 }
 0x484   :  { %v1203_v48 = vadd.f32 %v1202_v25, %v1201_v23  ;;  %v5759_v27 = vsub.f32 %v1073_v47, %v1102_v26  ;;  %v5762_v50 = vsub.f32 %v5746_v30, %v1102_v26  ;;  %v5764_v28 = vsub.f32 %v1074_v46, %v1102_v26 }
 0x486   :  { %v1204_v29 = vrot.slane %v1203_v48, 2  ;;  %v1107_v31 = vmul.f32 %v5759_v27, %v5759_v27  ;;  %v1106_v32 = vmul.f32 %v5762_v50, %v5762_v50  ;;  %v1108_v40 = vmul.f32 %v5764_v28, %v5764_v28 }
 0x488   :  { %v1205_v33 = vadd.f32 %v1204_v29, %v1203_v48  ;;  %1112 = vadd.xlane.f32.xlu1 %v1107_v31  ;;  %v1109_v39 = vsel %vm1075_vm4, %v1106_v32, 0.0  ;;  %v1114_v30 = vsel %vm1042_vm5, %v1108_v40, 0.0 }
 0x489   :  { %1110 = vadd.xlane.f32.xlu0 %v1109_v39 }
 0x48a   :  { %v1206_v41 = vrot.slane %v1205_v33, 1 }
 0x48c   :  { %v1207_v44 = vadd.f32 %v1206_v41, %v1205_v33 }
 0x48d   :  { %1115 = vadd.xlane.f32.xlu0 %v1114_v30 }
 0x48e   :  { %v1208_v45 = vmul.f32 0.00048828125, %v1207_v44 }
 0x490   :  { %v5774_v36 = vsub.f32 %v1181_v37, %v1208_v45  ;;  %v5776_v46 = vsub.f32 %v1180_v61, %v1208_v45  ;;  %v5778_v47 = vsub.f32 %v1182_v1, %v1208_v45  ;;  %v5102_v61 = vld [vmem:[#allocation8 + $0x10] sm:$0xff]   ;;  %v5106_v1 = vld [vmem:[#allocation8 + $0x20] sm:$0xff]  }
 0x491   :  { %4634 = vmatpush3.bf16.msra.mxu1 %v5102_v61  ;;  %v5107_v37 = vld [vmem:[#allocation8 + $0x60] sm:$0xff]  }
 0x492   :  { %v1213_v51 = vmul.f32 %v5774_v36, %v5774_v36  ;;  %v1212_v52 = vmul.f32 %v5776_v46, %v5776_v46  ;;  %v1214_v54 = vmul.f32 %v5778_v47, %v5778_v47  ;;  %4635 = vmatprep.subr.bf16.mxu1 %v5664_v59  ;;  %4666 = vmatpush3.bf16.msra.mxu0 %v5107_v37 }
 0x493   :  { %4667 = vmatprep.subr.bf16.mxu0 %v5664_v59 }
 0x494   :  { %1218 = vadd.xlane.f32.xlu0 %v1213_v51  ;;  %v1215_v53 = vsel %vm1075_vm4, %v1212_v52, 0.0  ;;  %v1220_v55 = vsel %vm1042_vm5, %v1214_v54, 0.0 }
 0x495   :  { %1216 = vadd.xlane.f32.xlu1 %v1215_v53  ;;  %4636 = vmatpush3.bf16.msra.mxu1 %v5104_v63  ;;  %v4138_v53 = vld [vmem:[%s6375_s7] ss:$0 sm:$0xff]  ;;  %v1165_v63 = vrot.slane %v5699_v49, 2 }
 0x496   :  { %4637 = vmatprep.subr.bf16.mxu1 %v5664_v59  ;;  %4668 = vmatpush3.bf16.msra.mxu0 %v5109_v2 }
 0x497   :  { %4669 = vmatprep.subr.bf16.mxu0 %v5664_v59 }
 0x499   :  { %1221 = vadd.xlane.f32.xlu1 %v1220_v55  ;;  %4638 = vmatpush3.bf16.msra.mxu1 %v5106_v1 }
 0x49a   :  { %4639 = vmatprep.subr.bf16.mxu1 %v5664_v59  ;;  %4670 = vmatpush3.bf16.msra.mxu0 %v5111_v3 }
 0x49b   :  { %4671 = vmatprep.subr.bf16.mxu0 %v5664_v59 }
 0x49d   :  { %4640 = vmatpush3.bf16.msra.mxu1 %v5108_v35 }
 0x49e   :  { %4641 = vmatprep.subr.bf16.mxu1 %v5664_v59  ;;  %4672 = vmatpush3.bf16.msra.mxu0 %v5113_v5 }
 0x49f   :  { %4713 = vmatprep.subr.bf16.mxu0 %v5664_v59 }
 0x4a1   :  { %4642 = vmatpush3.bf16.msra.mxu1 %v5110_v38 }
 0x4a2   :  { %4643 = vmatprep.subr.bf16.mxu1 %v5664_v59 }
 0x4a5   :  { %4644 = vmatpush3.bf16.msra.mxu1 %v5112_v4 }
 0x4a6   :  { %4685 = vmatprep.subr.bf16.mxu1 %v5664_v59 }
 0x515   :  { %v1113_v6 = vpop.xlane.xlu1 %1112 }
 0x516   :  { %v1111_v7 = vpop.xlane.xlu0 %1110  ;;  %v1121_v8 = vrot.slane %v1113_v6, 6 }
 0x517   :  { %v1120_v9 = vrot.slane %v1111_v7, 6 }
 0x519   :  { %v1122_v12 = vsel %vm1087_vm6, %v1120_v9, %v1121_v8 }
 0x51a   :  { %v1116_v10 = vpop.xlane.xlu0 %1115 }
 0x51b   :  { %v1123_v11 = vrot.slane %v1116_v10, 6 }
 0x51d   :  { %v1124_v13 = vsel %vm1087_vm6, %v1121_v8, %v1123_v11 }
 0x51e   :  { %v1127_v14 = vadd.f32 %v1124_v13, %v1122_v12  ;;  %v1259_v13 = vrot.slane %v5718_v42, 2 }
 0x520   :  { %v1128_v15 = vrot.slane %v1127_v14, 4 }
 0x521   :  { %v1219_v17 = vpop.xlane.xlu0 %1218 }
 0x522   :  { %v1129_v16 = vadd.f32 %v1128_v15, %v1127_v14  ;;  %v1217_v18 = vpop.xlane.xlu1 %1216  ;;  %v1227_v20 = vrot.slane %v1219_v17, 6  ;;  %v1260_v14 = vrot.slane %v5720_v43, 2 }
 0x523   :  { %v1226_v21 = vrot.slane %v1217_v18, 6 }
 0x524   :  { %v1130_v19 = vrot.slane %v1129_v16, 2 }
 0x525   :  { %v1228_v26 = vsel %vm1087_vm6, %v1226_v21, %v1227_v20  ;;  %v1261_v21 = vsel %vm1042_vm5, %v1259_v13, %v1260_v14 }
 0x526   :  { %v1131_v22 = vadd.f32 %v1130_v19, %v1129_v16  ;;  %v1222_v23 = vpop.xlane.xlu1 %1221 }
 0x527   :  { %v1229_v24 = vrot.slane %v1222_v23, 6 }
 0x528   :  { %v1132_v25 = vrot.slane %v1131_v22, 1 }
 0x529   :  { %v1230_v48 = vsel %vm1087_vm6, %v1227_v20, %v1229_v24 }
 0x52a   :  { %v1133_v29 = vadd.f32 %v1132_v25, %v1131_v22  ;;  %v1233_v31 = vadd.f32 %v1230_v48, %v1228_v26  ;;  %v5115_v22 = vld [vmem:[#allocation8 + $0xc0] sm:$0xff]   ;;  %v5116_v48 = vld [vmem:[#allocation8 + $0x88] sm:$0xff]  }
 0x52c   :  { %v1134_v32 = vmul.f32 0.00048828125, %v1133_v29  ;;  %v1234_v33 = vrot.slane %v1233_v31, 4  ;;  %v5117_v29 = vld [vmem:[#allocation8 + $0xc8] sm:$0xff]  }
 0x52e   :  { %v1135_v39 = vadd.f32 1e-05, %v1134_v32  ;;  %v1235_v40 = vadd.f32 %v1234_v33, %v1233_v31  ;;  %v5118_v32 = vld [vmem:[#allocation8 + $0x90] sm:$0xff]  }
 0x52f   :  { %v5119_v33 = vld [vmem:[#allocation8 + $0xd0] sm:$0xff]  }
 0x530   :  { %5222 = vrsqrt.f32 %v1135_v39  ;;  %v1236_v41 = vrot.slane %v1235_v40, 2 }
 0x532   :  { %v1237_v30 = vadd.f32 %v1236_v41, %v1235_v40  ;;  %v5120_v40 = vld [vmem:[#allocation8 + $0x98] sm:$0xff]  }
 0x533   :  { %v5121_v41 = vld [vmem:[#allocation8 + $0xd8] sm:$0xff]  }
 0x534   :  { %v1238_v44 = vrot.slane %v1237_v30, 1 }
 0x536   :  { %v1239_v45 = vadd.f32 %v1238_v44, %v1237_v30 }
 0x538   :  { %v1240_v51 = vmul.f32 0.00048828125, %v1239_v45  ;;  %v5122_v45 = vld [vmem:[#allocation8 + $0xa0] sm:$0xff]  }
 0x53a   :  { %v5223_v52 = vpop.eup %5222  ;;  %v1241_v54 = vadd.f32 1e-05, %v1240_v51  ;;  %v5123_v51 = vld [vmem:[#allocation8 + $0xe0] sm:$0xff]  }
 0x53b   :  { %v1137_v55 = vmul.f32 %v5223_v52, %v5762_v50  ;;  %v1138_v56 = vmul.f32 %v5223_v52, %v5759_v27  ;;  %v1139_v57 = vmul.f32 %v5223_v52, %v5764_v28  ;;  %v1167_v28 = vsel %vm1042_vm5, %v1165_v63, %v1166_v0 }
 0x53c   :  { %5224 = vrsqrt.f32 %v1241_v54  ;;  %v5125_v54 = vld [vmem:[#allocation8 + $0xe8] sm:$0xff]  }
 0x53d   :  { %v1146_v60 = vmul.f32 %v4138_v53, %v1137_v55  ;;  %v1147_v61 = vmul.f32 %v4138_v53, %v1138_v56  ;;  %v1148_v62 = vmul.f32 %v4138_v53, %v1139_v57  ;;  %v5126_v55 = vld [vmem:[#allocation8 + $0xb0] sm:$0xff]   ;;  %v5128_v57 = vld [vmem:[#allocation8 + $0xb8] sm:$0xff]  }
 0x53e   :  { %v5127_v56 = vld [vmem:[#allocation8 + $0xf0] sm:$0xff]  }
 0x53f   :  { %v1155_v1 = vadd.f32 %v4139_v58, %v1146_v60  ;;  %v1156_v37 = vadd.f32 %v4139_v58, %v1147_v61  ;;  %v1157_v35 = vadd.f32 %v4139_v58, %v1148_v62  ;;  %v5868_v60 = vld [vmem:[#allocation2] sm:$0xff] }
 0x541   :  { %v1158_v50 = vmax.f32 %v1155_v1, 0.0  ;;  %v1159_v2 = vmax.f32 %v1156_v37, 0.0  ;;  %v1160_v27 = vmax.f32 %v1157_v35, 0.0 }
 0x543   :  { %v1171_v38 = vadd.f32 %v1165_v63, %v1158_v50  ;;  %v1172_v3 = vadd.f32 %v1167_v28, %v1159_v2  ;;  %v1173_v4 = vadd.f32 %v1166_v0, %v1160_v27 }
 0x545   :  { %v1174_v5 = vmul.f32 0.70710677, %v1171_v38  ;;  %v1175_v6 = vmul.f32 0.70710677, %v1172_v3  ;;  %v1176_v7 = vmul.f32 0.70710677, %v1173_v4 }
 0x546   :  { %v5225_v8 = vpop.eup %5224 }
 0x547   :  { %1177 = vst [vmem:[#allocation2 + $0x2] sm:$0xc0] %v1174_v5  ;;  %1178 = vst [vmem:[#allocation2 + $0xa] sm:$0xff] %v1175_v6  ;;  %v1243_v49 = vmul.f32 %v5225_v8, %v5776_v46  ;;  %v1244_v34 = vmul.f32 %v5225_v8, %v5774_v36  ;;  %v1245_v9 = vmul.f32 %v5225_v8, %v5778_v47  ;;  %v5114_v36 = vld [vmem:[#allocation8 + $0x80] sm:$0xff]  }
 0x548   :  { %1179 = vst [vmem:[#allocation2 + $0x12] sm:$0x3f] %v1176_v7 }
 0x549   :  { %v1246_v10 = vmul.f32 %v4138_v53, %v1243_v49  ;;  %v1247_v11 = vmul.f32 %v4138_v53, %v1244_v34  ;;  %v1248_v12 = vmul.f32 %v4138_v53, %v1245_v9  ;;  %v5124_v53 = vld [vmem:[#allocation8 + $0xa8] sm:$0xff]  }
 0x54b   :  { %v1249_v15 = vadd.f32 %v4139_v58, %v1246_v10  ;;  %v1250_v16 = vadd.f32 %v4139_v58, %v1247_v11  ;;  %v1251_v17 = vadd.f32 %v4139_v58, %v1248_v12  ;;  %v5129_v58 = vld [vmem:[#allocation8 + $0xf8] sm:$0xff]  }
 0x54d   :  { %v1252_v18 = vmax.f32 %v1249_v15, 0.0  ;;  %v1253_v19 = vmax.f32 %v1250_v16, 0.0  ;;  %v1254_v20 = vmax.f32 %v1251_v17, 0.0 }
 0x54e   :  { %v5826_v46 = vld [vmem:[#allocation2 + $0x8] sm:$0xff] }
 0x54f   :  { %v1265_v47 = vadd.f32 %v1259_v13, %v1252_v18  ;;  %v1266_v23 = vadd.f32 %v1261_v21, %v1253_v19  ;;  %v1267_v24 = vadd.f32 %v1260_v14, %v1254_v20  ;;  %v5830_v42 = vpack.c.bf16 %v5826_v46, %v5664_v59  ;;  %v5840_v31 = vld [vmem:[#allocation2 + $0x10] sm:$0xff] }
 0x550   :  { %v1281_v39 = vpack.c.bf16 %v5664_v59, %v5840_v31 }
 0x551   :  { %v1268_v43 = vmul.f32 0.70710677, %v1265_v47  ;;  %v1269_v25 = vmul.f32 0.70710677, %v1266_v23  ;;  %v1270_v26 = vmul.f32 0.70710677, %v1267_v24  ;;  %4646 = vmatmul.mubr.bf16.vlgmr.msra.gmra.mrb[24].mxu1 %v5830_v42  ;;  %4674 = vmatmul.mubr.bf16.vlgmr.msra.gmra.mrb[36].mxu0 %v5830_v42 }
 0x552   :  { %4686 = vmatpush3.bf16.msra.mxu1 %v5114_v36  ;;  %4714 = vmatpush3.bf16.msra.mxu0 %v5115_v22 }
 0x553   :  { %1271 = vst [vmem:[#allocation2 + $0x1a] sm:$0xc0] %v1268_v43  ;;  %1272 = vst [vmem:[#allocation2 + $0x22] sm:$0xff] %v1269_v25  ;;  %4687 = vmatprep.subr.bf16.mxu1 %v5664_v59  ;;  %4715 = vmatprep.subr.bf16.mxu0 %v5664_v59 }
 0x554   :  { %1273 = vst [vmem:[#allocation2 + $0x2a] sm:$0x3f] %v1270_v26  ;;  %4649 = vmatprep.mubr.msk.bf16.mxu1 %vm5369_vm0, %v5664_v59  ;;  %4677 = vmatprep.mubr.msk.bf16.mxu0 %vm5369_vm0, %v5664_v59 }
 0x556   :  { %4688 = vmatpush3.bf16.msra.mxu1 %v5116_v48  ;;  %4716 = vmatpush3.bf16.msra.mxu0 %v5117_v29 }
 0x557   :  { %4689 = vmatprep.subr.bf16.mxu1 %v5664_v59  ;;  %4717 = vmatprep.subr.bf16.mxu0 %v5664_v59 }
 0x559   :  { %4650 = vmatmul.mubr.bf16.gmra.mrb[28].mxu1 %v1281_v39  ;;  %4678 = vmatmul.mubr.bf16.gmra.mrb[40].mxu0 %v1281_v39 }
 0x55a   :  { %4690 = vmatpush3.bf16.msra.mxu1 %v5118_v32  ;;  %4718 = vmatpush3.bf16.msra.mxu0 %v5119_v33  ;;  %v5852_v30 = vld [vmem:[#allocation2 + $0x20] sm:$0xff] }
 0x55b   :  { %4691 = vmatprep.subr.bf16.mxu1 %v5664_v59  ;;  %4719 = vmatprep.subr.bf16.mxu0 %v5664_v59  ;;  %v5854_v44 = vld [vmem:[#allocation2 + $0x28] sm:$0xff] }
 0x55c   :  { %4653 = vmatprep.mubr.msk.bf16.mxu1 %vm5369_vm0, %v5664_v59  ;;  %4681 = vmatprep.mubr.msk.bf16.mxu0 %vm5369_vm0, %v5664_v59  ;;  %v1282_v52 = vpack.c.bf16 %v5854_v44, %v5852_v30 }
 0x55e   :  { %4692 = vmatpush3.bf16.msra.mxu1 %v5120_v40  ;;  %4720 = vmatpush3.bf16.msra.mxu0 %v5121_v41 }
 0x55f   :  { %4693 = vmatprep.subr.bf16.mxu1 %v5664_v59  ;;  %4721 = vmatprep.subr.bf16.mxu0 %v5664_v59 }
 0x561   :  { %4654 = vmatmul.mubr.bf16.gmra.mrb[32].mxu1 %v1282_v52  ;;  %4682 = vmatmul.mubr.bf16.gmra.mrb[44].mxu0 %v1282_v52 }
 0x562   :  { %4694 = vmatpush3.bf16.msra.mxu1 %v5122_v45  ;;  %4722 = vmatpush3.bf16.msra.mxu0 %v5123_v51 }
 0x563   :  { %4695 = vmatprep.subr.bf16.mxu1 %v5664_v59  ;;  %4723 = vmatprep.subr.bf16.mxu0 %v5664_v59 }
 0x564   :  { %4701 = vmatprep.mubr.msk.bf16.mxu1 %vm5369_vm0, %v5664_v59  ;;  %4729 = vmatprep.mubr.msk.bf16.mxu0 %vm5369_vm0, %v5664_v59 }
 0x566   :  { %4696 = vmatpush3.bf16.msra.mxu1 %v5124_v53  ;;  %4724 = vmatpush3.bf16.msra.mxu0 %v5125_v54  ;;  %v4172_v53 = vld [vmem:[%s6378_s10] ss:$0 sm:$0xff] }
 0x567   :  { %4697 = vmatprep.subr.bf16.mxu1 %v5664_v59  ;;  %4725 = vmatprep.subr.bf16.mxu0 %v5664_v59 }
 0x56a   :  { %4698 = vmatpush3.bf16.msra.mxu1 %v5126_v55  ;;  %4726 = vmatpush3.bf16.msra.mxu0 %v5127_v56 }
 0x56b   :  { %4699 = vmatprep.subr.bf16.mxu1 %v5868_v60  ;;  %4727 = vmatprep.subr.bf16.mxu0 %v5868_v60 }
 0x56e   :  { %4700 = vmatpush3.bf16.msra.mxu1 %v5128_v57  ;;  %4728 = vmatpush3.bf16.msra.mxu0 %v5129_v58 }
 0x56f   :  { %4741 = vmatprep.subr.bf16.mxu1 %v5868_v60  ;;  %4769 = vmatprep.subr.bf16.mxu0 %v5868_v60 }
 0x571   :  { %4702 = vmatmul.mubr.bf16.vlgmr.msra.gmra.mrb[36].mxu1 %v5830_v42  ;;  %4730 = vmatmul.mubr.bf16.vlgmr.msra.gmra.mrb[48].mxu0 %v5830_v42 }
 0x572   :  { %4705 = vmatprep.mubr.msk.bf16.mxu1 %vm5369_vm0, %v5868_v60  ;;  %4733 = vmatprep.mubr.msk.bf16.mxu0 %vm5369_vm0, %v5868_v60 }
 0x579   :  { %4706 = vmatmul.mubr.bf16.gmra.mrb[40].mxu1 %v1281_v39  ;;  %4734 = vmatmul.mubr.bf16.gmra.mrb[52].mxu0 %v1281_v39 }
 0x57a   :  { %4709 = vmatprep.mubr.msk.bf16.mxu1 %vm5369_vm0, %v5868_v60  ;;  %4737 = vmatprep.mubr.msk.bf16.mxu0 %vm5369_vm0, %v5868_v60 }
 0x581   :  { %4710 = vmatmul.mubr.bf16.gmra.mrb[44].mxu1 %v1282_v52  ;;  %4738 = vmatmul.mubr.bf16.gmra.mrb[56].mxu0 %v1282_v52 }
 0x582   :  { %4757 = vmatprep.mubr.msk.bf16.mxu1 %vm5369_vm0, %v5868_v60  ;;  %4785 = vmatprep.mubr.msk.bf16.mxu0 %vm5369_vm0, %v5868_v60 }
 0x624   :  { %v1387_v59 = vpop.f32.mrb[24].mxu1  ;;  %v1508_v61 = vpop.f32.mrb[36].mxu0 }
 0x625   :  { %v4647_v62 = vpop.f32.mrb[25].mxu1  ;;  %v4675_v63 = vpop.f32.mrb[37].mxu0  ;;  %v1534_v37 = vrot.slane %v1508_v61, 1 }
 0x626   :  { %v1390_v0 = vpop.f32.mrb[26].mxu1  ;;  %v1511_v1 = vpop.f32.mrb[38].mxu0 }
 0x627   :  { %v1535_v35 = vrot.slane %v1511_v1, 1  ;;  %v4648_v50 = vpop.f32.mrb[27].mxu1  ;;  %v4676_v2 = vpop.f32.mrb[39].mxu0 }
 0x629   :  { %v1536_v27 = vsel %vm404_vm2, %v1534_v37, %v1535_v35 }
 0x62a   :  { %v1542_v28 = vadd.f32 %v1536_v27, %v1387_v59 }
 0x62c   :  { %v1395_v38 = vpop.f32.mrb[28].mxu1  ;;  %v1516_v3 = vpop.f32.mrb[40].mxu0 }
 0x62d   :  { %v1537_v4 = vrot.slane %v1516_v3, 1  ;;  %v4651_v5 = vpop.f32.mrb[29].mxu1  ;;  %v4679_v6 = vpop.f32.mrb[41].mxu0 }
 0x62e   :  { %v1398_v7 = vpop.f32.mrb[30].mxu1  ;;  %v1519_v8 = vpop.f32.mrb[42].mxu0 }
 0x62f   :  { %v1538_v49 = vsel %vm404_vm2, %v1535_v35, %v1537_v4  ;;  %v1544_v34 = vadd.f32 %v1537_v4, %v1395_v38  ;;  %v4652_v9 = vpop.f32.mrb[31].mxu1  ;;  %v4680_v10 = vpop.f32.mrb[43].mxu0  ;;  %v1548_v14 = vrot.slane %v1519_v8, 1 }
 0x630   :  { %v1543_v11 = vadd.f32 %v1538_v49, %v1390_v0 }
 0x634   :  { %v1403_v12 = vpop.f32.mrb[32].mxu1  ;;  %v1524_v13 = vpop.f32.mrb[44].mxu0 }
 0x635   :  { %v1549_v15 = vrot.slane %v1524_v13, 1  ;;  %v4655_v16 = vpop.f32.mrb[33].mxu1  ;;  %v4683_v17 = vpop.f32.mrb[45].mxu0 }
 0x636   :  { %v1406_v18 = vpop.f32.mrb[34].mxu1  ;;  %v1527_v19 = vpop.f32.mrb[46].mxu0 }
 0x637   :  { %v1550_v20 = vsel %vm404_vm2, %v1548_v14, %v1549_v15  ;;  %v1551_v21 = vrot.slane %v1527_v19, 1  ;;  %v4656_v36 = vpop.f32.mrb[35].mxu1  ;;  %v4684_v22 = vpop.f32.mrb[47].mxu0 }
 0x638   :  { %v1556_v47 = vadd.f32 %v1550_v20, %v1398_v7 }
 0x639   :  { %v1552_v23 = vsel %vm404_vm2, %v1549_v15, %v1551_v21  ;;  %v1558_v24 = vadd.f32 %v1551_v21, %v1406_v18 }
 0x63a   :  { %v1557_v42 = vadd.f32 %v1552_v23, %v1403_v12 }
 0x644   :  { %v1657_v43 = vpop.f32.mrb[36].mxu1  ;;  %v1806_v25 = vpop.f32.mrb[48].mxu0 }
 0x645   :  { %v4703_v26 = vpop.f32.mrb[37].mxu1  ;;  %v4731_v48 = vpop.f32.mrb[49].mxu0  ;;  %v1683_v33 = vrot.slane %v1657_v43, 2 }
 0x646   :  { %v1660_v29 = vpop.f32.mrb[38].mxu1  ;;  %v1808_v32 = vpop.f32.mrb[50].mxu0 }
 0x647   :  { %v1684_v39 = vrot.slane %v1660_v29, 2  ;;  %v4704_v40 = vpop.f32.mrb[39].mxu1  ;;  %v4732_v41 = vpop.f32.mrb[51].mxu0  ;;  %v1830_v52 = vrot.slane %v1808_v32, 3 }
 0x649   :  { %v1685_v45 = vsel %vm1042_vm5, %v1683_v33, %v1684_v39 }
 0x64a   :  { %v1691_v51 = vadd.f32 %v1685_v45, %v1542_v28 }
 0x64c   :  { %v1836_v54 = vadd.f32 %v1830_v52, %v1691_v51  ;;  %v1665_v55 = vpop.f32.mrb[40].mxu1  ;;  %v1813_v56 = vpop.f32.mrb[52].mxu0 }
 0x64d   :  { %v1686_v57 = vrot.slane %v1665_v55, 2  ;;  %v1831_v58 = vrot.slane %v1813_v56, 3  ;;  %v4707_v59 = vpop.f32.mrb[41].mxu1  ;;  %v4735_v61 = vpop.f32.mrb[53].mxu0 }
 0x64e   :  { %v1668_v62 = vpop.f32.mrb[42].mxu1  ;;  %v1816_v63 = vpop.f32.mrb[54].mxu0  ;;  %v5896_v0 = vadd.f32 %v4172_v53, %v1836_v54 }
 0x64f   :  { %v1687_v1 = vsel %vm1042_vm5, %v1684_v39, %v1686_v57  ;;  %v1693_v37 = vadd.f32 %v1686_v57, %v1544_v34  ;;  %v4708_v35 = vpop.f32.mrb[43].mxu1  ;;  %v4736_v50 = vpop.f32.mrb[55].mxu0  ;;  %v1832_v2 = vsel %vm1829_vm8, %v1830_v52, %v1831_v58  ;;  %v1697_v8 = vrot.slane %v1668_v62, 2 }
 0x650   :  { %v1863_v27 = vsel %vm1862_vm7, %v5896_v0, 0.0  ;;  %v1692_v28 = vadd.f32 %v1687_v1, %v1543_v11 }
 0x651   :  { %v1838_v38 = vadd.f32 %v1831_v58, %v1693_v37  ;;  %1864 = vadd.xlane.f32.xlu0 %v1863_v27 }
 0x652   :  { %v1837_v3 = vadd.f32 %v1832_v2, %v1692_v28 }
 0x653   :  { %v5902_v4 = vadd.f32 %v4172_v53, %v1838_v38 }
 0x654   :  { %v1673_v5 = vpop.f32.mrb[44].mxu1  ;;  %v1820_v6 = vpop.f32.mrb[56].mxu0  ;;  %v1860_v7 = vadd.f32 %v4172_v53, %v1837_v3 }
 0x655   :  { %v1698_v49 = vrot.slane %v1673_v5, 2  ;;  %v4711_v9 = vpop.f32.mrb[45].mxu1  ;;  %v4739_v34 = vpop.f32.mrb[57].mxu0  ;;  %v1868_v10 = vsel %vm1829_vm8, %v5902_v4, 0.0  ;;  %v1841_v14 = vrot.slane %v1820_v6, 3 }
 0x656   :  { %v1676_v12 = vpop.f32.mrb[46].mxu1  ;;  %1869 = vadd.xlane.f32.xlu0 %v1868_v10  ;;  %1866 = vadd.xlane.f32.xlu1 %v1860_v7  ;;  %v1823_v13 = vpop.f32.mrb[58].mxu0 }
 0x657   :  { %v1699_v11 = vsel %vm1042_vm5, %v1697_v8, %v1698_v49  ;;  %v1700_v15 = vrot.slane %v1676_v12, 2  ;;  %v1842_v16 = vrot.slane %v1823_v13, 3  ;;  %v4712_v17 = vpop.f32.mrb[47].mxu1  ;;  %v4740_v18 = vpop.f32.mrb[59].mxu0 }
 0x658   :  { %v1705_v19 = vadd.f32 %v1699_v11, %v1556_v47 }
 0x659   :  { %v1701_v20 = vsel %vm1042_vm5, %v1698_v49, %v1700_v15  ;;  %v1707_v21 = vadd.f32 %v1700_v15, %v1558_v24  ;;  %v1843_v36 = vsel %vm1829_vm8, %v1841_v14, %v1842_v16 }
 0x65a   :  { %v1847_v22 = vadd.f32 %v1841_v14, %v1705_v19  ;;  %v1706_v23 = vadd.f32 %v1701_v20, %v1557_v42 }
 0x65b   :  { %v1849_v43 = vadd.f32 %v1842_v16, %v1707_v21  ;;  %v5130_v21 = vld [vmem:[#allocation9] sm:$0xff]  }
 0x65c   :  { %v1967_v25 = vadd.f32 %v4172_v53, %v1847_v22  ;;  %v1848_v26 = vadd.f32 %v1843_v36, %v1706_v23  ;;  %v5131_v36 = vld [vmem:[#allocation9 + $0x40] sm:$0xff]   ;;  %4742 = vmatpush3.bf16.msra.mxu1 %v5130_v21  ;;  %v5132_v22 = vld [vmem:[#allocation9 + $0x8] sm:$0xff]  }
 0x65d   :  { %v1969_v32 = vadd.f32 %v4172_v53, %v1849_v43  ;;  %4770 = vmatpush3.bf16.msra.mxu0 %v5131_v36  ;;  %4743 = vmatprep.subr.bf16.mxu1 %v5868_v60  ;;  %v5133_v23 = vld [vmem:[#allocation9 + $0x48] sm:$0xff]   ;;  %v5134_v43 = vld [vmem:[#allocation9 + $0x10] sm:$0xff]  }
 0x65e   :  { %v1970_v48 = vsel %vm1862_vm7, %v1967_v25, 0.0  ;;  %v1968_v29 = vadd.f32 %v4172_v53, %v1848_v26  ;;  %4771 = vmatprep.subr.bf16.mxu0 %v5868_v60  ;;  %v5136_v26 = vld [vmem:[#allocation9 + $0x18] sm:$0xff]  }
 0x65f   :  { %1971 = vadd.xlane.f32.xlu1 %v1970_v48  ;;  %v1975_v33 = vsel %vm1829_vm8, %v1969_v32, 0.0  ;;  %v5137_v48 = vld [vmem:[#allocation9 + $0x58] sm:$0xff]  }
 0x660   :  { %1973 = vadd.xlane.f32.xlu0 %v1968_v29  ;;  %4744 = vmatpush3.bf16.msra.mxu1 %v5132_v22  ;;  %v4174_v22 = vld [vmem:[%s6380_s12] ss:$0 sm:$0xff] }
 0x661   :  { %4772 = vmatpush3.bf16.msra.mxu0 %v5133_v23  ;;  %4745 = vmatprep.subr.bf16.mxu1 %v5868_v60 }
 0x662   :  { %4773 = vmatprep.subr.bf16.mxu0 %v5868_v60 }
 0x663   :  { %1976 = vadd.xlane.f32.xlu1 %v1975_v33  ;;  %v5140_v33 = vld [vmem:[#allocation9 + $0x28] sm:$0xff]  }
 0x664   :  { %4746 = vmatpush3.bf16.msra.mxu1 %v5134_v43 }
 0x665   :  { %4747 = vmatprep.subr.bf16.mxu1 %v5868_v60 }
 0x668   :  { %4748 = vmatpush3.bf16.msra.mxu1 %v5136_v26  ;;  %v1952_v26 = vrot.slane %v5826_v46, 3 }
 0x669   :  { %4749 = vmatprep.subr.bf16.mxu1 %v5868_v60 }
 0x6de   :  { %v1865_v47 = vpop.xlane.xlu0 %1864 }
 0x6df   :  { %v1875_v40 = vrot.slane %v1865_v47, 5  ;;  %v5141_v47 = vld [vmem:[#allocation9 + $0x68] sm:$0xff]  }
 0x6e3   :  { %v1870_v39 = vpop.xlane.xlu0 %1869  ;;  %v1867_v24 = vpop.xlane.xlu1 %1866 }
 0x6e4   :  { %v1878_v41 = vrot.slane %v1870_v39, 5  ;;  %v1876_v45 = vrot.slane %v1867_v24, 5  ;;  %v5142_v39 = vld [vmem:[#allocation9 + $0x30] sm:$0xff]  }
 0x6e5   :  { %v5143_v24 = vld [vmem:[#allocation9 + $0x70] sm:$0xff]  }
 0x6e6   :  { %v1877_v42 = vsel %vm1874_vm9, %v1875_v40, %v1876_v45  ;;  %v1879_v51 = vsel %vm1874_vm9, %v1876_v45, %v1878_v41  ;;  %v5144_v40 = vld [vmem:[#allocation9 + $0x38] sm:$0xff]  }
 0x6e7   :  { %v1882_v52 = vadd.f32 %v1879_v51, %v1877_v42  ;;  %v5145_v41 = vld [vmem:[#allocation9 + $0x78] sm:$0xff]  }
 0x6e9   :  { %v1883_v54 = vrot.slane %v1882_v52, 4 }
 0x6eb   :  { %v1884_v55 = vadd.f32 %v1883_v54, %v1882_v52 }
 0x6ec   :  { %v1972_v53 = vpop.xlane.xlu1 %1971 }
 0x6ed   :  { %v1885_v56 = vrot.slane %v1884_v55, 2  ;;  %v1974_v57 = vpop.xlane.xlu0 %1973  ;;  %v1981_v59 = vrot.slane %v1972_v53, 5 }
 0x6ee   :  { %v1982_v61 = vrot.slane %v1974_v57, 5 }
 0x6ef   :  { %v1886_v58 = vadd.f32 %v1885_v56, %v1884_v55 }
 0x6f0   :  { %v1977_v62 = vpop.xlane.xlu1 %1976  ;;  %v1983_v37 = vsel %vm1874_vm9, %v1981_v59, %v1982_v61 }
 0x6f1   :  { %v1984_v63 = vrot.slane %v1977_v62, 5  ;;  %v1887_v1 = vrot.slane %v1886_v58, 1 }
 0x6f3   :  { %v1985_v35 = vsel %vm1874_vm9, %v1982_v61, %v1984_v63  ;;  %v1888_v50 = vadd.f32 %v1887_v1, %v1886_v58 }
 0x6f4   :  { %v1988_v2 = vadd.f32 %v1985_v35, %v1983_v37 }
 0x6f5   :  { %v1889_v27 = vmul.f32 0.00048828125, %v1888_v50 }
 0x6f6   :  { %v1989_v28 = vrot.slane %v1988_v2, 4 }
 0x6f7   :  { %v5915_v38 = vsub.f32 %v1860_v7, %v1889_v27  ;;  %v5918_v3 = vsub.f32 %v5896_v0, %v1889_v27  ;;  %v5921_v5 = vsub.f32 %v5902_v4, %v1889_v27 }
 0x6f8   :  { %v1990_v6 = vadd.f32 %v1989_v28, %v1988_v2 }
 0x6f9   :  { %v1894_v8 = vmul.f32 %v5915_v38, %v5915_v38  ;;  %v1893_v49 = vmul.f32 %v5918_v3, %v5918_v3  ;;  %v1895_v7 = vmul.f32 %v5921_v5, %v5921_v5 }
 0x6fa   :  { %v1991_v9 = vrot.slane %v1990_v6, 2 }
 0x6fb   :  { %1899 = vadd.xlane.f32.xlu1 %v1894_v8  ;;  %v1896_v34 = vsel %vm1862_vm7, %v1893_v49, 0.0  ;;  %v1901_v4 = vsel %vm1829_vm8, %v1895_v7, 0.0 }
 0x6fc   :  { %v1992_v10 = vadd.f32 %v1991_v9, %v1990_v6  ;;  %1897 = vadd.xlane.f32.xlu0 %v1896_v34 }
 0x6fe   :  { %v1993_v0 = vrot.slane %v1992_v10, 1 }
 0x700   :  { %1902 = vadd.xlane.f32.xlu0 %v1901_v4  ;;  %v1994_v12 = vadd.f32 %v1993_v0, %v1992_v10 }
 0x702   :  { %v1995_v13 = vmul.f32 0.00048828125, %v1994_v12 }
 0x704   :  { %v5931_v11 = vsub.f32 %v1968_v29, %v1995_v13  ;;  %v5933_v14 = vsub.f32 %v1967_v25, %v1995_v13  ;;  %v5935_v15 = vsub.f32 %v1969_v32, %v1995_v13  ;;  %v5135_v25 = vld [vmem:[#allocation9 + $0x50] sm:$0xff]   ;;  %v5138_v29 = vld [vmem:[#allocation9 + $0x20] sm:$0xff]  }
 0x705   :  { %4774 = vmatpush3.bf16.msra.mxu0 %v5135_v25  ;;  %v5139_v32 = vld [vmem:[#allocation9 + $0x60] sm:$0xff]   ;;  %4750 = vmatpush3.bf16.msra.mxu1 %v5138_v29 }
 0x706   :  { %v2000_v16 = vmul.f32 %v5931_v11, %v5931_v11  ;;  %v1999_v17 = vmul.f32 %v5933_v14, %v5933_v14  ;;  %v2001_v19 = vmul.f32 %v5935_v15, %v5935_v15  ;;  %4775 = vmatprep.subr.bf16.mxu0 %v5868_v60  ;;  %4751 = vmatprep.subr.bf16.mxu1 %v5868_v60 }
 0x708   :  { %2005 = vadd.xlane.f32.xlu0 %v2000_v16  ;;  %v2002_v18 = vsel %vm1862_vm7, %v1999_v17, 0.0  ;;  %v2007_v20 = vsel %vm1829_vm8, %v2001_v19, 0.0 }
 0x709   :  { %2003 = vadd.xlane.f32.xlu1 %v2002_v18  ;;  %4776 = vmatpush3.bf16.msra.mxu0 %v5137_v48  ;;  %v4173_v18 = vld [vmem:[%s6379_s11] ss:$0 sm:$0xff]  ;;  %v1953_v48 = vrot.slane %v5840_v31, 3 }
 0x70a   :  { %4777 = vmatprep.subr.bf16.mxu0 %v5868_v60  ;;  %4752 = vmatpush3.bf16.msra.mxu1 %v5140_v33 }
 0x70b   :  { %4753 = vmatprep.subr.bf16.mxu1 %v5868_v60 }
 0x70d   :  { %2008 = vadd.xlane.f32.xlu1 %v2007_v20  ;;  %4778 = vmatpush3.bf16.msra.mxu0 %v5139_v32 }
 0x70e   :  { %4779 = vmatprep.subr.bf16.mxu0 %v5868_v60  ;;  %4754 = vmatpush3.bf16.msra.mxu1 %v5142_v39 }
 0x70f   :  { %4755 = vmatprep.subr.bf16.mxu1 %v5868_v60 }
 0x711   :  { %4780 = vmatpush3.bf16.msra.mxu0 %v5141_v47 }
 0x712   :  { %4781 = vmatprep.subr.bf16.mxu0 %v5868_v60  ;;  %4756 = vmatpush3.bf16.msra.mxu1 %v5144_v40 }
 0x713   :  { %4797 = vmatprep.subr.bf16.mxu1 %v5868_v60 }
 0x715   :  { %4782 = vmatpush3.bf16.msra.mxu0 %v5143_v24 }
 0x716   :  { %4783 = vmatprep.subr.bf16.mxu0 %v5868_v60 }
 0x719   :  { %4784 = vmatpush3.bf16.msra.mxu0 %v5145_v41 }
 0x71a   :  { %4825 = vmatprep.subr.bf16.mxu0 %v5868_v60 }
 0x788   :  { %v1900_v45 = vpop.xlane.xlu1 %1899 }
 0x789   :  { %v1898_v42 = vpop.xlane.xlu0 %1897  ;;  %v1908_v51 = vrot.slane %v1900_v45, 5 }
 0x78a   :  { %v1907_v52 = vrot.slane %v1898_v42, 5 }
 0x78c   :  { %v1909_v53 = vsel %vm1874_vm9, %v1907_v52, %v1908_v51 }
 0x78d   :  { %v1903_v54 = vpop.xlane.xlu0 %1902 }
 0x78e   :  { %v1910_v55 = vrot.slane %v1903_v54, 5 }
 0x790   :  { %v1911_v56 = vsel %vm1874_vm9, %v1908_v51, %v1910_v55 }
 0x791   :  { %v1914_v57 = vadd.f32 %v1911_v56, %v1909_v53  ;;  %v2046_v56 = vrot.slane %v5852_v30, 3 }
 0x793   :  { %v1915_v58 = vrot.slane %v1914_v57, 4 }
 0x795   :  { %v1916_v59 = vadd.f32 %v1915_v58, %v1914_v57  ;;  %v2006_v61 = vpop.xlane.xlu0 %2005  ;;  %v2047_v57 = vrot.slane %v5854_v44, 3  ;;  %v5148_v44 = vld [vmem:[#allocation9 + $0x88] sm:$0xff]  }
 0x796   :  { %v2004_v62 = vpop.xlane.xlu1 %2003  ;;  %v2014_v37 = vrot.slane %v2006_v61, 5 }
 0x797   :  { %v1917_v63 = vrot.slane %v1916_v59, 2  ;;  %v2013_v35 = vrot.slane %v2004_v62, 5 }
 0x799   :  { %v1918_v1 = vadd.f32 %v1917_v63, %v1916_v59  ;;  %v2015_v6 = vsel %vm1874_vm9, %v2013_v35, %v2014_v37  ;;  %v5147_v35 = vld [vmem:[#allocation9 + $0xc0] sm:$0xff]  }
 0x79a   :  { %v2009_v50 = vpop.xlane.xlu1 %2008 }
 0x79b   :  { %v1919_v2 = vrot.slane %v1918_v1, 1  ;;  %v2016_v27 = vrot.slane %v2009_v50, 5 }
 0x79d   :  { %v1920_v28 = vadd.f32 %v1919_v2, %v1918_v1  ;;  %v2017_v8 = vsel %vm1874_vm9, %v2014_v37, %v2016_v27  ;;  %v5149_v27 = vld [vmem:[#allocation9 + $0xc8] sm:$0xff]  }
 0x79e   :  { %v2020_v49 = vadd.f32 %v2017_v8, %v2015_v6 }
 0x79f   :  { %v1921_v9 = vmul.f32 0.00048828125, %v1920_v28 }
 0x7a0   :  { %v2021_v34 = vrot.slane %v2020_v49, 4 }
 0x7a1   :  { %v1922_v7 = vadd.f32 1e-05, %v1921_v9  ;;  %v5150_v9 = vld [vmem:[#allocation9 + $0x90] sm:$0xff]  }
 0x7a2   :  { %v2022_v10 = vadd.f32 %v2021_v34, %v2020_v49  ;;  %v5151_v34 = vld [vmem:[#allocation9 + $0xd0] sm:$0xff]  }
 0x7a3   :  { %5226 = vrsqrt.f32 %v1922_v7 }
 0x7a4   :  { %v2023_v0 = vrot.slane %v2022_v10, 2 }
 0x7a6   :  { %v2024_v4 = vadd.f32 %v2023_v0, %v2022_v10  ;;  %v5152_v10 = vld [vmem:[#allocation9 + $0x98] sm:$0xff]  }
 0x7a7   :  { %v5153_v0 = vld [vmem:[#allocation9 + $0xd8] sm:$0xff]  }
 0x7a8   :  { %v2025_v12 = vrot.slane %v2024_v4, 1 }
 0x7aa   :  { %v2026_v13 = vadd.f32 %v2025_v12, %v2024_v4 }
 0x7ac   :  { %v2027_v16 = vmul.f32 0.00048828125, %v2026_v13  ;;  %v5154_v13 = vld [vmem:[#allocation9 + $0xa0] sm:$0xff]  }
 0x7ad   :  { %v5227_v17 = vpop.eup %5226 }
 0x7ae   :  { %v1924_v19 = vmul.f32 %v5227_v17, %v5918_v3  ;;  %v1925_v20 = vmul.f32 %v5227_v17, %v5915_v38  ;;  %v1926_v21 = vmul.f32 %v5227_v17, %v5921_v5  ;;  %v2028_v36 = vadd.f32 1e-05, %v2027_v16  ;;  %v5155_v16 = vld [vmem:[#allocation9 + $0xe0] sm:$0xff]  }
 0x7af   :  { %v1954_v5 = vsel %vm1829_vm8, %v1952_v26, %v1953_v48 }
 0x7b0   :  { %v1933_v23 = vmul.f32 %v4173_v18, %v1924_v19  ;;  %v1934_v43 = vmul.f32 %v4173_v18, %v1925_v20  ;;  %v1935_v25 = vmul.f32 %v4173_v18, %v1926_v21  ;;  %5228 = vrsqrt.f32 %v2028_v36  ;;  %v5157_v19 = vld [vmem:[#allocation9 + $0xe8] sm:$0xff]   ;;  %v5158_v20 = vld [vmem:[#allocation9 + $0xb0] sm:$0xff]   ;;  %v5160_v36 = vld [vmem:[#allocation9 + $0xb8] sm:$0xff]  }
 0x7b1   :  { %v5159_v21 = vld [vmem:[#allocation9 + $0xf0] sm:$0xff]  }
 0x7b2   :  { %v1942_v29 = vadd.f32 %v4174_v22, %v1933_v23  ;;  %v1943_v32 = vadd.f32 %v4174_v22, %v1934_v43  ;;  %v1944_v3 = vadd.f32 %v4174_v22, %v1935_v25  ;;  %v5162_v23 = vld [vmem:[#allocation9 + $0x100] sm:$0xff]   ;;  %v5163_v43 = vld [vmem:[#allocation9 + $0x108] sm:$0xff]   ;;  %v5164_v25 = vld [vmem:[#allocation9 + $0x110] sm:$0xff]  }
 0x7b4   :  { %v1945_v33 = vmax.f32 %v1942_v29, 0.0  ;;  %v1946_v38 = vmax.f32 %v1943_v32, 0.0  ;;  %v1947_v47 = vmax.f32 %v1944_v3, 0.0  ;;  %v5167_v29 = vld [vmem:[#allocation9 + $0x128] sm:$0xff]   ;;  %v5168_v32 = vld [vmem:[#allocation9 + $0x130] sm:$0xff]   ;;  %v5169_v3 = vld [vmem:[#allocation9 + $0x138] sm:$0xff]  }
 0x7b6   :  { %v1958_v39 = vadd.f32 %v1952_v26, %v1945_v33  ;;  %v1959_v24 = vadd.f32 %v1954_v5, %v1946_v38  ;;  %v1960_v40 = vadd.f32 %v1953_v48, %v1947_v47  ;;  %v5165_v26 = vld [vmem:[#allocation9 + $0x118] sm:$0xff]   ;;  %v5166_v48 = vld [vmem:[#allocation9 + $0x120] sm:$0xff]  }
 0x7b8   :  { %v1961_v41 = vmul.f32 0.70710677, %v1958_v39  ;;  %v1962_v45 = vmul.f32 0.70710677, %v1959_v24  ;;  %v1963_v42 = vmul.f32 0.70710677, %v1960_v40 }
 0x7ba   :  { %v5229_v51 = vpop.eup %5228  ;;  %1964 = vst [vmem:[#allocation2 + $0x3] sm:$0xe0] %v1961_v41  ;;  %1965 = vst [vmem:[#allocation2 + $0xb] sm:$0xff] %v1962_v45 }
 0x7bb   :  { %1966 = vst [vmem:[#allocation2 + $0x13] sm:$0x1f] %v1963_v42  ;;  %v2030_v46 = vmul.f32 %v5229_v51, %v5933_v14  ;;  %v2031_v31 = vmul.f32 %v5229_v51, %v5931_v11  ;;  %v2032_v52 = vmul.f32 %v5229_v51, %v5935_v15  ;;  %v5146_v14 = vld [vmem:[#allocation9 + $0x80] sm:$0xff]   ;;  %v2048_v11 = vsel %vm1829_vm8, %v2046_v56, %v2047_v57 }
 0x7bd   :  { %v2033_v54 = vmul.f32 %v4173_v18, %v2030_v46  ;;  %v2034_v55 = vmul.f32 %v4173_v18, %v2031_v31  ;;  %v2035_v53 = vmul.f32 %v4173_v18, %v2032_v52  ;;  %v5156_v18 = vld [vmem:[#allocation9 + $0xa8] sm:$0xff]  }
 0x7bf   :  { %v2036_v58 = vadd.f32 %v4174_v22, %v2033_v54  ;;  %v2037_v59 = vadd.f32 %v4174_v22, %v2034_v55  ;;  %v2038_v61 = vadd.f32 %v4174_v22, %v2035_v53  ;;  %v5161_v22 = vld [vmem:[#allocation9 + $0xf8] sm:$0xff]  }
 0x7c1   :  { %v2039_v62 = vmax.f32 %v2036_v58, 0.0  ;;  %v2040_v63 = vmax.f32 %v2037_v59, 0.0  ;;  %v2041_v1 = vmax.f32 %v2038_v61, 0.0  ;;  %v5982_v37 = vld [vmem:[#allocation2 + $0x8] sm:$0xff] }
 0x7c2   :  { %v5987_v15 = vpack.c.bf16 %v5982_v37, %v5868_v60  ;;  %v5997_v49 = vld [vmem:[#allocation2 + $0x10] sm:$0xff] }
 0x7c3   :  { %v2052_v50 = vadd.f32 %v2046_v56, %v2039_v62  ;;  %v2053_v30 = vadd.f32 %v2048_v11, %v2040_v63  ;;  %v2054_v2 = vadd.f32 %v2047_v57, %v2041_v1  ;;  %v6003_v7 = vpack.c.bf16 %v5868_v60, %v5997_v49 }
 0x7c4   :  { %4758 = vmatmul.mubr.bf16.vlgmr.msra.gmra.mrb[48].mxu1 %v5987_v15  ;;  %4786 = vmatmul.mubr.bf16.vlgmr.msra.gmra.mrb[60].mxu0 %v5987_v15 }
 0x7c5   :  { %v2055_v28 = vmul.f32 0.70710677, %v2052_v50  ;;  %v2056_v6 = vmul.f32 0.70710677, %v2053_v30  ;;  %v2057_v8 = vmul.f32 0.70710677, %v2054_v2  ;;  %4798 = vmatpush3.bf16.msra.mxu1 %v5146_v14  ;;  %4826 = vmatpush3.bf16.msra.mxu0 %v5147_v35 }
 0x7c6   :  { %4799 = vmatprep.subr.bf16.mxu1 %v5868_v60  ;;  %4827 = vmatprep.subr.bf16.mxu0 %v5868_v60 }
 0x7c7   :  { %2058 = vst [vmem:[#allocation2 + $0x1b] sm:$0xe0] %v2055_v28  ;;  %2059 = vst [vmem:[#allocation2 + $0x23] sm:$0xff] %v2056_v6  ;;  %4761 = vmatprep.mubr.msk.bf16.mxu1 %vm5369_vm0, %v5868_v60  ;;  %4789 = vmatprep.mubr.msk.bf16.mxu0 %vm5369_vm0, %v5868_v60 }
 0x7c8   :  { %2060 = vst [vmem:[#allocation2 + $0x2b] sm:$0x1f] %v2057_v8 }
 0x7c9   :  { %4800 = vmatpush3.bf16.msra.mxu1 %v5148_v44  ;;  %4828 = vmatpush3.bf16.msra.mxu0 %v5149_v27 }
 0x7ca   :  { %4801 = vmatprep.subr.bf16.mxu1 %v5868_v60  ;;  %4829 = vmatprep.subr.bf16.mxu0 %v5868_v60 }
 0x7cc   :  { %4762 = vmatmul.mubr.bf16.gmra.mrb[52].mxu1 %v6003_v7  ;;  %4790 = vmatmul.mubr.bf16.gmra.mrb[64].mxu0 %v6003_v7 }
 0x7cd   :  { %4802 = vmatpush3.bf16.msra.mxu1 %v5150_v9  ;;  %4830 = vmatpush3.bf16.msra.mxu0 %v5151_v34 }
 0x7ce   :  { %4803 = vmatprep.subr.bf16.mxu1 %v5868_v60  ;;  %4831 = vmatprep.subr.bf16.mxu0 %v5868_v60  ;;  %v6013_v4 = vld [vmem:[#allocation2 + $0x20] sm:$0xff] }
 0x7cf   :  { %4765 = vmatprep.mubr.msk.bf16.mxu1 %vm5369_vm0, %v5868_v60  ;;  %4793 = vmatprep.mubr.msk.bf16.mxu0 %vm5369_vm0, %v5868_v60  ;;  %v6015_v12 = vld [vmem:[#allocation2 + $0x28] sm:$0xff] }
 0x7d0   :  { %v6021_v17 = vpack.c.bf16 %v6015_v12, %v6013_v4 }
 0x7d1   :  { %4804 = vmatpush3.bf16.msra.mxu1 %v5152_v10  ;;  %4832 = vmatpush3.bf16.msra.mxu0 %v5153_v0 }
 0x7d2   :  { %4805 = vmatprep.subr.bf16.mxu1 %v5868_v60  ;;  %4833 = vmatprep.subr.bf16.mxu0 %v5868_v60 }
 0x7d4   :  { %4766 = vmatmul.mubr.bf16.gmra.mrb[56].mxu1 %v6021_v17  ;;  %4794 = vmatmul.mubr.bf16.gmra.mrb[68].mxu0 %v6021_v17 }
 0x7d5   :  { %4806 = vmatpush3.bf16.msra.mxu1 %v5154_v13  ;;  %4834 = vmatpush3.bf16.msra.mxu0 %v5155_v16 }
 0x7d6   :  { %4807 = vmatprep.subr.bf16.mxu1 %v5868_v60  ;;  %4835 = vmatprep.subr.bf16.mxu0 %v5868_v60 }
 0x7d7   :  { %4813 = vmatprep.mubr.msk.bf16.mxu1 %vm5369_vm0, %v5868_v60  ;;  %4841 = vmatprep.mubr.msk.bf16.mxu0 %vm5369_vm0, %v5868_v60 }
 0x7d9   :  { %4808 = vmatpush3.bf16.msra.mxu1 %v5156_v18  ;;  %4836 = vmatpush3.bf16.msra.mxu0 %v5157_v19 }
 0x7da   :  { %4809 = vmatprep.subr.bf16.mxu1 %v5868_v60  ;;  %4837 = vmatprep.subr.bf16.mxu0 %v5868_v60 }
 0x7dd   :  { %4810 = vmatpush3.bf16.msra.mxu1 %v5158_v20  ;;  %4838 = vmatpush3.bf16.msra.mxu0 %v5159_v21 }
 0x7de   :  { %4811 = vmatprep.subr.bf16.mxu1 %v5868_v60  ;;  %4839 = vmatprep.subr.bf16.mxu0 %v5868_v60 }
 0x7e1   :  { %4812 = vmatpush3.bf16.msra.mxu1 %v5160_v36  ;;  %4840 = vmatpush3.bf16.msra.mxu0 %v5161_v22 }
 0x7e2   :  { %4853 = vmatprep.subr.bf16.mxu1 %v5868_v60  ;;  %4881 = vmatprep.subr.bf16.mxu0 %v5868_v60 }
 0x7e4   :  { %4814 = vmatmul.mubr.bf16.vlgmr.msra.gmra.mrb[60].mxu1 %v5987_v15  ;;  %4842 = vmatmul.mubr.bf16.vlgmr.msra.gmra.mrb[72].mxu0 %v5987_v15 }
 0x7e5   :  { %4854 = vmatpush3.bf16.msra.mxu1 %v5162_v23  ;;  %4817 = vmatprep.mubr.msk.bf16.mxu1 %vm5369_vm0, %v5868_v60 }
 0x7e6   :  { %4855 = vmatprep.subr.bf16.mxu1 %v5868_v60  ;;  %4845 = vmatprep.mubr.msk.bf16.mxu0 %vm5369_vm0, %v5868_v60 }
 0x7e9   :  { %4856 = vmatpush3.bf16.msra.mxu1 %v5163_v43 }
 0x7ea   :  { %4857 = vmatprep.subr.bf16.mxu1 %v5868_v60 }
 0x7ec   :  { %4818 = vmatmul.mubr.bf16.gmra.mrb[64].mxu1 %v6003_v7  ;;  %4846 = vmatmul.mubr.bf16.gmra.mrb[76].mxu0 %v6003_v7 }
 0x7ed   :  { %4858 = vmatpush3.bf16.msra.mxu1 %v5164_v25  ;;  %4821 = vmatprep.mubr.msk.bf16.mxu1 %vm5369_vm0, %v5868_v60 }
 0x7ee   :  { %4859 = vmatprep.subr.bf16.mxu1 %v5868_v60  ;;  %4849 = vmatprep.mubr.msk.bf16.mxu0 %vm5369_vm0, %v5868_v60 }
 0x7f1   :  { %4860 = vmatpush3.bf16.msra.mxu1 %v5165_v26 }
 0x7f2   :  { %4861 = vmatprep.subr.bf16.mxu1 %v5868_v60 }
 0x7f4   :  { %4822 = vmatmul.mubr.bf16.gmra.mrb[68].mxu1 %v6021_v17  ;;  %4850 = vmatmul.mubr.bf16.gmra.mrb[80].mxu0 %v6021_v17 }
 0x7f5   :  { %4862 = vmatpush3.bf16.msra.mxu1 %v5166_v48  ;;  %4869 = vmatprep.mubr.msk.bf16.mxu1 %vm5369_vm0, %v5868_v60 }
 0x7f6   :  { %4863 = vmatprep.subr.bf16.mxu1 %v5868_v60  ;;  %4897 = vmatprep.mubr.msk.bf16.mxu0 %vm5369_vm0, %v5868_v60 }
 0x7f9   :  { %4864 = vmatpush3.bf16.msra.mxu1 %v5167_v29 }
 0x7fa   :  { %4865 = vmatprep.subr.bf16.mxu1 %v5868_v60 }
 0x7fd   :  { %4866 = vmatpush3.bf16.msra.mxu1 %v5168_v32 }
 0x7fe   :  { %4867 = vmatprep.subr.bf16.mxu1 %v5868_v60 }
 0x801   :  { %4868 = vmatpush3.bf16.msra.mxu1 %v5169_v3 }
 0x802   :  { %4909 = vmatprep.subr.bf16.mxu1 %v5868_v60 }
 0x804   :  { %4870 = vmatmul.mubr.bf16.vlgmr.msra.gmra.mrb[72].mxu1 %v5987_v15 }
 0x805   :  { %4873 = vmatprep.mubr.msk.bf16.mxu1 %vm5369_vm0, %v5868_v60 }
 0x80c   :  { %4874 = vmatmul.mubr.bf16.gmra.mrb[76].mxu1 %v6003_v7 }
 0x80d   :  { %4877 = vmatprep.mubr.msk.bf16.mxu1 %vm5369_vm0, %v5868_v60 }
 0x814   :  { %4878 = vmatmul.mubr.bf16.gmra.mrb[80].mxu1 %v6021_v17 }
 0x815   :  { %4925 = vmatprep.mubr.msk.bf16.mxu1 %vm5369_vm0, %v5868_v60 }
 0x897   :  { %v2174_v33 = vpop.f32.mrb[48].mxu1  ;;  %v2295_v38 = vpop.f32.mrb[60].mxu0 }
 0x898   :  { %v4759_v47 = vpop.f32.mrb[49].mxu1  ;;  %v4787_v5 = vpop.f32.mrb[61].mxu0  ;;  %v2321_v40 = vrot.slane %v2295_v38, 1 }
 0x899   :  { %v2177_v39 = vpop.f32.mrb[50].mxu1  ;;  %v2298_v24 = vpop.f32.mrb[62].mxu0 }
 0x89a   :  { %v2322_v41 = vrot.slane %v2298_v24, 1  ;;  %v4760_v45 = vpop.f32.mrb[51].mxu1  ;;  %v4788_v42 = vpop.f32.mrb[63].mxu0 }
 0x89c   :  { %v2323_v51 = vsel %vm404_vm2, %v2321_v40, %v2322_v41 }
 0x89d   :  { %v2329_v46 = vadd.f32 %v2323_v51, %v2174_v33 }
 0x89f   :  { %v2182_v31 = vpop.f32.mrb[52].mxu1  ;;  %v2303_v52 = vpop.f32.mrb[64].mxu0 }
 0x8a0   :  { %v2324_v54 = vrot.slane %v2303_v52, 1  ;;  %v4763_v55 = vpop.f32.mrb[53].mxu1  ;;  %v4791_v53 = vpop.f32.mrb[65].mxu0 }
 0x8a1   :  { %v2185_v56 = vpop.f32.mrb[54].mxu1  ;;  %v2306_v60 = vpop.f32.mrb[66].mxu0 }
 0x8a2   :  { %v2325_v57 = vsel %vm404_vm2, %v2322_v41, %v2324_v54  ;;  %v2331_v58 = vadd.f32 %v2324_v54, %v2182_v31  ;;  %v4764_v59 = vpop.f32.mrb[55].mxu1  ;;  %v4792_v61 = vpop.f32.mrb[67].mxu0  ;;  %v2335_v14 = vrot.slane %v2306_v60, 1 }
 0x8a3   :  { %v2330_v62 = vadd.f32 %v2325_v57, %v2177_v39 }
 0x8a7   :  { %v2190_v63 = vpop.f32.mrb[56].mxu1  ;;  %v2311_v1 = vpop.f32.mrb[68].mxu0 }
 0x8a8   :  { %v2336_v35 = vrot.slane %v2311_v1, 1  ;;  %v4767_v11 = vpop.f32.mrb[57].mxu1  ;;  %v4795_v15 = vpop.f32.mrb[69].mxu0 }
 0x8a9   :  { %v2193_v50 = vpop.f32.mrb[58].mxu1  ;;  %v2314_v30 = vpop.f32.mrb[70].mxu0 }
 0x8aa   :  { %v2337_v2 = vsel %vm404_vm2, %v2335_v14, %v2336_v35  ;;  %v2338_v44 = vrot.slane %v2314_v30, 1  ;;  %v4768_v27 = vpop.f32.mrb[59].mxu1  ;;  %v4796_v28 = vpop.f32.mrb[71].mxu0 }
 0x8ab   :  { %v2343_v6 = vadd.f32 %v2337_v2, %v2185_v56 }
 0x8ac   :  { %v2339_v8 = vsel %vm404_vm2, %v2336_v35, %v2338_v44  ;;  %v2345_v9 = vadd.f32 %v2338_v44, %v2193_v50 }
 0x8ad   :  { %v2344_v34 = vadd.f32 %v2339_v8, %v2190_v63 }
 0x8b7   :  { %v2444_v7 = vpop.f32.mrb[60].mxu1  ;;  %v2593_v10 = vpop.f32.mrb[72].mxu0 }
 0x8b8   :  { %v4815_v0 = vpop.f32.mrb[61].mxu1  ;;  %v4843_v13 = vpop.f32.mrb[73].mxu0  ;;  %v2470_v18 = vrot.slane %v2444_v7, 2  ;;  %v2619_v19 = vrot.slane %v2593_v10, 3 }
 0x8b9   :  { %v2447_v16 = vpop.f32.mrb[62].mxu1  ;;  %v2596_v17 = vpop.f32.mrb[74].mxu0 }
 0x8ba   :  { %v2471_v20 = vrot.slane %v2447_v16, 2  ;;  %v2620_v21 = vrot.slane %v2596_v17, 3  ;;  %v4816_v36 = vpop.f32.mrb[63].mxu1  ;;  %v4844_v22 = vpop.f32.mrb[75].mxu0  ;;  %v4215_v16 = vld [vmem:[%s6382_s14] ss:$0 sm:$0xff] }
 0x8bc   :  { %v2472_v23 = vsel %vm1042_vm5, %v2470_v18, %v2471_v20  ;;  %v2621_v43 = vsel %vm1829_vm8, %v2619_v19, %v2620_v21 }
 0x8bd   :  { %v2478_v25 = vadd.f32 %v2472_v23, %v2329_v46 }
 0x8bf   :  { %v2452_v26 = vpop.f32.mrb[64].mxu1  ;;  %v2601_v48 = vpop.f32.mrb[76].mxu0  ;;  %v2627_v29 = vadd.f32 %v2621_v43, %v2478_v25 }
 0x8c0   :  { %v2473_v32 = vrot.slane %v2452_v26, 2  ;;  %v2622_v3 = vrot.slane %v2601_v48, 3  ;;  %v4819_v33 = vpop.f32.mrb[65].mxu1  ;;  %v4847_v38 = vpop.f32.mrb[77].mxu0 }
 0x8c1   :  { %v2455_v47 = vpop.f32.mrb[66].mxu1  ;;  %v2604_v5 = vpop.f32.mrb[78].mxu0 }
 0x8c2   :  { %v2474_v39 = vsel %vm1042_vm5, %v2471_v20, %v2473_v32  ;;  %v2480_v24 = vadd.f32 %v2473_v32, %v2331_v58  ;;  %v2623_v40 = vsel %vm1829_vm8, %v2620_v21, %v2622_v3  ;;  %v4820_v41 = vpop.f32.mrb[67].mxu1  ;;  %v4848_v45 = vpop.f32.mrb[79].mxu0  ;;  %v2484_v54 = vrot.slane %v2455_v47, 2 }
 0x8c3   :  { %v2479_v42 = vadd.f32 %v2474_v39, %v2330_v62  ;;  %v2633_v55 = vrot.slane %v2604_v5, 3 }
 0x8c4   :  { %v2629_v51 = vadd.f32 %v2622_v3, %v2480_v24 }
 0x8c5   :  { %v2628_v31 = vadd.f32 %v2623_v40, %v2479_v42 }
 0x8c7   :  { %v2460_v46 = vpop.f32.mrb[68].mxu1  ;;  %v2609_v52 = vpop.f32.mrb[80].mxu0 }
 0x8c8   :  { %v2485_v53 = vrot.slane %v2460_v46, 2  ;;  %v2634_v56 = vrot.slane %v2609_v52, 3  ;;  %v4823_v60 = vpop.f32.mrb[69].mxu1  ;;  %v4851_v57 = vpop.f32.mrb[81].mxu0 }
 0x8c9   :  { %v2463_v59 = vpop.f32.mrb[70].mxu1  ;;  %v2612_v61 = vpop.f32.mrb[82].mxu0 }
 0x8ca   :  { %v2486_v63 = vsel %vm1042_vm5, %v2484_v54, %v2485_v53  ;;  %v2635_v58 = vsel %vm1829_vm8, %v2633_v55, %v2634_v56  ;;  %v2487_v1 = vrot.slane %v2463_v59, 2  ;;  %v2636_v14 = vrot.slane %v2612_v61, 3  ;;  %v4824_v35 = vpop.f32.mrb[71].mxu1  ;;  %v4852_v62 = vpop.f32.mrb[83].mxu0 }
 0x8cb   :  { %v2492_v11 = vadd.f32 %v2486_v63, %v2343_v6 }
 0x8cc   :  { %v2488_v15 = vsel %vm1042_vm5, %v2485_v53, %v2487_v1  ;;  %v2494_v50 = vadd.f32 %v2487_v1, %v2345_v9  ;;  %v2637_v30 = vsel %vm1829_vm8, %v2634_v56, %v2636_v14 }
 0x8cd   :  { %v2493_v2 = vadd.f32 %v2488_v15, %v2344_v34  ;;  %v2641_v44 = vadd.f32 %v2635_v58, %v2492_v11 }
 0x8ce   :  { %v2643_v27 = vadd.f32 %v2636_v14, %v2494_v50 }
 0x8cf   :  { %v2642_v28 = vadd.f32 %v2637_v30, %v2493_v2 }
 0x8d7   :  { %v2742_v8 = vpop.f32.mrb[72].mxu1 }
 0x8d8   :  { %v4871_v7 = vpop.f32.mrb[73].mxu1 }
 0x8d9   :  { %v2744_v10 = vpop.f32.mrb[74].mxu1 }
 0x8da   :  { %v2766_v0 = vrot.slane %v2744_v10, 4  ;;  %v4872_v13 = vpop.f32.mrb[75].mxu1 }
 0x8dc   :  { %v2772_v17 = vadd.f32 %v2766_v0, %v2627_v29 }
 0x8de   :  { %v6087_v6 = vadd.f32 %v4215_v16, %v2772_v17 }
 0x8df   :  { %v2749_v9 = vpop.f32.mrb[76].mxu1 }
 0x8e0   :  { %v2767_v18 = vrot.slane %v2749_v9, 4  ;;  %v4875_v19 = vpop.f32.mrb[77].mxu1  ;;  %v2799_v34 = vsel %vm2798_vm10, %v6087_v6, 0.0 }
 0x8e1   :  { %v2752_v20 = vpop.f32.mrb[78].mxu1  ;;  %2800 = vadd.xlane.f32.xlu0 %v2799_v34 }
 0x8e2   :  { %v2774_v21 = vadd.f32 %v2767_v18, %v2629_v51  ;;  %v4876_v36 = vpop.f32.mrb[79].mxu1  ;;  %v2768_v22 = vsel %vm2765_vm11, %v2766_v0, %v2767_v18 }
 0x8e3   :  { %v2773_v23 = vadd.f32 %v2768_v22, %v2628_v31 }
 0x8e4   :  { %v2797_v43 = vadd.f32 %v4215_v16, %v2774_v21 }
 0x8e5   :  { %v2796_v25 = vadd.f32 %v4215_v16, %v2773_v23 }
 0x8e6   :  { %v2804_v26 = vsel %vm2765_vm11, %v2797_v43, 0.0 }
 0x8e7   :  { %v2756_v48 = vpop.f32.mrb[80].mxu1  ;;  %2805 = vadd.xlane.f32.xlu0 %v2804_v26  ;;  %2802 = vadd.xlane.f32.xlu1 %v2796_v25 }
 0x8e8   :  { %v2777_v29 = vrot.slane %v2756_v48, 4  ;;  %v4879_v32 = vpop.f32.mrb[81].mxu1 }
 0x8e9   :  { %v2759_v3 = vpop.f32.mrb[82].mxu1 }
 0x8ea   :  { %v2783_v33 = vadd.f32 %v2777_v29, %v2641_v44  ;;  %v2778_v38 = vrot.slane %v2759_v3, 4  ;;  %v4880_v47 = vpop.f32.mrb[83].mxu1  ;;  %v5170_v3 = vld [vmem:[#allocation11] sm:$0xff]  }
 0x8eb   :  { %4882 = vmatpush3.bf16.msra.mxu0 %v5170_v3  ;;  %v5172_v47 = vld [vmem:[#allocation11 + $0x8] sm:$0xff]  }
 0x8ec   :  { %v2785_v5 = vadd.f32 %v2778_v38, %v2643_v27  ;;  %v2902_v39 = vadd.f32 %v4215_v16, %v2783_v33  ;;  %v2779_v24 = vsel %vm2765_vm11, %v2777_v29, %v2778_v38  ;;  %v5171_v33 = vld [vmem:[#allocation11 + $0x40] sm:$0xff]   ;;  %v6129_v38 = vld [vmem:[#allocation2] sm:$0xff] }
 0x8ed   :  { %v2784_v40 = vadd.f32 %v2779_v24, %v2642_v28  ;;  %4910 = vmatpush3.bf16.msra.mxu1 %v5171_v33  ;;  %4883 = vmatprep.subr.bf16.mxu0 %v6129_v38  ;;  %v5175_v24 = vld [vmem:[#allocation11 + $0x50] sm:$0xff]  }
 0x8ee   :  { %v2905_v41 = vsel %vm2798_vm10, %v2902_v39, 0.0  ;;  %v2904_v45 = vadd.f32 %v4215_v16, %v2785_v5  ;;  %4911 = vmatprep.subr.bf16.mxu1 %v6129_v38  ;;  %v5173_v5 = vld [vmem:[#allocation11 + $0x48] sm:$0xff]  }
 0x8ef   :  { %2906 = vadd.xlane.f32.xlu1 %v2905_v41  ;;  %v2903_v42 = vadd.f32 %v4215_v16, %v2784_v40  ;;  %4884 = vmatpush3.bf16.msra.mxu0 %v5172_v47  ;;  %v5176_v40 = vld [vmem:[#allocation11 + $0x18] sm:$0xff]   ;;  %v4217_v47 = vld [vmem:[%s6384_s16] ss:$0 sm:$0xff] }
 0x8f0   :  { %v2910_v51 = vsel %vm2765_vm11, %v2904_v45, 0.0  ;;  %4885 = vmatprep.subr.bf16.mxu0 %v6129_v38  ;;  %v5177_v41 = vld [vmem:[#allocation11 + $0x58] sm:$0xff]  }
 0x8f1   :  { %2908 = vadd.xlane.f32.xlu0 %v2903_v42  ;;  %4912 = vmatpush3.bf16.msra.mxu1 %v5173_v5 }
 0x8f2   :  { %4913 = vmatprep.subr.bf16.mxu1 %v6129_v38 }
 0x8f3   :  { %2911 = vadd.xlane.f32.xlu1 %v2910_v51  ;;  %v5180_v51 = vld [vmem:[#allocation11 + $0x28] sm:$0xff]  }
 0x8f5   :  { %4914 = vmatpush3.bf16.msra.mxu1 %v5175_v24 }
 0x8f6   :  { %4915 = vmatprep.subr.bf16.mxu1 %v6129_v38 }
 0x8f9   :  { %4916 = vmatpush3.bf16.msra.mxu1 %v5177_v41  ;;  %v2888_v41 = vrot.slane %v5997_v49, 4 }
 0x8fa   :  { %4917 = vmatprep.subr.bf16.mxu1 %v6129_v38 }
 0x96e   :  { %v2801_v31 = vpop.xlane.xlu0 %2800 }
 0x96f   :  { %v2810_v54 = vrot.slane %v2801_v31, 4  ;;  %v5181_v31 = vld [vmem:[#allocation11 + $0x68] sm:$0xff]  }
 0x974   :  { %v2806_v46 = vpop.xlane.xlu0 %2805  ;;  %v2803_v52 = vpop.xlane.xlu1 %2802 }
 0x975   :  { %v2813_v55 = vrot.slane %v2806_v46, 4  ;;  %v2811_v53 = vrot.slane %v2803_v52, 4  ;;  %v5182_v46 = vld [vmem:[#allocation11 + $0x30] sm:$0xff]  }
 0x976   :  { %v5183_v52 = vld [vmem:[#allocation11 + $0x70] sm:$0xff]  }
 0x977   :  { %v2812_v56 = vsel %vm2765_vm11, %v2810_v54, %v2811_v53  ;;  %v2814_v60 = vsel %vm2765_vm11, %v2811_v53, %v2813_v55  ;;  %v5184_v54 = vld [vmem:[#allocation11 + $0x38] sm:$0xff]  }
 0x978   :  { %v2817_v57 = vadd.f32 %v2814_v60, %v2812_v56  ;;  %v5185_v55 = vld [vmem:[#allocation11 + $0x78] sm:$0xff]  }
 0x97a   :  { %v2818_v59 = vrot.slane %v2817_v57, 4 }
 0x97c   :  { %v2819_v61 = vadd.f32 %v2818_v59, %v2817_v57  ;;  %v2907_v63 = vpop.xlane.xlu1 %2906 }
 0x97d   :  { %v2916_v11 = vrot.slane %v2907_v63, 4 }
 0x97e   :  { %v2820_v58 = vrot.slane %v2819_v61, 2  ;;  %v2909_v1 = vpop.xlane.xlu0 %2908 }
 0x97f   :  { %v2917_v14 = vrot.slane %v2909_v1, 4 }
 0x980   :  { %v2821_v35 = vadd.f32 %v2820_v58, %v2819_v61  ;;  %v2912_v62 = vpop.xlane.xlu1 %2911 }
 0x981   :  { %v2919_v15 = vrot.slane %v2912_v62, 4  ;;  %v2918_v30 = vsel %vm2765_vm11, %v2916_v11, %v2917_v14 }
 0x982   :  { %v2822_v50 = vrot.slane %v2821_v35, 1 }
 0x983   :  { %v2920_v2 = vsel %vm2765_vm11, %v2917_v14, %v2919_v15 }
 0x984   :  { %v2923_v44 = vadd.f32 %v2920_v2, %v2918_v30  ;;  %v2823_v27 = vadd.f32 %v2822_v50, %v2821_v35 }
 0x986   :  { %v2924_v28 = vrot.slane %v2923_v44, 4  ;;  %v2824_v8 = vmul.f32 0.00048828125, %v2823_v27 }
 0x988   :  { %v2925_v7 = vadd.f32 %v2924_v28, %v2923_v44  ;;  %v6100_v10 = vsub.f32 %v2796_v25, %v2824_v8  ;;  %v6103_v0 = vsub.f32 %v6087_v6, %v2824_v8  ;;  %v6105_v13 = vsub.f32 %v2797_v43, %v2824_v8 }
 0x98a   :  { %v2926_v16 = vrot.slane %v2925_v7, 2  ;;  %v2829_v17 = vmul.f32 %v6100_v10, %v6100_v10  ;;  %v2828_v9 = vmul.f32 %v6103_v0, %v6103_v0  ;;  %v2830_v34 = vmul.f32 %v6105_v13, %v6105_v13 }
 0x98c   :  { %v2927_v18 = vadd.f32 %v2926_v16, %v2925_v7  ;;  %2834 = vadd.xlane.f32.xlu1 %v2829_v17  ;;  %v2831_v19 = vsel %vm2798_vm10, %v2828_v9, 0.0  ;;  %v2836_v6 = vsel %vm2765_vm11, %v2830_v34, 0.0 }
 0x98d   :  { %2832 = vadd.xlane.f32.xlu0 %v2831_v19 }
 0x98e   :  { %v2928_v20 = vrot.slane %v2927_v18, 1 }
 0x990   :  { %v2929_v21 = vadd.f32 %v2928_v20, %v2927_v18 }
 0x991   :  { %2837 = vadd.xlane.f32.xlu0 %v2836_v6 }
 0x992   :  { %v2930_v36 = vmul.f32 0.00048828125, %v2929_v21 }
 0x994   :  { %v6115_v22 = vsub.f32 %v2903_v42, %v2930_v36  ;;  %v6117_v23 = vsub.f32 %v2902_v39, %v2930_v36  ;;  %v6119_v43 = vsub.f32 %v2904_v45, %v2930_v36  ;;  %v5174_v39 = vld [vmem:[#allocation11 + $0x10] sm:$0xff]   ;;  %v5178_v45 = vld [vmem:[#allocation11 + $0x20] sm:$0xff]  }
 0x995   :  { %4886 = vmatpush3.bf16.msra.mxu0 %v5174_v39  ;;  %v5179_v42 = vld [vmem:[#allocation11 + $0x60] sm:$0xff]  }
 0x996   :  { %v2935_v25 = vmul.f32 %v6115_v22, %v6115_v22  ;;  %v2934_v26 = vmul.f32 %v6117_v23, %v6117_v23  ;;  %v2936_v29 = vmul.f32 %v6119_v43, %v6119_v43  ;;  %4887 = vmatprep.subr.bf16.mxu0 %v6129_v38  ;;  %4918 = vmatpush3.bf16.msra.mxu1 %v5179_v42 }
 0x997   :  { %4919 = vmatprep.subr.bf16.mxu1 %v6129_v38 }
 0x998   :  { %2940 = vadd.xlane.f32.xlu0 %v2935_v25  ;;  %v2937_v48 = vsel %vm2798_vm10, %v2934_v26, 0.0  ;;  %v2942_v32 = vsel %vm2765_vm11, %v2936_v29, 0.0 }
 0x999   :  { %2938 = vadd.xlane.f32.xlu1 %v2937_v48  ;;  %4888 = vmatpush3.bf16.msra.mxu0 %v5176_v40  ;;  %v4216_v48 = vld [vmem:[%s6383_s15] ss:$0 sm:$0xff]  ;;  %v2887_v40 = vrot.slane %v5982_v37, 4 }
 0x99a   :  { %4889 = vmatprep.subr.bf16.mxu0 %v6129_v38  ;;  %4920 = vmatpush3.bf16.msra.mxu1 %v5181_v31 }
 0x99b   :  { %4921 = vmatprep.subr.bf16.mxu1 %v6129_v38 }
 0x99d   :  { %2943 = vadd.xlane.f32.xlu1 %v2942_v32  ;;  %4890 = vmatpush3.bf16.msra.mxu0 %v5178_v45 }
 0x99e   :  { %4891 = vmatprep.subr.bf16.mxu0 %v6129_v38  ;;  %4922 = vmatpush3.bf16.msra.mxu1 %v5183_v52 }
 0x99f   :  { %4923 = vmatprep.subr.bf16.mxu1 %v6129_v38 }
 0x9a1   :  { %4892 = vmatpush3.bf16.msra.mxu0 %v5180_v51 }
 0x9a2   :  { %4893 = vmatprep.subr.bf16.mxu0 %v6129_v38  ;;  %4924 = vmatpush3.bf16.msra.mxu1 %v5185_v55 }
 0x9a3   :  { %4965 = vmatprep.subr.bf16.mxu1 %v6129_v38 }
 0x9a5   :  { %4894 = vmatpush3.bf16.msra.mxu0 %v5182_v46 }
 0x9a6   :  { %4895 = vmatprep.subr.bf16.mxu0 %v6129_v38 }
 0x9a9   :  { %4896 = vmatpush3.bf16.msra.mxu0 %v5184_v54 }
 0x9aa   :  { %4937 = vmatprep.subr.bf16.mxu0 %v6129_v38 }
 0xa19   :  { %v2835_v53 = vpop.xlane.xlu1 %2834 }
 0xa1a   :  { %v2833_v56 = vpop.xlane.xlu0 %2832  ;;  %v2843_v60 = vrot.slane %v2835_v53, 4 }
 0xa1b   :  { %v2842_v57 = vrot.slane %v2833_v56, 4 }
 0xa1d   :  { %v2844_v63 = vsel %vm2765_vm11, %v2842_v57, %v2843_v60 }
 0xa1e   :  { %v2838_v59 = vpop.xlane.xlu0 %2837 }
 0xa1f   :  { %v2845_v61 = vrot.slane %v2838_v59, 4 }
 0xa21   :  { %v2846_v58 = vsel %vm2765_vm11, %v2843_v60, %v2845_v61 }
 0xa22   :  { %v2849_v1 = vadd.f32 %v2846_v58, %v2844_v63  ;;  %v2981_v58 = vrot.slane %v6013_v4, 4 }
 0xa24   :  { %v2850_v14 = vrot.slane %v2849_v1, 4 }
 0xa25   :  { %v2941_v62 = vpop.xlane.xlu0 %2940 }
 0xa26   :  { %v2851_v35 = vadd.f32 %v2850_v14, %v2849_v1  ;;  %v2939_v11 = vpop.xlane.xlu1 %2938  ;;  %v2949_v50 = vrot.slane %v2941_v62, 4  ;;  %v2982_v1 = vrot.slane %v6015_v12, 4 }
 0xa27   :  { %v2948_v30 = vrot.slane %v2939_v11, 4 }
 0xa28   :  { %v2852_v15 = vrot.slane %v2851_v35, 2 }
 0xa29   :  { %v2950_v8 = vsel %vm2765_vm11, %v2948_v30, %v2949_v50  ;;  %v2983_v30 = vsel %vm2765_vm11, %v2981_v58, %v2982_v1 }
 0xa2a   :  { %v2853_v2 = vadd.f32 %v2852_v15, %v2851_v35  ;;  %v2944_v44 = vpop.xlane.xlu1 %2943 }
 0xa2b   :  { %v2951_v27 = vrot.slane %v2944_v44, 4 }
 0xa2c   :  { %v2854_v28 = vrot.slane %v2853_v2, 1 }
 0xa2d   :  { %v2952_v7 = vsel %vm2765_vm11, %v2949_v50, %v2951_v27 }
 0xa2e   :  { %v2855_v16 = vadd.f32 %v2854_v28, %v2853_v2  ;;  %v2955_v17 = vadd.f32 %v2952_v7, %v2950_v8  ;;  %v5187_v2 = vld [vmem:[#allocation11 + $0xc0] sm:$0xff]   ;;  %v5188_v7 = vld [vmem:[#allocation11 + $0x88] sm:$0xff]  }
 0xa30   :  { %v2856_v9 = vmul.f32 0.00048828125, %v2855_v16  ;;  %v2956_v18 = vrot.slane %v2955_v17, 4  ;;  %v5189_v16 = vld [vmem:[#allocation11 + $0xc8] sm:$0xff]  }
 0xa32   :  { %v2857_v19 = vadd.f32 1e-05, %v2856_v9  ;;  %v2957_v34 = vadd.f32 %v2956_v18, %v2955_v17  ;;  %v5190_v9 = vld [vmem:[#allocation11 + $0x90] sm:$0xff]  }
 0xa33   :  { %v5191_v18 = vld [vmem:[#allocation11 + $0xd0] sm:$0xff]  }
 0xa34   :  { %5230 = vrsqrt.f32 %v2857_v19  ;;  %v2958_v20 = vrot.slane %v2957_v34, 2 }
 0xa36   :  { %v2959_v6 = vadd.f32 %v2958_v20, %v2957_v34  ;;  %v5192_v34 = vld [vmem:[#allocation11 + $0x98] sm:$0xff]  }
 0xa37   :  { %v5193_v20 = vld [vmem:[#allocation11 + $0xd8] sm:$0xff]  }
 0xa38   :  { %v2960_v21 = vrot.slane %v2959_v6, 1 }
 0xa3a   :  { %v2961_v36 = vadd.f32 %v2960_v21, %v2959_v6 }
 0xa3c   :  { %v2962_v25 = vmul.f32 0.00048828125, %v2961_v36  ;;  %v5194_v36 = vld [vmem:[#allocation11 + $0xa0] sm:$0xff]  }
 0xa3e   :  { %v5231_v26 = vpop.eup %5230  ;;  %v2963_v29 = vadd.f32 1e-05, %v2962_v25  ;;  %v5195_v25 = vld [vmem:[#allocation11 + $0xe0] sm:$0xff]  }
 0xa3f   :  { %v2859_v32 = vmul.f32 %v5231_v26, %v6103_v0  ;;  %v2860_v3 = vmul.f32 %v5231_v26, %v6100_v10  ;;  %v2861_v33 = vmul.f32 %v5231_v26, %v6105_v13  ;;  %v2889_v13 = vsel %vm2765_vm11, %v2887_v40, %v2888_v41 }
 0xa40   :  { %5232 = vrsqrt.f32 %v2963_v29  ;;  %v5197_v29 = vld [vmem:[#allocation11 + $0xe8] sm:$0xff]  }
 0xa41   :  { %v2868_v5 = vmul.f32 %v4216_v48, %v2859_v32  ;;  %v2869_v39 = vmul.f32 %v4216_v48, %v2860_v3  ;;  %v2870_v24 = vmul.f32 %v4216_v48, %v2861_v33  ;;  %v5198_v32 = vld [vmem:[#allocation11 + $0xb0] sm:$0xff]   ;;  %v5200_v33 = vld [vmem:[#allocation11 + $0xb8] sm:$0xff]  }
 0xa42   :  { %v5199_v3 = vld [vmem:[#allocation11 + $0xf0] sm:$0xff]  }
 0xa43   :  { %v2877_v45 = vadd.f32 %v4217_v47, %v2868_v5  ;;  %v2878_v42 = vadd.f32 %v4217_v47, %v2869_v39  ;;  %v2879_v51 = vadd.f32 %v4217_v47, %v2870_v24  ;;  %v5202_v5 = vld [vmem:[#allocation11 + $0x100] sm:$0xff]   ;;  %v5204_v24 = vld [vmem:[#allocation11 + $0x108] sm:$0xff]  }
 0xa44   :  { %v5203_v39 = vld [vmem:[#allocation11 + $0x140] sm:$0xff]  }
 0xa45   :  { %v2880_v0 = vmax.f32 %v2877_v45, 0.0  ;;  %v2881_v31 = vmax.f32 %v2878_v42, 0.0  ;;  %v2882_v10 = vmax.f32 %v2879_v51, 0.0  ;;  %v5207_v45 = vld [vmem:[#allocation11 + $0x150] sm:$0xff]   ;;  %v5208_v42 = vld [vmem:[#allocation11 + $0x118] sm:$0xff]  }
 0xa46   :  { %v5209_v51 = vld [vmem:[#allocation11 + $0x158] sm:$0xff]  }
 0xa47   :  { %v2893_v46 = vadd.f32 %v2887_v40, %v2880_v0  ;;  %v2894_v52 = vadd.f32 %v2889_v13, %v2881_v31  ;;  %v2895_v54 = vadd.f32 %v2888_v41, %v2882_v10  ;;  %v5205_v40 = vld [vmem:[#allocation11 + $0x148] sm:$0xff]   ;;  %v5206_v41 = vld [vmem:[#allocation11 + $0x110] sm:$0xff]   ;;  %v5210_v0 = vld [vmem:[#allocation11 + $0x120] sm:$0xff]  }
 0xa48   :  { %v5211_v31 = vld [vmem:[#allocation11 + $0x160] sm:$0xff]   ;;  %v5212_v10 = vld [vmem:[#allocation11 + $0x128] sm:$0xff]  }
 0xa49   :  { %v2896_v55 = vmul.f32 0.70710677, %v2893_v46  ;;  %v2897_v53 = vmul.f32 0.70710677, %v2894_v52  ;;  %v2898_v56 = vmul.f32 0.70710677, %v2895_v54 }
 0xa4a   :  { %v5233_v60 = vpop.eup %5232  ;;  %v5213_v13 = vld [vmem:[#allocation11 + $0x168] sm:$0xff]   ;;  %v5214_v46 = vld [vmem:[#allocation11 + $0x130] sm:$0xff]   ;;  %v5216_v54 = vld [vmem:[#allocation11 + $0x138] sm:$0xff]  }
 0xa4b   :  { %2899 = vst [vmem:[#allocation2 + $0x4] sm:$0xf0] %v2896_v55  ;;  %2900 = vst [vmem:[#allocation2 + $0xc] sm:$0xff] %v2897_v53  ;;  %v2965_v37 = vmul.f32 %v5233_v60, %v6117_v23  ;;  %v2966_v49 = vmul.f32 %v5233_v60, %v6115_v22  ;;  %v2967_v57 = vmul.f32 %v5233_v60, %v6119_v43  ;;  %v5186_v22 = vld [vmem:[#allocation11 + $0x80] sm:$0xff]   ;;  %v5215_v52 = vld [vmem:[#allocation11 + $0x170] sm:$0xff]  }
 0xa4c   :  { %2901 = vst [vmem:[#allocation2 + $0x14] sm:$0xf] %v2898_v56  ;;  %v5217_v55 = vld [vmem:[#allocation11 + $0x178] sm:$0xff]  }
 0xa4d   :  { %v2968_v59 = vmul.f32 %v4216_v48, %v2965_v37  ;;  %v2969_v61 = vmul.f32 %v4216_v48, %v2966_v49  ;;  %v2970_v63 = vmul.f32 %v4216_v48, %v2967_v57  ;;  %v5196_v48 = vld [vmem:[#allocation11 + $0xa8] sm:$0xff]  }
 0xa4f   :  { %v2971_v14 = vadd.f32 %v4217_v47, %v2968_v59  ;;  %v2972_v35 = vadd.f32 %v4217_v47, %v2969_v61  ;;  %v2973_v62 = vadd.f32 %v4217_v47, %v2970_v63  ;;  %v5201_v47 = vld [vmem:[#allocation11 + $0xf8] sm:$0xff]  }
 0xa51   :  { %v2974_v11 = vmax.f32 %v2971_v14, 0.0  ;;  %v2975_v15 = vmax.f32 %v2972_v35, 0.0  ;;  %v2976_v50 = vmax.f32 %v2973_v62, 0.0 }
 0xa52   :  { %v6169_v23 = vld [vmem:[#allocation2 + $0x8] sm:$0xff] }
 0xa53   :  { %v2987_v43 = vadd.f32 %v2981_v58, %v2974_v11  ;;  %v2988_v44 = vadd.f32 %v2983_v30, %v2975_v15  ;;  %v2989_v27 = vadd.f32 %v2982_v1, %v2976_v50  ;;  %v6173_v4 = vpack.c.bf16 %v6169_v23, %v6129_v38  ;;  %v6183_v17 = vld [vmem:[#allocation2 + $0x10] sm:$0xff] }
 0xa54   :  { %v6189_v19 = vpack.c.bf16 %v6129_v38, %v6183_v17 }
 0xa55   :  { %v2990_v12 = vmul.f32 0.70710677, %v2987_v43  ;;  %v2991_v28 = vmul.f32 0.70710677, %v2988_v44  ;;  %v2992_v8 = vmul.f32 0.70710677, %v2989_v27  ;;  %4898 = vmatmul.mubr.bf16.vlgmr.msra.gmra.mrb[84].mxu0 %v6173_v4  ;;  %4926 = vmatmul.mubr.bf16.vlgmr.msra.gmra.mrb[84].mxu1 %v6173_v4 }
 0xa56   :  { %4938 = vmatpush3.bf16.msra.mxu0 %v5186_v22  ;;  %4966 = vmatpush3.bf16.msra.mxu1 %v5187_v2 }
 0xa57   :  { %2993 = vst [vmem:[#allocation2 + $0x1c] sm:$0xf0] %v2990_v12  ;;  %2994 = vst [vmem:[#allocation2 + $0x24] sm:$0xff] %v2991_v28  ;;  %4939 = vmatprep.subr.bf16.mxu0 %v6129_v38  ;;  %4967 = vmatprep.subr.bf16.mxu1 %v6129_v38 }
 0xa58   :  { %2995 = vst [vmem:[#allocation2 + $0x2c] sm:$0xf] %v2992_v8  ;;  %4901 = vmatprep.mubr.msk.bf16.mxu0 %vm5369_vm0, %v6129_v38  ;;  %4929 = vmatprep.mubr.msk.bf16.mxu1 %vm5369_vm0, %v6129_v38 }
 0xa5a   :  { %4940 = vmatpush3.bf16.msra.mxu0 %v5188_v7  ;;  %4968 = vmatpush3.bf16.msra.mxu1 %v5189_v16 }
 0xa5b   :  { %4941 = vmatprep.subr.bf16.mxu0 %v6129_v38  ;;  %4969 = vmatprep.subr.bf16.mxu1 %v6129_v38 }
 0xa5d   :  { %4902 = vmatmul.mubr.bf16.gmra.mrb[88].mxu0 %v6189_v19  ;;  %4930 = vmatmul.mubr.bf16.gmra.mrb[88].mxu1 %v6189_v19 }
 0xa5e   :  { %4942 = vmatpush3.bf16.msra.mxu0 %v5190_v9  ;;  %4970 = vmatpush3.bf16.msra.mxu1 %v5191_v18  ;;  %v6199_v6 = vld [vmem:[#allocation2 + $0x20] sm:$0xff] }
 0xa5f   :  { %4943 = vmatprep.subr.bf16.mxu0 %v6129_v38  ;;  %4971 = vmatprep.subr.bf16.mxu1 %v6129_v38  ;;  %v6201_v21 = vld [vmem:[#allocation2 + $0x28] sm:$0xff] }
 0xa60   :  { %4905 = vmatprep.mubr.msk.bf16.mxu0 %vm5369_vm0, %v6129_v38  ;;  %4933 = vmatprep.mubr.msk.bf16.mxu1 %vm5369_vm0, %v6129_v38  ;;  %v6207_v26 = vpack.c.bf16 %v6201_v21, %v6199_v6 }
 0xa62   :  { %4944 = vmatpush3.bf16.msra.mxu0 %v5192_v34  ;;  %4972 = vmatpush3.bf16.msra.mxu1 %v5193_v20 }
 0xa63   :  { %4945 = vmatprep.subr.bf16.mxu0 %v6129_v38  ;;  %4973 = vmatprep.subr.bf16.mxu1 %v6129_v38 }
 0xa65   :  { %4906 = vmatmul.mubr.bf16.gmra.mrb[92].mxu0 %v6207_v26  ;;  %4934 = vmatmul.mubr.bf16.gmra.mrb[92].mxu1 %v6207_v26 }
 0xa66   :  { %4946 = vmatpush3.bf16.msra.mxu0 %v5194_v36  ;;  %4974 = vmatpush3.bf16.msra.mxu1 %v5195_v25 }
 0xa67   :  { %4947 = vmatprep.subr.bf16.mxu0 %v6129_v38  ;;  %4975 = vmatprep.subr.bf16.mxu1 %v6129_v38 }
 0xa68   :  { %4953 = vmatprep.mubr.msk.bf16.mxu0 %vm5369_vm0, %v6129_v38  ;;  %4981 = vmatprep.mubr.msk.bf16.mxu1 %vm5369_vm0, %v6129_v38 }
 0xa6a   :  { %4948 = vmatpush3.bf16.msra.mxu0 %v5196_v48  ;;  %4976 = vmatpush3.bf16.msra.mxu1 %v5197_v29 }
 0xa6b   :  { %4949 = vmatprep.subr.bf16.mxu0 %v6129_v38  ;;  %4977 = vmatprep.subr.bf16.mxu1 %v6129_v38 }
 0xa6e   :  { %4950 = vmatpush3.bf16.msra.mxu0 %v5198_v32  ;;  %4978 = vmatpush3.bf16.msra.mxu1 %v5199_v3 }
 0xa6f   :  { %4951 = vmatprep.subr.bf16.mxu0 %v6129_v38  ;;  %4979 = vmatprep.subr.bf16.mxu1 %v6129_v38 }
 0xa72   :  { %4952 = vmatpush3.bf16.msra.mxu0 %v5200_v33  ;;  %4980 = vmatpush3.bf16.msra.mxu1 %v5201_v47 }
 0xa73   :  { %4993 = vmatprep.subr.bf16.mxu0 %v6129_v38  ;;  %5021 = vmatprep.subr.bf16.mxu1 %v6129_v38 }
 0xa75   :  { %4954 = vmatmul.mubr.bf16.vlgmr.msra.gmra.mrb[96].mxu0 %v6173_v4  ;;  %4982 = vmatmul.mubr.bf16.vlgmr.msra.gmra.mrb[96].mxu1 %v6173_v4 }
 0xa76   :  { %4994 = vmatpush3.bf16.msra.mxu0 %v5202_v5  ;;  %5022 = vmatpush3.bf16.msra.mxu1 %v5203_v39 }
 0xa77   :  { %4995 = vmatprep.subr.bf16.mxu0 %v6129_v38  ;;  %5023 = vmatprep.subr.bf16.mxu1 %v6129_v38 }
 0xa78   :  { %4957 = vmatprep.mubr.msk.bf16.mxu0 %vm5369_vm0, %v6129_v38  ;;  %4985 = vmatprep.mubr.msk.bf16.mxu1 %vm5369_vm0, %v6129_v38 }
 0xa7a   :  { %4996 = vmatpush3.bf16.msra.mxu0 %v5204_v24  ;;  %5024 = vmatpush3.bf16.msra.mxu1 %v5205_v40 }
 0xa7b   :  { %4997 = vmatprep.subr.bf16.mxu0 %v6129_v38  ;;  %5025 = vmatprep.subr.bf16.mxu1 %v6129_v38 }
 0xa7d   :  { %4958 = vmatmul.mubr.bf16.gmra.mrb[100].mxu0 %v6189_v19  ;;  %4986 = vmatmul.mubr.bf16.gmra.mrb[100].mxu1 %v6189_v19 }
 0xa7e   :  { %4998 = vmatpush3.bf16.msra.mxu0 %v5206_v41  ;;  %5026 = vmatpush3.bf16.msra.mxu1 %v5207_v45 }
 0xa7f   :  { %4999 = vmatprep.subr.bf16.mxu0 %v6129_v38  ;;  %5027 = vmatprep.subr.bf16.mxu1 %v6129_v38 }
 0xa80   :  { %4961 = vmatprep.mubr.msk.bf16.mxu0 %vm5369_vm0, %v6129_v38  ;;  %4989 = vmatprep.mubr.msk.bf16.mxu1 %vm5369_vm0, %v6129_v38 }
 0xa82   :  { %5000 = vmatpush3.bf16.msra.mxu0 %v5208_v42  ;;  %5028 = vmatpush3.bf16.msra.mxu1 %v5209_v51 }
 0xa83   :  { %5001 = vmatprep.subr.bf16.mxu0 %v6129_v38  ;;  %5029 = vmatprep.subr.bf16.mxu1 %v6129_v38 }
 0xa85   :  { %4962 = vmatmul.mubr.bf16.gmra.mrb[104].mxu0 %v6207_v26  ;;  %4990 = vmatmul.mubr.bf16.gmra.mrb[104].mxu1 %v6207_v26 }
 0xa86   :  { %5002 = vmatpush3.bf16.msra.mxu0 %v5210_v0  ;;  %5030 = vmatpush3.bf16.msra.mxu1 %v5211_v31 }
 0xa87   :  { %5003 = vmatprep.subr.bf16.mxu0 %v6129_v38  ;;  %5031 = vmatprep.subr.bf16.mxu1 %v6129_v38 }
 0xa88   :  { %5009 = vmatprep.mubr.msk.bf16.mxu0 %vm5369_vm0, %v6129_v38  ;;  %5037 = vmatprep.mubr.msk.bf16.mxu1 %vm5369_vm0, %v6129_v38 }
 0xa8a   :  { %5004 = vmatpush3.bf16.msra.mxu0 %v5212_v10  ;;  %5032 = vmatpush3.bf16.msra.mxu1 %v5213_v13 }
 0xa8b   :  { %5005 = vmatprep.subr.bf16.mxu0 %v6129_v38  ;;  %5033 = vmatprep.subr.bf16.mxu1 %v6129_v38 }
 0xa8e   :  { %5006 = vmatpush3.bf16.msra.mxu0 %v5214_v46  ;;  %5034 = vmatpush3.bf16.msra.mxu1 %v5215_v52 }
 0xa8f   :  { %5007 = vmatprep.subr.bf16.mxu0 %v6129_v38  ;;  %5035 = vmatprep.subr.bf16.mxu1 %v6129_v38 }
 0xa92   :  { %5008 = vmatpush3.bf16.msra.mxu0 %v5216_v54  ;;  %5036 = vmatpush3.bf16.msra.mxu1 %v5217_v55 }
 0xa95   :  { %5010 = vmatmul.mubr.bf16.vlgmr.msra.gmra.mrb[108].mxu0 %v6173_v4  ;;  %5038 = vmatmul.mubr.bf16.vlgmr.msra.gmra.mrb[108].mxu1 %v6173_v4 }
 0xa96   :  { %5013 = vmatprep.mubr.msk.bf16.mxu0 %vm5369_vm0, %v6129_v38  ;;  %5041 = vmatprep.mubr.msk.bf16.mxu1 %vm5369_vm0, %v6129_v38 }
 0xa9d   :  { %5014 = vmatmul.mubr.bf16.gmra.mrb[112].mxu0 %v6189_v19  ;;  %5042 = vmatmul.mubr.bf16.gmra.mrb[112].mxu1 %v6189_v19 }
 0xa9e   :  { %5017 = vmatprep.mubr.msk.bf16.mxu0 %vm5369_vm0, %v6129_v38  ;;  %5045 = vmatprep.mubr.msk.bf16.mxu1 %vm5369_vm0, %v6129_v38 }
 0xaa5   :  { %5018 = vmatmul.mubr.bf16.gmra.mrb[116].mxu0 %v6207_v26  ;;  %5046 = vmatmul.mubr.bf16.gmra.mrb[116].mxu1 %v6207_v26 }
 0xb28   :  { %v3109_v53 = vpop.f32.mrb[84].mxu0  ;;  %v3230_v56 = vpop.f32.mrb[84].mxu1 }
 0xb29   :  { %v4899_v60 = vpop.f32.mrb[85].mxu0  ;;  %v4927_v37 = vpop.f32.mrb[85].mxu1  ;;  %v3256_v59 = vrot.slane %v3230_v56, 1 }
 0xb2a   :  { %v3112_v49 = vpop.f32.mrb[86].mxu0  ;;  %v3233_v57 = vpop.f32.mrb[86].mxu1 }
 0xb2b   :  { %v3257_v61 = vrot.slane %v3233_v57, 1  ;;  %v4900_v63 = vpop.f32.mrb[87].mxu0  ;;  %v4928_v58 = vpop.f32.mrb[87].mxu1 }
 0xb2d   :  { %v3258_v1 = vsel %vm404_vm2, %v3256_v59, %v3257_v61 }
 0xb2e   :  { %v3264_v14 = vadd.f32 %v3258_v1, %v3109_v53 }
 0xb30   :  { %v3117_v35 = vpop.f32.mrb[88].mxu0  ;;  %v3238_v62 = vpop.f32.mrb[88].mxu1 }
 0xb31   :  { %v3259_v38 = vrot.slane %v3238_v62, 1  ;;  %v4903_v11 = vpop.f32.mrb[89].mxu0  ;;  %v4931_v15 = vpop.f32.mrb[89].mxu1 }
 0xb32   :  { %v3120_v50 = vpop.f32.mrb[90].mxu0  ;;  %v3241_v30 = vpop.f32.mrb[90].mxu1 }
 0xb33   :  { %v3260_v22 = vsel %vm404_vm2, %v3257_v61, %v3259_v38  ;;  %v3266_v2 = vadd.f32 %v3259_v38, %v3117_v35  ;;  %v4904_v43 = vpop.f32.mrb[91].mxu0  ;;  %v4932_v44 = vpop.f32.mrb[91].mxu1  ;;  %v3270_v28 = vrot.slane %v3241_v30, 1 }
 0xb34   :  { %v3265_v27 = vadd.f32 %v3260_v22, %v3112_v49 }
 0xb38   :  { %v3125_v4 = vpop.f32.mrb[92].mxu0  ;;  %v3246_v12 = vpop.f32.mrb[92].mxu1 }
 0xb39   :  { %v3271_v8 = vrot.slane %v3246_v12, 1  ;;  %v4907_v7 = vpop.f32.mrb[93].mxu0  ;;  %v4935_v16 = vpop.f32.mrb[93].mxu1 }
 0xb3a   :  { %v3128_v9 = vpop.f32.mrb[94].mxu0  ;;  %v3249_v18 = vpop.f32.mrb[94].mxu1 }
 0xb3b   :  { %v3272_v19 = vsel %vm404_vm2, %v3270_v28, %v3271_v8  ;;  %v3273_v34 = vrot.slane %v3249_v18, 1  ;;  %v4908_v20 = vpop.f32.mrb[95].mxu0  ;;  %v4936_v36 = vpop.f32.mrb[95].mxu1 }
 0xb3c   :  { %v3278_v25 = vadd.f32 %v3272_v19, %v3120_v50 }
 0xb3d   :  { %v3274_v26 = vsel %vm404_vm2, %v3271_v8, %v3273_v34  ;;  %v3280_v48 = vadd.f32 %v3273_v34, %v3128_v9 }
 0xb3e   :  { %v3279_v29 = vadd.f32 %v3274_v26, %v3125_v4 }
 0xb48   :  { %v3379_v32 = vpop.f32.mrb[96].mxu0  ;;  %v3528_v3 = vpop.f32.mrb[96].mxu1 }
 0xb49   :  { %v4955_v33 = vpop.f32.mrb[97].mxu0  ;;  %v4983_v47 = vpop.f32.mrb[97].mxu1  ;;  %v3405_v24 = vrot.slane %v3379_v32, 2  ;;  %v3554_v40 = vrot.slane %v3528_v3, 3 }
 0xb4a   :  { %v3382_v5 = vpop.f32.mrb[98].mxu0  ;;  %v3531_v39 = vpop.f32.mrb[98].mxu1 }
 0xb4b   :  { %v3406_v41 = vrot.slane %v3382_v5, 2  ;;  %v3555_v45 = vrot.slane %v3531_v39, 3  ;;  %v4956_v42 = vpop.f32.mrb[99].mxu0  ;;  %v4984_v51 = vpop.f32.mrb[99].mxu1 }
 0xb4d   :  { %v3407_v0 = vsel %vm1042_vm5, %v3405_v24, %v3406_v41  ;;  %v3556_v31 = vsel %vm1829_vm8, %v3554_v40, %v3555_v45 }
 0xb4e   :  { %v3413_v10 = vadd.f32 %v3407_v0, %v3264_v14 }
 0xb50   :  { %v3562_v13 = vadd.f32 %v3556_v31, %v3413_v10  ;;  %v3387_v46 = vpop.f32.mrb[100].mxu0  ;;  %v3536_v52 = vpop.f32.mrb[100].mxu1 }
 0xb51   :  { %v3408_v54 = vrot.slane %v3387_v46, 2  ;;  %v3557_v55 = vrot.slane %v3536_v52, 3  ;;  %v4959_v53 = vpop.f32.mrb[101].mxu0  ;;  %v4987_v56 = vpop.f32.mrb[101].mxu1 }
 0xb52   :  { %v3390_v60 = vpop.f32.mrb[102].mxu0  ;;  %v3539_v37 = vpop.f32.mrb[102].mxu1 }
 0xb53   :  { %v3409_v49 = vsel %vm1042_vm5, %v3406_v41, %v3408_v54  ;;  %v3415_v57 = vadd.f32 %v3408_v54, %v3266_v2  ;;  %v3558_v59 = vsel %vm1829_vm8, %v3555_v45, %v3557_v55  ;;  %v4960_v61 = vpop.f32.mrb[103].mxu0  ;;  %v4988_v63 = vpop.f32.mrb[103].mxu1  ;;  %v3419_v38 = vrot.slane %v3390_v60, 2 }
 0xb54   :  { %v3414_v58 = vadd.f32 %v3409_v49, %v3265_v27  ;;  %v3568_v11 = vrot.slane %v3539_v37, 3 }
 0xb55   :  { %v3564_v1 = vadd.f32 %v3557_v55, %v3415_v57 }
 0xb56   :  { %v3563_v35 = vadd.f32 %v3558_v59, %v3414_v58 }
 0xb58   :  { %v3395_v14 = vpop.f32.mrb[104].mxu0  ;;  %v3544_v62 = vpop.f32.mrb[104].mxu1 }
 0xb59   :  { %v3420_v15 = vrot.slane %v3395_v14, 2  ;;  %v3569_v50 = vrot.slane %v3544_v62, 3  ;;  %v4963_v30 = vpop.f32.mrb[105].mxu0  ;;  %v4991_v22 = vpop.f32.mrb[105].mxu1 }
 0xb5a   :  { %v3398_v43 = vpop.f32.mrb[106].mxu0  ;;  %v3547_v44 = vpop.f32.mrb[106].mxu1 }
 0xb5b   :  { %v3421_v4 = vsel %vm1042_vm5, %v3419_v38, %v3420_v15  ;;  %v3570_v2 = vsel %vm1829_vm8, %v3568_v11, %v3569_v50  ;;  %v3422_v12 = vrot.slane %v3398_v43, 2  ;;  %v3571_v28 = vrot.slane %v3547_v44, 3  ;;  %v4964_v8 = vpop.f32.mrb[107].mxu0  ;;  %v4992_v27 = vpop.f32.mrb[107].mxu1 }
 0xb5c   :  { %v3427_v7 = vadd.f32 %v3421_v4, %v3278_v25 }
 0xb5d   :  { %v3423_v16 = vsel %vm1042_vm5, %v3420_v15, %v3422_v12  ;;  %v3429_v9 = vadd.f32 %v3422_v12, %v3280_v48  ;;  %v3572_v18 = vsel %vm1829_vm8, %v3569_v50, %v3571_v28 }
 0xb5e   :  { %v3576_v19 = vadd.f32 %v3570_v2, %v3427_v7  ;;  %v3428_v34 = vadd.f32 %v3423_v16, %v3279_v29  ;;  %v4266_v29 = vld [vmem:[%s6386_s18] ss:$0 sm:$0xff] }
 0xb5f   :  { %v3578_v20 = vadd.f32 %v3571_v28, %v3429_v9 }
 0xb60   :  { %v3577_v36 = vadd.f32 %v3572_v18, %v3428_v34 }
 0xb68   :  { %v3677_v26 = vpop.f32.mrb[108].mxu0  ;;  %v3826_v32 = vpop.f32.mrb[108].mxu1 }
 0xb69   :  { %v5011_v3 = vpop.f32.mrb[109].mxu0  ;;  %v5039_v33 = vpop.f32.mrb[109].mxu1  ;;  %v3703_v39 = vrot.slane %v3677_v26, 4 }
 0xb6a   :  { %v3680_v47 = vpop.f32.mrb[110].mxu0  ;;  %v3828_v5 = vpop.f32.mrb[110].mxu1 }
 0xb6b   :  { %v3704_v24 = vrot.slane %v3680_v47, 4  ;;  %v5012_v40 = vpop.f32.mrb[111].mxu0  ;;  %v5040_v41 = vpop.f32.mrb[111].mxu1  ;;  %v3849_v48 = vrot.slane %v3828_v5, 5 }
 0xb6d   :  { %v3705_v25 = vsel %vm2765_vm11, %v3703_v39, %v3704_v24 }
 0xb6e   :  { %v3711_v45 = vadd.f32 %v3705_v25, %v3562_v13 }
 0xb70   :  { %v3855_v42 = vadd.f32 %v3849_v48, %v3711_v45  ;;  %v3685_v51 = vpop.f32.mrb[112].mxu0  ;;  %v3833_v0 = vpop.f32.mrb[112].mxu1 }
 0xb71   :  { %v3706_v31 = vrot.slane %v3685_v51, 4  ;;  %v3850_v10 = vrot.slane %v3833_v0, 5  ;;  %v5015_v46 = vpop.f32.mrb[113].mxu0  ;;  %v5043_v52 = vpop.f32.mrb[113].mxu1 }
 0xb72   :  { %v3688_v54 = vpop.f32.mrb[114].mxu0  ;;  %v3836_v55 = vpop.f32.mrb[114].mxu1  ;;  %v6285_v53 = vadd.f32 %v4266_v29, %v3855_v42 }
 0xb73   :  { %v3707_v56 = vsel %vm2765_vm11, %v3704_v24, %v3706_v31  ;;  %v3713_v13 = vadd.f32 %v3706_v31, %v3564_v1  ;;  %v5016_v60 = vpop.f32.mrb[115].mxu0  ;;  %v5044_v37 = vpop.f32.mrb[115].mxu1  ;;  %v3851_v49 = vsel %vm1874_vm9, %v3849_v48, %v3850_v10  ;;  %v3717_v11 = vrot.slane %v3688_v54, 4 }
 0xb74   :  { %v3882_v57 = vsel %vm3881_vm12, %v6285_v53, 0.0  ;;  %v3712_v59 = vadd.f32 %v3707_v56, %v3563_v35 }
 0xb75   :  { %v3857_v61 = vadd.f32 %v3850_v10, %v3713_v13  ;;  %3883 = vadd.xlane.f32.xlu0 %v3882_v57 }
 0xb76   :  { %v3856_v63 = vadd.f32 %v3851_v49, %v3712_v59 }
 0xb77   :  { %v6291_v58 = vadd.f32 %v4266_v29, %v3857_v61 }
 0xb78   :  { %v3693_v14 = vpop.f32.mrb[116].mxu0  ;;  %v3840_v62 = vpop.f32.mrb[116].mxu1  ;;  %v3879_v38 = vadd.f32 %v4266_v29, %v3856_v63 }
 0xb79   :  { %v3718_v15 = vrot.slane %v3693_v14, 4  ;;  %v5019_v50 = vpop.f32.mrb[117].mxu0  ;;  %v5047_v1 = vpop.f32.mrb[117].mxu1  ;;  %v3887_v30 = vsel %vm1874_vm9, %v6291_v58, 0.0  ;;  %v3860_v44 = vrot.slane %v3840_v62, 5 }
 0xb7a   :  { %v3843_v22 = vpop.f32.mrb[118].mxu1  ;;  %3888 = vadd.xlane.f32.xlu0 %v3887_v30  ;;  %3885 = vadd.xlane.f32.xlu1 %v3879_v38  ;;  %v3696_v43 = vpop.f32.mrb[118].mxu0 }
 0xb7b   :  { %v3719_v35 = vsel %vm2765_vm11, %v3717_v11, %v3718_v15  ;;  %v3861_v4 = vrot.slane %v3843_v22, 5  ;;  %v3720_v2 = vrot.slane %v3696_v43, 4  ;;  %v5020_v12 = vpop.f32.mrb[119].mxu0  ;;  %v5048_v28 = vpop.f32.mrb[119].mxu1 }
 0xb7c   :  { %v3725_v8 = vadd.f32 %v3719_v35, %v3576_v19 }
 0xb7d   :  { %v3721_v27 = vsel %vm2765_vm11, %v3718_v15, %v3720_v2  ;;  %v3727_v7 = vadd.f32 %v3720_v2, %v3578_v20  ;;  %v3862_v16 = vsel %vm1874_vm9, %v3860_v44, %v3861_v4 }
 0xb7e   :  { %v3866_v9 = vadd.f32 %v3860_v44, %v3725_v8  ;;  %v3726_v18 = vadd.f32 %v3721_v27, %v3577_v36 }
 0xb7f   :  { %v3868_v34 = vadd.f32 %v3861_v4, %v3727_v7 }
 0xb80   :  { %v3985_v26 = vadd.f32 %v4266_v29, %v3866_v9  ;;  %v3867_v32 = vadd.f32 %v3862_v16, %v3726_v18 }
 0xb81   :  { %v3987_v47 = vadd.f32 %v4266_v29, %v3868_v34 }
 0xb82   :  { %v3988_v3 = vsel %vm3881_vm12, %v3985_v26, 0.0  ;;  %v3986_v33 = vadd.f32 %v4266_v29, %v3867_v32 }
 0xb83   :  { %3989 = vadd.xlane.f32.xlu1 %v3988_v3  ;;  %v3993_v5 = vsel %vm1874_vm9, %v3987_v47, 0.0 }
 0xb84   :  { %3991 = vadd.xlane.f32.xlu0 %v3986_v33 }
 0xb87   :  { %3994 = vadd.xlane.f32.xlu1 %v3993_v5 }
 0xc02   :  { %v3884_v19 = vpop.xlane.xlu0 %3883 }
 0xc03   :  { %v3893_v20 = vrot.slane %v3884_v19, 3 }
 0xc07   :  { %v3889_v39 = vpop.xlane.xlu0 %3888  ;;  %v3886_v24 = vpop.xlane.xlu1 %3885 }
 0xc08   :  { %v3896_v40 = vrot.slane %v3889_v39, 3  ;;  %v3894_v41 = vrot.slane %v3886_v24, 3 }
 0xc0a   :  { %v3895_v36 = vsel %vm1829_vm8, %v3893_v20, %v3894_v41  ;;  %v3897_v25 = vsel %vm1829_vm8, %v3894_v41, %v3896_v40 }
 0xc0b   :  { %v3900_v45 = vadd.f32 %v3897_v25, %v3895_v36 }
 0xc0d   :  { %v3901_v48 = vrot.slane %v3900_v45, 4 }
 0xc0f   :  { %v3902_v42 = vadd.f32 %v3901_v48, %v3900_v45 }
 0xc10   :  { %v3990_v51 = vpop.xlane.xlu1 %3989 }
 0xc11   :  { %v3903_v29 = vrot.slane %v3902_v42, 2  ;;  %v3992_v0 = vpop.xlane.xlu0 %3991  ;;  %v3999_v10 = vrot.slane %v3990_v51, 3 }
 0xc12   :  { %v4000_v46 = vrot.slane %v3992_v0, 3 }
 0xc13   :  { %v3904_v31 = vadd.f32 %v3903_v29, %v3902_v42 }
 0xc14   :  { %v3995_v52 = vpop.xlane.xlu1 %3994  ;;  %v4001_v56 = vsel %vm1829_vm8, %v3999_v10, %v4000_v46 }
 0xc15   :  { %v4002_v54 = vrot.slane %v3995_v52, 3  ;;  %v3905_v55 = vrot.slane %v3904_v31, 1 }
 0xc17   :  { %v4003_v13 = vsel %vm1829_vm8, %v4000_v46, %v4002_v54  ;;  %v3906_v60 = vadd.f32 %v3905_v55, %v3904_v31 }
 0xc18   :  { %v4006_v37 = vadd.f32 %v4003_v13, %v4001_v56 }
 0xc19   :  { %v3907_v49 = vmul.f32 0.00048828125, %v3906_v60  ;;  %v4267_v60 = vld [vmem:[%s6387_s19] ss:$0 sm:$0xff] }
 0xc1a   :  { %v4007_v57 = vrot.slane %v4006_v37, 4 }
 0xc1b   :  { %v6304_v59 = vsub.f32 %v3879_v38, %v3907_v49  ;;  %v6307_v61 = vsub.f32 %v6285_v53, %v3907_v49  ;;  %v6310_v63 = vsub.f32 %v6291_v58, %v3907_v49 }
 0xc1c   :  { %v4008_v14 = vadd.f32 %v4007_v57, %v4006_v37 }
 0xc1d   :  { %v3912_v62 = vmul.f32 %v6304_v59, %v6304_v59  ;;  %v3911_v11 = vmul.f32 %v6307_v61, %v6307_v61  ;;  %v3913_v38 = vmul.f32 %v6310_v63, %v6310_v63 }
 0xc1e   :  { %v4009_v15 = vrot.slane %v4008_v14, 2 }
 0xc1f   :  { %3917 = vadd.xlane.f32.xlu1 %v3912_v62  ;;  %v3914_v50 = vsel %vm3881_vm12, %v3911_v11, 0.0  ;;  %v3919_v58 = vsel %vm1874_vm9, %v3913_v38, 0.0  ;;  %v4268_v62 = vld [vmem:[%s6408_s25] ss:$0 sm:$0xff]  ;;  %v3970_v38 = vrot.slane %v6169_v23, 5 }
 0xc20   :  { %v4010_v1 = vadd.f32 %v4009_v15, %v4008_v14  ;;  %3915 = vadd.xlane.f32.xlu0 %v3914_v50 }
 0xc22   :  { %v4011_v53 = vrot.slane %v4010_v1, 1 }
 0xc24   :  { %3920 = vadd.xlane.f32.xlu0 %v3919_v58  ;;  %v4012_v30 = vadd.f32 %v4011_v53, %v4010_v1  ;;  %v3971_v1 = vrot.slane %v6183_v17, 5 }
 0xc26   :  { %v4013_v22 = vmul.f32 0.00048828125, %v4012_v30 }
 0xc28   :  { %v6320_v43 = vsub.f32 %v3986_v33, %v4013_v22  ;;  %v6322_v35 = vsub.f32 %v3985_v26, %v4013_v22  ;;  %v6324_v44 = vsub.f32 %v3987_v47, %v4013_v22 }
 0xc2a   :  { %v4018_v4 = vmul.f32 %v6320_v43, %v6320_v43  ;;  %v4017_v2 = vmul.f32 %v6322_v35, %v6322_v35  ;;  %v4019_v28 = vmul.f32 %v6324_v44, %v6324_v44 }
 0xc2c   :  { %4023 = vadd.xlane.f32.xlu0 %v4018_v4  ;;  %v4020_v12 = vsel %vm3881_vm12, %v4017_v2, 0.0  ;;  %v4025_v8 = vsel %vm1874_vm9, %v4019_v28, 0.0 }
 0xc2d   :  { %4021 = vadd.xlane.f32.xlu1 %v4020_v12 }
 0xc31   :  { %4026 = vadd.xlane.f32.xlu1 %v4025_v8 }
 0xcac   :  { %v3918_v27 = vpop.xlane.xlu1 %3917 }
 0xcad   :  { %v3916_v7 = vpop.xlane.xlu0 %3915  ;;  %v3926_v16 = vrot.slane %v3918_v27, 3 }
 0xcae   :  { %v3925_v9 = vrot.slane %v3916_v7, 3 }
 0xcb0   :  { %v3927_v26 = vsel %vm1829_vm8, %v3925_v9, %v3926_v16 }
 0xcb1   :  { %v3921_v18 = vpop.xlane.xlu0 %3920 }
 0xcb2   :  { %v3928_v34 = vrot.slane %v3921_v18, 3 }
 0xcb4   :  { %v3929_v32 = vsel %vm1829_vm8, %v3926_v16, %v3928_v34 }
 0xcb5   :  { %v3932_v3 = vadd.f32 %v3929_v32, %v3927_v26  ;;  %v4064_v26 = vrot.slane %v6199_v6, 5  ;;  %v4065_v32 = vrot.slane %v6201_v21, 5 }
 0xcb7   :  { %v3933_v33 = vrot.slane %v3932_v3, 4  ;;  %v4066_v6 = vsel %vm1874_vm9, %v4064_v26, %v4065_v32 }
 0xcb9   :  { %v3934_v47 = vadd.f32 %v3933_v33, %v3932_v3  ;;  %v4024_v5 = vpop.xlane.xlu0 %4023 }
 0xcba   :  { %v4022_v19 = vpop.xlane.xlu1 %4021  ;;  %v4032_v20 = vrot.slane %v4024_v5, 3 }
 0xcbb   :  { %v3935_v39 = vrot.slane %v3934_v47, 2  ;;  %v4031_v40 = vrot.slane %v4022_v19, 3 }
 0xcbd   :  { %v3936_v24 = vadd.f32 %v3935_v39, %v3934_v47  ;;  %v4033_v48 = vsel %vm1829_vm8, %v4031_v40, %v4032_v20 }
 0xcbe   :  { %v4027_v41 = vpop.xlane.xlu1 %4026 }
 0xcbf   :  { %v3937_v36 = vrot.slane %v3936_v24, 1  ;;  %v4034_v25 = vrot.slane %v4027_v41, 3 }
 0xcc1   :  { %v3938_v45 = vadd.f32 %v3937_v36, %v3936_v24  ;;  %v4035_v42 = vsel %vm1829_vm8, %v4032_v20, %v4034_v25 }
 0xcc2   :  { %v4038_v51 = vadd.f32 %v4035_v42, %v4033_v48 }
 0xcc3   :  { %v3939_v29 = vmul.f32 0.00048828125, %v3938_v45 }
 0xcc4   :  { %v4039_v0 = vrot.slane %v4038_v51, 4 }
 0xcc5   :  { %v3940_v31 = vadd.f32 1e-05, %v3939_v29 }
 0xcc6   :  { %v4040_v10 = vadd.f32 %v4039_v0, %v4038_v51 }
 0xcc7   :  { %5234 = vrsqrt.f32 %v3940_v31 }
 0xcc8   :  { %v4041_v46 = vrot.slane %v4040_v10, 2 }
 0xcca   :  { %v4042_v52 = vadd.f32 %v4041_v46, %v4040_v10 }
 0xccc   :  { %v4043_v54 = vrot.slane %v4042_v52, 1 }
 0xcce   :  { %v4044_v55 = vadd.f32 %v4043_v54, %v4042_v52 }
 0xcd0   :  { %v4045_v56 = vmul.f32 0.00048828125, %v4044_v55 }
 0xcd1   :  { %v5235_v13 = vpop.eup %5234 }
 0xcd2   :  { %v3942_v37 = vmul.f32 %v5235_v13, %v6307_v61  ;;  %v3943_v49 = vmul.f32 %v5235_v13, %v6304_v59  ;;  %v3944_v57 = vmul.f32 %v5235_v13, %v6310_v63  ;;  %v4046_v14 = vadd.f32 1e-05, %v4045_v56 }
 0xcd3   :  { %v3972_v63 = vsel %vm1874_vm9, %v3970_v38, %v3971_v1 }
 0xcd4   :  { %v3951_v11 = vmul.f32 %v4267_v60, %v3942_v37  ;;  %v3952_v15 = vmul.f32 %v4267_v60, %v3943_v49  ;;  %v3953_v50 = vmul.f32 %v4267_v60, %v3944_v57  ;;  %5236 = vrsqrt.f32 %v4046_v14 }
 0xcd6   :  { %v3960_v53 = vadd.f32 %v4268_v62, %v3951_v11  ;;  %v3961_v58 = vadd.f32 %v4268_v62, %v3952_v15  ;;  %v3962_v61 = vadd.f32 %v4268_v62, %v3953_v50 }
 0xcd8   :  { %v3963_v30 = vmax.f32 %v3960_v53, 0.0  ;;  %v3964_v59 = vmax.f32 %v3961_v58, 0.0  ;;  %v3965_v22 = vmax.f32 %v3962_v61, 0.0 }
 0xcda   :  { %v3976_v4 = vadd.f32 %v3970_v38, %v3963_v30  ;;  %v3977_v2 = vadd.f32 %v3972_v63, %v3964_v59  ;;  %v3978_v12 = vadd.f32 %v3971_v1, %v3965_v22 }
 0xcdc   :  { %v3979_v28 = vmul.f32 0.70710677, %v3976_v4  ;;  %v3980_v8 = vmul.f32 0.70710677, %v3977_v2  ;;  %v3981_v27 = vmul.f32 0.70710677, %v3978_v12 }
 0xcde   :  { %v5237_v7 = vpop.eup %5236  ;;  %3982 = vst [vmem:[#allocation2 + $0x5] sm:$0xf8] %v3979_v28  ;;  %3983 = vst [vmem:[#allocation2 + $0xd] sm:$0xff] %v3980_v8 }
 0xcdf   :  { %3984 = vst [vmem:[#allocation2 + $0x15] sm:$0x7] %v3981_v27  ;;  %v4048_v23 = vmul.f32 %v5237_v7, %v6322_v35  ;;  %v4049_v17 = vmul.f32 %v5237_v7, %v6320_v43  ;;  %v4050_v16 = vmul.f32 %v5237_v7, %v6324_v44 }
 0xce1   :  { %v4051_v9 = vmul.f32 %v4267_v60, %v4048_v23  ;;  %v4052_v18 = vmul.f32 %v4267_v60, %v4049_v17  ;;  %v4053_v34 = vmul.f32 %v4267_v60, %v4050_v16 }
 0xce3   :  { %v4054_v3 = vadd.f32 %v4268_v62, %v4051_v9  ;;  %v4055_v33 = vadd.f32 %v4268_v62, %v4052_v18  ;;  %v4056_v47 = vadd.f32 %v4268_v62, %v4053_v34 }
 0xce5   :  { %v4079_v5 = vld [vmem:[#allocation2 + $0x8] sm:$0xff]  ;;  %v4057_v39 = vmax.f32 %v4054_v3, 0.0  ;;  %v4058_v24 = vmax.f32 %v4055_v33, 0.0  ;;  %v4059_v20 = vmax.f32 %v4056_v47, 0.0 }
 0xce6   :  { %v4080_v19 = vld [vmem:[#allocation2 + $0x10] sm:$0xff]  ;;  %4081 = vst [vmem:[%s6409_s2] sm:$0xff] %v4079_v5 }
 0xce7   :  { %4082 = vst [vmem:[%s6409_s2 + $0x8] sm:$0xff] %v4080_v19  ;;  %v4070_v43 = vadd.f32 %v4064_v26, %v4057_v39  ;;  %v4071_v21 = vadd.f32 %v4066_v6, %v4058_v24  ;;  %v4072_v35 = vadd.f32 %v4065_v32, %v4059_v20 }
 0xce9   :  { %v4073_v44 = vmul.f32 0.70710677, %v4070_v43  ;;  %v4074_v40 = vmul.f32 0.70710677, %v4071_v21  ;;  %v4075_v41 = vmul.f32 0.70710677, %v4072_v35 }
 0xceb   :  { %4076 = vst [vmem:[#allocation2 + $0x1d] sm:$0xf8] %v4073_v44  ;;  %4077 = vst [vmem:[#allocation2 + $0x25] sm:$0xff] %v4074_v40 }
 0xcec   :  { %4078 = vst [vmem:[#allocation2 + $0x2d] sm:$0x7] %v4075_v41 }
 0xcf2   :  { %v4083_v36 = vld [vmem:[#allocation2 + $0x20] sm:$0xff] }
 0xcf3   :  { %v4084_v25 = vld [vmem:[#allocation2 + $0x28] sm:$0xff]  ;;  %4085 = vst [vmem:[%s6409_s2 + $0x10] sm:$0xff] %v4083_v36 }
 0xcf4   :  { %4086 = vst [vmem:[%s6409_s2 + $0x18] sm:$0xff] %v4084_v25 }
 0xcf5   :  { %4091 = vsyncpa [#allocation5], 1 }
 0xcf6   :  { %4092 = vsyncpa [#allocation7], 1 }
 0xcf7   :  { %4093 = vsyncpa [#allocation10], 1 }

</bundles_post_ra>
